<compile_context>
chip_gen: v5e
topology: v5e:2x2
jax: 0.10.0
libtpu: 0.0.40
codegen_flags: <defaults>
</compile_context>

<pallas_src>
import functools

import numpy as np
import jax
import jax.numpy as jnp
from jax.experimental import pallas as pl
from jax.experimental.pallas import tpu as pltpu


def _arap_kernel(lapT_ref, a_ref, b_ref, out_ref):
    # lapT_ref: (TK, TJ) int8   lapT[k, j] = L[j, k]  (0/1 adjacency mask)
    # a_ref   : (B, TK, 8) f32  vertex-k features  [ s(3),  d(3), P_k, 1 ]
    # b_ref   : (B, 8, TJ) f32  vertex-j features  [-d(3), -s(3), 1,  P_j]
    # out_ref : (B, TJ)    f32  resident accumulator across the k grid axis
    @pl.when(pl.program_id(1) == 0)
    def _():
        out_ref[...] = jnp.zeros_like(out_ref)

    # Single narrow compare, shared across the batch (no f32 mask temp).
    mask_nz = lapT_ref[...] != 0                                   # (TK, TJ) bool

    nb = a_ref.shape[0]
    # Static loop: B (frames) is small for this loss; the mask -- the only
    # O(nv^2) HBM stream -- is read once per tile, not B times.
    # TODO(synk): switch to lax.fori_loop(..., unroll=True) if B grows past ~8.
    for b in range(nb):
        # acc[k,j] = P_k + P_j - sum_i s_k,i d_j,i - sum_i d_k,i s_j,i
        #          = diffx - diffdx  for masked entries.  One MXU matmul.
        acc = jnp.dot(a_ref[b], b_ref[b],
                      precision=jax.lax.Precision.HIGHEST,
                      preferred_element_type=jnp.float32)          # (TK, TJ)
        # masked |.|, reduce over k (sublanes) -> lane-dense (1, TJ) row
        row = jnp.sum(jnp.where(mask_nz, jnp.abs(acc), 0.0),
                      axis=0, keepdims=True)
        out_ref[b:b + 1, :] += row


def _pick_tiles(nvp, tj, tk):
    """Tile sizes dividing nvp. TJ: lanes (multiple of 128, capped at nvp//2 so
    the 'parallel' j axis has >=2 steps for v7x megacore). TK: sublanes of the
    int8 mask tile (multiple of 32)."""
    tj = min(tj, nvp)
    if nvp >= 256:
        tj = min(tj, max(128, nvp // 2))
    tj = max(128, tj - tj % 128)
    while nvp % tj:
        tj -= 128
    tk = min(tk, nvp)
    tk = max(32, tk - tk % 32)
    while nvp % tk:
        tk -= 32
    return tj, tk


def _arap_forward(lapT, dx, x, *, nv, nvp, tj, tk):
    """lapT: (nvp, nvp) int8 cached mask; dx/x: (B, nv, 3) -> (B, nv) f32."""
    B = x.shape[0]
    x = x.astype(jnp.float32)
    dx = dx.astype(jnp.float32)
    s = x + dx
    d = x - dx
    p = jnp.sum(s * d, axis=-1, keepdims=True)          # (B, nv, 1) = sum x^2 - dx^2
    one = jnp.ones_like(p)

    # k-side operand: vertices on sublanes, 8 features on lanes.
    a_op = jnp.concatenate([s, d, p, one], axis=-1)                      # (B, nv, 8)
    # j-side operand: 8 features on sublanes, vertices on lanes.
    b_op = jnp.transpose(jnp.concatenate([-d, -s, one, p], axis=-1),
                         (0, 2, 1))                                      # (B, 8, nv)

    pad = nvp - nv
    if pad:
        a_op = jnp.pad(a_op, ((0, 0), (0, pad), (0, 0)))
        b_op = jnp.pad(b_op, ((0, 0), (0, 0), (0, pad)))

    grid = (nvp // tj, nvp // tk)                 # (j: parallel, k: reduction)

    out = pl.pallas_call(
        _arap_kernel,
        out_shape=jax.ShapeDtypeStruct((B, nvp), jnp.float32),
        grid_spec=pltpu.PrefetchScalarGridSpec(
            num_scalar_prefetch=0,
            grid=grid,
            in_specs=[
                pl.BlockSpec((tk, tj), lambda j, k: (k, j)),        # int8 mask (transposed)
                pl.BlockSpec((B, tk, 8), lambda j, k: (0, k, 0)),   # k-side features
                pl.BlockSpec((B, 8, tj), lambda j, k: (0, 0, j)),   # j-side features
            ],
            out_specs=pl.BlockSpec((B, tj), lambda j, k: (0, j)),
        ),
        compiler_params=pltpu.CompilerParams(
            dimension_semantics=("parallel", "arbitrary"),
            vmem_limit_bytes=48 * 1024 * 1024),
    )(lapT, a_op, b_op)

    return out[:, :nv]


class PreframeARAPLoss:
    """JAX/Pallas port of the PyTorch module.  Build once (caches the padded,
    transposed int8 adjacency mask); call like the module: loss(dx, x)."""

    def __init__(self, points, faces, average=False, *, tj=1024, tk=512):
        points = np.asarray(points)
        faces = np.asarray(faces)
        self.nv = int(points.shape[0])
        self.nf = int(faces.shape[0])
        self.average = average          # unused by forward (matches PyTorch)

        lap = np.zeros((self.nv, self.nv), dtype=np.int8)
        lap[faces[:, 0], faces[:, 1]] = 1
        lap[faces[:, 1], faces[:, 0]] = 1
        lap[faces[:, 1], faces[:, 2]] = 1
        lap[faces[:, 2], faces[:, 1]] = 1
        lap[faces[:, 2], faces[:, 0]] = 1
        lap[faces[:, 0], faces[:, 2]] = 1

        # Pad to a tile-friendly size and cache the transposed int8 mask ONCE
        # (this O(nv^2) preprocessing used to run on every call).
        pad_to = 1024 if self.nv >= 1024 else 256
        self.nvp = int(pl.cdiv(self.nv, pad_to) * pad_to)
        lapT = np.zeros((self.nvp, self.nvp), dtype=np.int8)
        lapT[: self.nv, : self.nv] = lap.T
        self.lapT = jnp.asarray(lapT)

        self.TJ, self.TK = _pick_tiles(self.nvp, tj, tk)
        self._forward = jax.jit(functools.partial(
            _arap_forward, nv=self.nv, nvp=self.nvp, tj=self.TJ, tk=self.TK))

    def __call__(self, dx, x):
        return self._forward(self.lapT, dx, x)


def build_laplacian(nv, faces):
    """Replicates the __init__ adjacency construction (0/1 float32 matrix)."""
    lap = np.zeros((nv, nv), dtype=np.float32)
    lap[faces[:, 0], faces[:, 1]] = 1
    lap[faces[:, 1], faces[:, 0]] = 1
    lap[faces[:, 1], faces[:, 2]] = 1
    lap[faces[:, 2], faces[:, 1]] = 1
    lap[faces[:, 2], faces[:, 0]] = 1
    lap[faces[:, 0], faces[:, 2]] = 1
    return jnp.asarray(lap)


def reference_arap_loss(laplacian, dx, x):
    """Pure-JAX reference reproducing the PyTorch forward exactly."""
    lap = laplacian
    tx = lap[None, :, :, None] * x[:, None, :, :] - x[:, :, None, :]
    tdx = lap[None, :, :, None] * dx[:, None, :, :] - dx[:, :, None, :]
    diffx = jnp.sum(tx ** 2, axis=-1)
    diffdx = jnp.sum(tdx ** 2, axis=-1)
    diff = jnp.abs(diffx - diffdx)
    return jnp.sum(diff * (lap != 0.0)[None].astype(diff.dtype), axis=2)


if __name__ == "__main__":
    B, nv = 2, 64

    # Deterministic synthetic mesh connectivity (faces of a "ring" mesh).
    faces = np.stack(
        [np.arange(nv),
         (np.arange(nv) + 1) % nv,
         (np.arange(nv) + 5) % nv], axis=1).astype(np.int32)        # (nv, 3)
    points = np.zeros((nv, 3), dtype=np.float32)                    # only nv is used

    loss_mod = PreframeARAPLoss(points, faces)

    key = jax.random.PRNGKey(0)
    kx, kdx = jax.random.split(key)
    x = jax.random.normal(kx, (B, nv, 3), dtype=jnp.float32)
    dx = x + 0.05 * jax.random.normal(kdx, (B, nv, 3), dtype=jnp.float32)

    out = jax.block_until_ready(loss_mod(dx, x))

    ref = reference_arap_loss(build_laplacian(nv, faces), dx, x)
    np.testing.assert_allclose(np.asarray(out), np.asarray(ref),
                               rtol=1e-4, atol=1e-4)
    print("KERNEL_OK")
</pallas_src>

<mosaic_0001>
module attributes {stable_mosaic.version = 11 : i64} {
  func.func @_arap_kernel(%arg0: i32, %arg1: i32, %arg2: memref<256x128xi8, #tpu.memory_space<vmem>>, %arg3: memref<2x256x8xf32, #tpu.memory_space<vmem>>, %arg4: memref<2x8x128xf32, #tpu.memory_space<vmem>>, %arg5: memref<2x128xf32, #tpu.memory_space<vmem>>) attributes {dimension_semantics = [#tpu.dimension_semantics<parallel>, #tpu.dimension_semantics<arbitrary>], iteration_bounds = array<i64: 2, 1>, scalar_prefetch = 0 : i64, scratch_operands = 0 : i64, tpu.core_type = #tpu.core_type<tc>, window_params = [{transform_indices = @transform_0, window_bounds = array<i64: 256, 128>}, {transform_indices = @transform_1, window_bounds = array<i64: 2, 256, 8>}, {transform_indices = @transform_2, window_bounds = array<i64: 2, 8, 128>}, {transform_indices = @transform_3, window_bounds = array<i64: 2, 128>}]} {
    %c0_i32 = arith.constant 0 : i32
    %0 = arith.cmpi eq, %arg1, %c0_i32 : i32
    %1 = arith.extui %0 : i1 to i32
    %c0_i32_0 = arith.constant 0 : i32
    %2 = arith.cmpi ne, %1, %c0_i32_0 : i32
    scf.if %2 {
      %cst_26 = arith.constant 0.000000e+00 : f32
      %32 = vector.broadcast %cst_26 : f32 to vector<2x128xf32>
      %c0_27 = arith.constant 0 : index
      %c0_28 = arith.constant 0 : index
      %33 = vector.load %arg5[%c0_27, %c0_28] : memref<2x128xf32, #tpu.memory_space<vmem>>, vector<2x128xf32>
      tpu.vector_store %arg5[%c0_27, %c0_28], %32 {strides = array<i32>} : memref<2x128xf32, #tpu.memory_space<vmem>>, vector<2x128xf32>,
    } else {
    }
    %c0 = arith.constant 0 : index
    %c0_1 = arith.constant 0 : index
    %3 = vector.load %arg2[%c0, %c0_1] : memref<256x128xi8, #tpu.memory_space<vmem>>, vector<256x128xi8>
    %c0_i8 = arith.constant 0 : i8
    %4 = vector.broadcast %c0_i8 : i8 to vector<256x128xi8>
    %5 = arith.cmpi ne, %3, %4 : vector<256x128xi8>
    %c0_2 = arith.constant 0 : index
    %c0_3 = arith.constant 0 : index
    %c0_4 = arith.constant 0 : index
    %6 = vector.load %arg3[%c0_2, %c0_3, %c0_4] : memref<2x256x8xf32, #tpu.memory_space<vmem>>, vector<1x256x8xf32>
    %7 = vector.shape_cast %6 : vector<1x256x8xf32> to vector<256x8xf32>
    %c0_5 = arith.constant 0 : index
    %c0_6 = arith.constant 0 : index
    %c0_7 = arith.constant 0 : index
    %8 = vector.load %arg4[%c0_5, %c0_6, %c0_7] : memref<2x8x128xf32, #tpu.memory_space<vmem>>, vector<1x8x128xf32>
    %9 = vector.shape_cast %8 : vector<1x8x128xf32> to vector<8x128xf32>
    %cst = arith.constant dense<0.000000e+00> : vector<256x128xf32>
    %10 = tpu.matmul %7, %9, %cst {dimension_numbers = #tpu.dot_dimension_numbers<[1], [0], [0], [1], [0, 0, 1, 1], [], []>, precision = #tpu.contract_precision<fp32>} : vector<256x8xf32>, vector<8x128xf32>, vector<256x128xf32> -> vector<256x128xf32>
    %11 = math.absf %10 : vector<256x128xf32>
    %cst_8 = arith.constant 0.000000e+00 : f32
    %12 = vector.broadcast %cst_8 : f32 to vector<256x128xf32>
    %13 = arith.select %5, %11, %12 : vector<256x128xi1>, vector<256x128xf32>
    %cst_9 = arith.constant dense<0.000000e+00> : vector<128xf32>
    %14 = vector.multi_reduction <add>, %13, %cst_9 [0] : vector<256x128xf32> to vector<128xf32>
    %15 = vector.shape_cast %14 : vector<128xf32> to vector<1x128xf32>
    %c0_10 = arith.constant 0 : index
    %c0_11 = arith.constant 0 : index
    %16 = vector.load %arg5[%c0_10, %c0_11] : memref<2x128xf32, #tpu.memory_space<vmem>>, vector<1x128xf32>
    %17 = arith.addf %16, %15 : vector<1x128xf32>
    %c0_12 = arith.constant 0 : index
    %c0_13 = arith.constant 0 : index
    %18 = vector.load %arg5[%c0_12, %c0_13] : memref<2x128xf32, #tpu.memory_space<vmem>>, vector<1x128xf32>
    tpu.vector_store %arg5[%c0_12, %c0_13], %17 {strides = array<i32>} : memref<2x128xf32, #tpu.memory_space<vmem>>, vector<1x128xf32>,
    %c1 = arith.constant 1 : index
    %c0_14 = arith.constant 0 : index
    %c0_15 = arith.constant 0 : index
    %19 = vector.load %arg3[%c1, %c0_14, %c0_15] : memref<2x256x8xf32, #tpu.memory_space<vmem>>, vector<1x256x8xf32>
    %20 = vector.shape_cast %19 : vector<1x256x8xf32> to vector<256x8xf32>
    %c1_16 = arith.constant 1 : index
    %c0_17 = arith.constant 0 : index
    %c0_18 = arith.constant 0 : index
    %21 = vector.load %arg4[%c1_16, %c0_17, %c0_18] : memref<2x8x128xf32, #tpu.memory_space<vmem>>, vector<1x8x128xf32>
    %22 = vector.shape_cast %21 : vector<1x8x128xf32> to vector<8x128xf32>
    %cst_19 = arith.constant dense<0.000000e+00> : vector<256x128xf32>
    %23 = tpu.matmul %20, %22, %cst_19 {dimension_numbers = #tpu.dot_dimension_numbers<[1], [0], [0], [1], [0, 0, 1, 1], [], []>, precision = #tpu.contract_precision<fp32>} : vector<256x8xf32>, vector<8x128xf32>, vector<256x128xf32> -> vector<256x128xf32>
    %24 = math.absf %23 : vector<256x128xf32>
    %cst_20 = arith.constant 0.000000e+00 : f32
    %25 = vector.broadcast %cst_20 : f32 to vector<256x128xf32>
    %26 = arith.select %5, %24, %25 : vector<256x128xi1>, vector<256x128xf32>
    %cst_21 = arith.constant dense<0.000000e+00> : vector<128xf32>
    %27 = vector.multi_reduction <add>, %26, %cst_21 [0] : vector<256x128xf32> to vector<128xf32>
    %28 = vector.shape_cast %27 : vector<128xf32> to vector<1x128xf32>
    %c1_22 = arith.constant 1 : index
    %c0_23 = arith.constant 0 : index
    %29 = vector.load %arg5[%c1_22, %c0_23] : memref<2x128xf32, #tpu.memory_space<vmem>>, vector<1x128xf32>
    %30 = arith.addf %29, %28 : vector<1x128xf32>
    %c1_24 = arith.constant 1 : index
    %c0_25 = arith.constant 0 : index
    %31 = vector.load %arg5[%c1_24, %c0_25] : memref<2x128xf32, #tpu.memory_space<vmem>>, vector<1x128xf32>
    tpu.vector_store %arg5[%c1_24, %c0_25], %30 {strides = array<i32>} : memref<2x128xf32, #tpu.memory_space<vmem>>, vector<1x128xf32>,
    return
  }
  func.func @transform_0(%arg0: i32, %arg1: i32) -> (i32, i32) {
    %c0_i32 = arith.constant 0 : i32
    return %arg1, %arg0 : i32, i32
  }
  func.func @transform_1(%arg0: i32, %arg1: i32) -> (i32, i32, i32) {
    %c0_i32 = arith.constant 0 : i32
    %c0_i32_0 = arith.constant 0 : i32
    %c0_i32_1 = arith.constant 0 : i32
    return %c0_i32, %arg1, %c0_i32_0 : i32, i32, i32
  }
  func.func @transform_2(%arg0: i32, %arg1: i32) -> (i32, i32, i32) {
    %c0_i32 = arith.constant 0 : i32
    %c0_i32_0 = arith.constant 0 : i32
    %c0_i32_1 = arith.constant 0 : i32
    return %c0_i32, %c0_i32_0, %arg0 : i32, i32, i32
  }
  func.func @transform_3(%arg0: i32, %arg1: i32) -> (i32, i32) {
    %c0_i32 = arith.constant 0 : i32
    %c0_i32_0 = arith.constant 0 : i32
    return %c0_i32, %arg0 : i32, i32
  }
}

</mosaic_0001>

<bundles_post_ra>
// kernel: _arap_forward.1
= control target key start
LH: loop header
LB: loop body
LE: loop exit
PB: predicated region body
PF: predicated region fallthrough
CT: control target
= control target key end

     0   :  { %s3524_s12 = smov 0   ;;  %s3526_s13 = smov 0   ;;  %s5088_s0 = inlined_call_operand.vmem [shape: s8[256,256], index: 0, kind: input, shape index: {}]   ;;  %s5089_s1 = inlined_call_operand.vmem [shape: f32[2,256,8], index: 1, kind: input, shape index: {}]   ;;  %s5090_s2 = inlined_call_operand.vmem [shape: f32[2,8,256], index: 2, kind: input, shape index: {}]   ;;  %s5091_s3 = inlined_call_operand.vmem [shape: f32[2,256], index: 3, kind: output, shape index: {}]  }
   0x1   :  { %s3528_s14 = smov 0   ;;  %s3530_s15 = smov 0  }
   0x2   :  { %s3532_s16 = smov 0  }
   0x3 LB: > { %s25_s17 = sadd.s32 1, %s3496_s15  ;;  %p41_p1 = scmp.ne.s32.totalorder %s3488_s13, %s3484_s12  ;;  %s3500_s16 = sphi %s3532_s16, %s13_s16   ;;  %s3496_s15 = sphi %s3530_s15, %s5572_s15   ;;  %s3492_s14 = sphi %s3528_s14, %s5571_s14   ;;  %s3488_s13 = sphi %s3526_s13, %s5570_s13   ;;  %s3484_s12 = sphi %s3524_s12, %s5569_s12  }
   0x4   : > { %p27_p0 = scmp.ge.s32.totalorder %s25_s17, 2  ;;  %p42_p2 = scmp.eq.s32.totalorder %s3500_s16, 0 }
   0x5   : > { %s34_s20 = sadd.s32 1, %s3488_s13  ;;  %p3376_p5 = scmp.ge.s32.totalorder %s3500_s16, 2 }
   0x6   : > { %s5574_s17 = smov (%p27_p0, %s25_s17), 0  ;;  %p3555_p3 = por %p42_p2, %p41_p1 }
   0x7   : > { %s30_s19 = ssub.s32 %s3496_s15, %s5574_s17  ;;  %154 = sbr.rel (%p3376_p5) target bundleno = 30 (0x1e), region = 20 }
   0x8   : > { %p32_p4 = scmp.eq.s32.totalorder %s30_s19, 0 }
   0xa   : > { %s3563_s21 = scalar_select %p32_p4, %s3488_s13, %s34_s20  }
   0xc   : > { %157 = sbr.rel (!%p3555_p3) target bundleno = 24 (0x18), region = 24  ;;  %s159_s22 = sand.u32 (%p3555_p3), 1, %s3488_s13  }
   0xd   : > { %s3378_s23 = sshll.u32 (%p3555_p3), %s3496_s15, 3  ;;  %s3377_s24 = sshll.u32 (%p3555_p3), %s159_s22, 6 }
   0xe   : > { %s166_s27 = scalar_lea.vmem (%p3555_p3), %s5088_s0, %s3378_s23  ;;  %s161_s28 = scalar_lea.vmem (%p3555_p3), [#allocation2], %s3377_s24 }
   0xf   : > { %v209_v0 = vld [vmem:[%s166_s27] sm:$0xff] (%p3555_p3)  ;;  %v211_v1 = vld [vmem:[%s166_s27 + $0x10] sm:$0xff] (%p3555_p3) }
  0x10   : > { %v213_v2 = vld [vmem:[%s166_s27 + $0x20] sm:$0xff] (%p3555_p3)  ;;  %210 = vst [vmem:[%s161_s28] sm:$0xff] (%p3555_p3), %v209_v0  ;;  %v215_v3 = vld [vmem:[%s166_s27 + $0x30] sm:$0xff] (%p3555_p3) }
  0x11   : > { %212 = vst [vmem:[%s161_s28 + $0x8] sm:$0xff] %v211_v1  ;;  %v217_v4 = vld [vmem:[%s166_s27 + $0x40] sm:$0xff]  ;;  %v219_v5 = vld [vmem:[%s166_s27 + $0x50] sm:$0xff] }
  0x12   : > { %214 = vst [vmem:[%s161_s28 + $0x10] sm:$0xff] %v213_v2  ;;  %v221_v6 = vld [vmem:[%s166_s27 + $0x60] sm:$0xff]  ;;  %v223_v7 = vld [vmem:[%s166_s27 + $0x70] sm:$0xff] }
  0x13   : > { %216 = vst [vmem:[%s161_s28 + $0x18] sm:$0xff] %v215_v3 }
  0x14   : > { %218 = vst [vmem:[%s161_s28 + $0x20] sm:$0xff] %v217_v4 }
  0x15   : > { %220 = vst [vmem:[%s161_s28 + $0x28] sm:$0xff] %v219_v5 }
  0x16   : > { %222 = vst [vmem:[%s161_s28 + $0x30] sm:$0xff] %v221_v6 }
  0x17   : > { %224 = vst [vmem:[%s161_s28 + $0x38] sm:$0xff] %v223_v7 }
  0x18 PF: > { %230 = sbr.rel (!%p3555_p3) target bundleno = 30 (0x1e), region = 62  ;;  %s232_s29 = sand.u32 (%p3555_p3), 1, %s3488_s13  }
  0x19   : > { %s3380_s30 = sshll.u32 (%p3555_p3), %s3496_s15, 3  ;;  %s3379_s4 = sshll.u32 (%p3555_p3), %s232_s29, 4 }
  0x1a   : > { %s236_s7 = scalar_lea.vmem (%p3555_p3), %s5090_s2, %s3380_s30  ;;  %s234_s8 = scalar_lea.vmem (%p3555_p3), [#allocation3], %s3379_s4 }
  0x1b   : > { %v267_v8 = vld [vmem:[%s236_s7] sm:$0xff] (%p3555_p3)  ;;  %v269_v9 = vld [vmem:[%s236_s7 + $0x10] sm:$0xff] (%p3555_p3) }
  0x1c   : > { %268 = vst [vmem:[%s234_s8] sm:$0xff] (%p3555_p3), %v267_v8 }
  0x1d   : > { %270 = vst [vmem:[%s234_s8 + $0x8] sm:$0xff] %v269_v9 }
  0x1e PF: > { %p3381_p6 = scmp.ge.s32.totalorder %s3500_s16, 1  ;;  %p275_p7 = scmp.lt.s32.totalorder %s3500_s16, 3 }
  0x20   : > { %p276_p8 = pnand %p3381_p6, %p275_p7 }
  0x22   : > { %279 = sbr.rel (%p276_p8) target bundleno = 966 (0x3c6), region = 100 }
  0x27   : > { %s282_s9 = sand.u32 1, %s3484_s12   ;;  %v354_v10 = vld [vmem:[%s5089_s1] sm:$0xff]  ;;  %vm387_vm0 = vcmask 64512   ;;  %v355_v11 = vld [vmem:[%s5089_s1 + $0x8] sm:$0xff]  ;;  %v356_v12 = vld [vmem:[%s5089_s1 + $0x10] sm:$0xff]  ;;  %p327_p9 = scmp.lt.s32.totalorder %s3492_s14, 1 }
  0x28   : > { %s3383_s23 = sshll.u32 %s282_s9, 4  ;;  %v389_v13 = vsel %vm387_vm0, %v354_v10, 0  ;;  %v392_v14 = vsel %vm387_vm0, %v355_v11, 0  ;;  %v395_v19 = vsel %vm387_vm0, %v356_v12, 0  ;;  %v357_v35 = vld [vmem:[%s5089_s1 + $0x18] sm:$0xff]  ;;  %v358_v44 = vld [vmem:[%s5089_s1 + $0x20] sm:$0xff] }
  0x29   : > { %v3596_v15 = vand.u32 4294901760, %v389_v13  ;;  %v3598_v16 = vand.u32 4294901760, %v392_v14  ;;  %s291_s24 = scalar_lea.vmem [#allocation3], %s3383_s23  ;;  %v3603_v27 = vand.u32 4294901760, %v395_v19  ;;  %v398_v40 = vsel %vm387_vm0, %v357_v35, 0  ;;  %v359_v51 = vld [vmem:[%s5089_s1 + $0x28] sm:$0xff] }
  0x2a   : > { %v386_v17 = vld [vmem:[%s291_s24] sm:$0xff]  ;;  %v3417_v18 = vld [vmem:[%s291_s24 + $0x8] sm:$0xff]  ;;  %v3611_v43 = vand.u32 4294901760, %v398_v40  ;;  %v401_v47 = vsel %vm387_vm0, %v358_v44, 0  ;;  %v404_v54 = vsel %vm387_vm0, %v359_v51, 0  ;;  %s3382_s22 = sshll.u32 %s282_s9, 6 }
  0x2b   : > { %v499_v20 = vand.u32 4294901760, %v386_v17  ;;  %v502_v21 = vsub.f32 %v389_v13, %v3596_v15  ;;  %v2073_v22 = vand.u32 4294901760, %v3417_v18  ;;  %v510_v23 = vsub.f32 %v392_v14, %v3598_v16  ;;  %v360_v58 = vld [vmem:[%s5089_s1 + $0x30] sm:$0xff]  ;;  %v361_v1 = vld [vmem:[%s5089_s1 + $0x38] sm:$0xff]  ;;  %v362_v8 = vld [vmem:[%s5089_s1 + $0x40] sm:$0xff]  ;;  %s4154_s12 = scalar_lea.vmem [#allocation2], %s3382_s22 }
  0x2c   : > { %v518_v39 = vsub.f32 %v395_v19, %v3603_v27  ;;  %v526_v46 = vsub.f32 %v398_v40, %v3611_v43  ;;  %v3619_v50 = vand.u32 4294901760, %v401_v47  ;;  %v3627_v57 = vand.u32 4294901760, %v404_v54  ;;  %s5576_s14 = smov (!%p327_p9, %s3492_s14), 1 }
  0x2d   : > { %v774_v24 = vsub.f32 %v386_v17, %v499_v20  ;;  %500 = vmatpush.msra.mxu0 %v499_v20  ;;  %1103 = vmatpush.msra.mxu3 %v499_v20  ;;  %v503_v25 = vand.u32 4294901760, %v502_v21  ;;  %v2348_v26 = vsub.f32 %v3417_v18, %v2073_v22  ;;  %v511_v31 = vand.u32 4294901760, %v510_v23  ;;  %v363_v17 = vld [vmem:[%s5089_s1 + $0x48] sm:$0xff] }
  0x2e   : > { %v519_v42 = vand.u32 4294901760, %v518_v39  ;;  %v527_v49 = vand.u32 4294901760, %v526_v46  ;;  %v534_v53 = vsub.f32 %v401_v47, %v3619_v50  ;;  %v542_v60 = vsub.f32 %v404_v54, %v3627_v57  ;;  %v367_v47 = vld [vmem:[%s5089_s1 + $0x68] sm:$0xff] }
  0x2f   : > { %925 = vmatpush.msra.mxu2 %v774_v24  ;;  %v504_v28 = vsub.f32 %v502_v21, %v503_v25  ;;  %1107 = vmatmul.f32.vlgmr.msra.gmra.mxu3 %v503_v25  ;;  %v775_v29 = vand.u32 4294901760, %v774_v24  ;;  %v2349_v30 = vand.u32 4294901760, %v2348_v26  ;;  %v512_v38 = vsub.f32 %v510_v23, %v511_v31 }
  0x30   : > { %928 = vmatmul.f32.vlgmr.msra.gmra.mxu2 %v502_v21  ;;  %v520_v45 = vsub.f32 %v518_v39, %v519_v42  ;;  %v528_v52 = vsub.f32 %v526_v46, %v527_v49  ;;  %v535_v56 = vand.u32 4294901760, %v534_v53  ;;  %v407_v61 = vsel %vm387_vm0, %v360_v58, 0 }
  0x31   : > { %v505_v32 = vand.u32 4294901760, %v504_v28  ;;  %2074 = vmatpush.msrb.mxu2 %v2073_v22  ;;  %v776_v33 = vsub.f32 %v774_v24, %v775_v29  ;;  %1315 = vmatpush.msrb.mxu0 %v775_v29  ;;  %v2350_v34 = vsub.f32 %v2348_v26, %v2349_v30  ;;  %v513_v41 = vand.u32 4294901760, %v512_v38  ;;  %v364_v24 = vld [vmem:[%s5089_s1 + $0x50] sm:$0xff] }
  0x32   : > { %v521_v48 = vand.u32 4294901760, %v520_v45  ;;  %v529_v55 = vand.u32 4294901760, %v528_v52  ;;  %v536_v59 = vsub.f32 %v534_v53, %v535_v56  ;;  %v543_v63 = vand.u32 4294901760, %v542_v60 }
  0x33   : > { %2889 = vmatpush.msra.mxu2 %v2349_v30  ;;  %506 = vmatmul.f32.vlgmr.msra.gmra.mxu0 %v505_v32  ;;  %v777_v36 = vand.u32 4294901760, %v776_v33  ;;  %v2351_v37 = vand.u32 4294901760, %v2350_v34  ;;  %v3635_v0 = vand.u32 4294901760, %v407_v61  ;;  %v410_v4 = vsel %vm387_vm0, %v361_v1, 0  ;;  %v365_v32 = vld [vmem:[%s5089_s1 + $0x58] sm:$0xff] }
  0x34   : > { %2499 = vmatpush.msra.mxu0 %v2348_v26  ;;  %v537_v62 = vand.u32 4294901760, %v536_v59  ;;  %v544_v2 = vsub.f32 %v542_v60, %v543_v63  ;;  %v3643_v7 = vand.u32 4294901760, %v410_v4  ;;  %v413_v11 = vsel %vm387_vm0, %v362_v8, 0  ;;  %v370_v8 = vld [vmem:[%s5089_s1 + $0x80] sm:$0xff] }
  0x35   : > { %778 = vmatpush.msra.mxu1 %v777_v36  ;;  %2352 = vmatpush.msrb.mxu3 %v2351_v37  ;;  %v550_v3 = vsub.f32 %v407_v61, %v3635_v0  ;;  %v3651_v14 = vand.u32 4294901760, %v413_v11  ;;  %v419_v28 = vsel %vm387_vm0, %v364_v24, 0  ;;  %v422_v35 = vsel %vm387_vm0, %v365_v32, 0 }
  0x36   : > { %780 = vmatmul.f32.vlgmr.msra.gmra.mxu1 %v3596_v15  ;;  %v545_v5 = vand.u32 4294901760, %v544_v2  ;;  %v558_v10 = vsub.f32 %v410_v4, %v3643_v7  ;;  %v3675_v38 = vand.u32 4294901760, %v422_v35  ;;  %v428_v51 = vsel %vm387_vm0, %v367_v47, 0 }
  0x37   : > { %3035 = vmatpush.msra.mxu3 %v2073_v22  ;;  %1461 = vmatpush.msrb.mxu1 %v499_v20  ;;  %v551_v6 = vand.u32 4294901760, %v550_v3  ;;  %v566_v19 = vsub.f32 %v413_v11, %v3651_v14  ;;  %v416_v20 = vsel %vm387_vm0, %v363_v17, 0  ;;  %v3691_v54 = vand.u32 4294901760, %v428_v51 }
  0x38   : > { %1113 = vmatmul.f32.gmra.mxu3 %v511_v31  ;;  %933 = vmatmul.f32.gmra.mxu2 %v510_v23  ;;  %v559_v13 = vand.u32 4294901760, %v558_v10  ;;  %v3659_v23 = vand.u32 4294901760, %v416_v20  ;;  %v3667_v31 = vand.u32 4294901760, %v419_v28  ;;  %v437_v11 = vsel %vm387_vm0, %v370_v8, 0 }
  0x39   : > { %2677 = vmatpush.msra.mxu1 %v2073_v22  ;;  %v552_v9 = vsub.f32 %v550_v3, %v551_v6  ;;  %v567_v22 = vand.u32 4294901760, %v566_v19  ;;  %v606_v58 = vsub.f32 %v428_v51, %v3691_v54  ;;  %v3715_v17 = vand.u32 4294901760, %v437_v11 }
  0x3a   : > { %v560_v18 = vsub.f32 %v558_v10, %v559_v13  ;;  %v574_v26 = vsub.f32 %v416_v20, %v3659_v23  ;;  %v582_v34 = vsub.f32 %v419_v28, %v3667_v31 }
  0x3b   : > { %514 = vmatmul.f32.gmra.mxu0 %v513_v41  ;;  %v553_v12 = vand.u32 4294901760, %v552_v9  ;;  %v568_v25 = vsub.f32 %v566_v19, %v567_v22  ;;  %v590_v41 = vsub.f32 %v422_v35, %v3675_v38  ;;  %v607_v61 = vand.u32 4294901760, %v606_v58 }
  0x3c   : > { %v561_v21 = vand.u32 4294901760, %v560_v18  ;;  %v575_v30 = vand.u32 4294901760, %v574_v26  ;;  %v583_v37 = vand.u32 4294901760, %v582_v34  ;;  %v371_v18 = vld [vmem:[%s5089_s1 + $0x88] sm:$0xff]  ;;  %v630_v20 = vsub.f32 %v437_v11, %v3715_v17 }
  0x3d   : > { %v569_v29 = vand.u32 4294901760, %v568_v25  ;;  %v591_v45 = vand.u32 4294901760, %v590_v41  ;;  %v608_v1 = vsub.f32 %v606_v58, %v607_v61 }
  0x3e   : > { %784 = vmatmul.f32.gmra.mxu1 %v3598_v16  ;;  %v576_v33 = vsub.f32 %v574_v26, %v575_v30  ;;  %v584_v40 = vsub.f32 %v582_v34, %v583_v37  ;;  %v631_v24 = vand.u32 4294901760, %v630_v20 }
  0x3f   : > { %v609_v4 = vand.u32 4294901760, %v608_v1 }
  0x40   : > { %1119 = vmatmul.f32.gmra.mxu3 %v519_v42  ;;  %938 = vmatmul.f32.gmra.mxu2 %v518_v39  ;;  %v577_v36 = vand.u32 4294901760, %v576_v33  ;;  %v366_v39 = vld [vmem:[%s5089_s1 + $0x60] sm:$0xff]  ;;  %v585_v44 = vand.u32 4294901760, %v584_v40  ;;  %v632_v28 = vsub.f32 %v630_v20, %v631_v24 }
  0x41   : > { %v425_v42 = vsel %vm387_vm0, %v366_v39, 0 }
  0x42   : > { %v633_v32 = vand.u32 4294901760, %v632_v28 }
  0x43   : > { %522 = vmatmul.f32.gmra.mxu0 %v521_v48  ;;  %v592_v48 = vsub.f32 %v590_v41, %v591_v45 }
  0x45   : > { %v593_v52 = vand.u32 4294901760, %v592_v48 }
  0x46   : > { %788 = vmatmul.f32.gmra.mxu1 %v3603_v27 }
  0x48   : > { %1125 = vmatmul.f32.gmra.mxu3 %v527_v49  ;;  %943 = vmatmul.f32.gmra.mxu2 %v526_v46  ;;  %v3683_v46 = vand.u32 4294901760, %v425_v42 }
  0x4a   : > { %v598_v49 = vsub.f32 %v425_v42, %v3683_v46 }
  0x4b   : > { %530 = vmatmul.f32.gmra.mxu0 %v529_v55  ;;  %v368_v55 = vld [vmem:[%s5089_s1 + $0x70] sm:$0xff] }
  0x4c   : > { %v431_v59 = vsel %vm387_vm0, %v368_v55, 0  ;;  %v374_v55 = vld [vmem:[%s5089_s1 + $0xa0] sm:$0xff] }
  0x4d   : > { %v449_v1 = vsel %vm387_vm0, %v374_v55, 0 }
  0x4e   : > { %792 = vmatmul.f32.gmra.mxu1 %v3611_v43 }
  0x50   : > { %1131 = vmatmul.f32.gmra.mxu3 %v535_v56  ;;  %948 = vmatmul.f32.gmra.mxu2 %v534_v53  ;;  %v599_v53 = vand.u32 4294901760, %v598_v49 }
  0x52   : > { %v600_v56 = vsub.f32 %v598_v49, %v599_v53 }
  0x53   : > { %538 = vmatmul.f32.gmra.mxu0 %v537_v62  ;;  %v3699_v62 = vand.u32 4294901760, %v431_v59 }
  0x55   : > { %v614_v2 = vsub.f32 %v431_v59, %v3699_v62 }
  0x56   : > { %796 = vmatmul.f32.gmra.mxu1 %v3619_v50 }
  0x58   : > { %1137 = vmatmul.f32.gmra.mxu3 %v543_v63  ;;  %953 = vmatmul.f32.gmra.mxu2 %v542_v60  ;;  %v601_v60 = vand.u32 4294901760, %v600_v56  ;;  %v369_v63 = vld [vmem:[%s5089_s1 + $0x78] sm:$0xff] }
  0x5b   : > { %546 = vmatmul.f32.gmra.mxu0 %v545_v5  ;;  %v615_v5 = vand.u32 4294901760, %v614_v2 }
  0x5d   : > { %v616_v9 = vsub.f32 %v614_v2, %v615_v5 }
  0x5e   : > { %800 = vmatmul.f32.gmra.mxu1 %v3627_v57 }
  0x60   : > { %1143 = vmatmul.f32.gmra.mxu3 %v551_v6  ;;  %958 = vmatmul.f32.gmra.mxu2 %v550_v3  ;;  %v434_v3 = vsel %vm387_vm0, %v369_v63, 0 }
  0x61   : > { %v3707_v6 = vand.u32 4294901760, %v434_v3 }
  0x63   : > { %554 = vmatmul.f32.gmra.mxu0 %v553_v12  ;;  %v617_v12 = vand.u32 4294901760, %v616_v9 }
  0x66   : > { %804 = vmatmul.f32.gmra.mxu1 %v3635_v0 }
  0x68   : > { %1149 = vmatmul.f32.gmra.mxu3 %v559_v13  ;;  %963 = vmatmul.f32.gmra.mxu2 %v558_v10  ;;  %v622_v10 = vsub.f32 %v434_v3, %v3707_v6 }
  0x6a   : > { %v623_v13 = vand.u32 4294901760, %v622_v10 }
  0x6b   : > { %562 = vmatmul.f32.gmra.mxu0 %v561_v21  ;;  %v440_v21 = vsel %vm387_vm0, %v371_v18, 0 }
  0x6c   : > { %v3723_v25 = vand.u32 4294901760, %v440_v21 }
  0x6e   : > { %808 = vmatmul.f32.gmra.mxu1 %v3643_v7 }
  0x70   : > { %1155 = vmatmul.f32.gmra.mxu3 %v567_v22  ;;  %968 = vmatmul.f32.gmra.mxu2 %v566_v19  ;;  %v624_v19 = vsub.f32 %v622_v10, %v623_v13 }
  0x72   : > { %v625_v22 = vand.u32 4294901760, %v624_v19 }
  0x73   : > { %570 = vmatmul.f32.gmra.mxu0 %v569_v29  ;;  %v638_v29 = vsub.f32 %v440_v21, %v3723_v25 }
  0x75   : > { %v639_v33 = vand.u32 4294901760, %v638_v29 }
  0x76   : > { %812 = vmatmul.f32.gmra.mxu1 %v3651_v14 }
  0x78   : > { %1161 = vmatmul.f32.gmra.mxu3 %v575_v30  ;;  %973 = vmatmul.f32.gmra.mxu2 %v574_v26  ;;  %v372_v26 = vld [vmem:[%s5089_s1 + $0x90] sm:$0xff] }
  0x79   : > { %v443_v30 = vsel %vm387_vm0, %v372_v26, 0 }
  0x7b   : > { %578 = vmatmul.f32.gmra.mxu0 %v577_v36  ;;  %v373_v36 = vld [vmem:[%s5089_s1 + $0x98] sm:$0xff] }
  0x7e   : > { %816 = vmatmul.f32.gmra.mxu1 %v3659_v23 }
  0x80   : > { %1167 = vmatmul.f32.gmra.mxu3 %v583_v37  ;;  %978 = vmatmul.f32.gmra.mxu2 %v582_v34  ;;  %v3731_v34 = vand.u32 4294901760, %v443_v30 }
  0x82   : > { %v646_v42 = vsub.f32 %v443_v30, %v3731_v34 }
  0x83   : > { %586 = vmatmul.f32.gmra.mxu0 %v585_v44 }
  0x86   : > { %820 = vmatmul.f32.gmra.mxu1 %v3667_v31 }
  0x88   : > { %1173 = vmatmul.f32.gmra.mxu3 %v591_v45  ;;  %983 = vmatmul.f32.gmra.mxu2 %v590_v41  ;;  %v640_v41 = vsub.f32 %v638_v29, %v639_v33  ;;  %v446_v45 = vsel %vm387_vm0, %v373_v36, 0 }
  0x89   : > { %v3739_v51 = vand.u32 4294901760, %v446_v45 }
  0x8a   : > { %v641_v48 = vand.u32 4294901760, %v640_v41 }
  0x8b   : > { %594 = vmatmul.f32.gmra.mxu0 %v593_v52 }
  0x8e   : > { %824 = vmatmul.f32.gmra.mxu1 %v3675_v38 }
  0x90   : > { %1179 = vmatmul.f32.gmra.mxu3 %v599_v53  ;;  %988 = vmatmul.f32.gmra.mxu2 %v598_v49  ;;  %v647_v49 = vand.u32 4294901760, %v646_v42 }
  0x93   : > { %602 = vmatmul.f32.gmra.mxu0 %v601_v60  ;;  %v648_v60 = vsub.f32 %v646_v42, %v647_v49 }
  0x95   : > { %v649_v3 = vand.u32 4294901760, %v648_v60 }
  0x96   : > { %828 = vmatmul.f32.gmra.mxu1 %v3683_v46 }
  0x98   : > { %1185 = vmatmul.f32.gmra.mxu3 %v607_v61  ;;  %993 = vmatmul.f32.gmra.mxu2 %v606_v58  ;;  %v654_v61 = vsub.f32 %v446_v45, %v3739_v51 }
  0x9b   : > { %610 = vmatmul.f32.gmra.mxu0 %v609_v4  ;;  %v655_v4 = vand.u32 4294901760, %v654_v61 }
  0x9d   : > { %v656_v18 = vsub.f32 %v654_v61, %v655_v4 }
  0x9e   : > { %832 = vmatmul.f32.gmra.mxu1 %v3691_v54 }
  0xa0   : > { %1191 = vmatmul.f32.gmra.mxu3 %v615_v5  ;;  %998 = vmatmul.f32.gmra.mxu2 %v614_v2  ;;  %v3749_v5 = vand.u32 4294901760, %v449_v1 }
  0xa2   : > { %v662_v19 = vsub.f32 %v449_v1, %v3749_v5 }
  0xa3   : > { %618 = vmatmul.f32.gmra.mxu0 %v617_v12 }
  0xa4   : > { %v663_v26 = vand.u32 4294901760, %v662_v19 }
  0xa6   : > { %836 = vmatmul.f32.gmra.mxu1 %v3699_v62 }
  0xa8   : > { %1197 = vmatmul.f32.gmra.mxu3 %v623_v13  ;;  %1003 = vmatmul.f32.gmra.mxu2 %v622_v10  ;;  %v375_v10 = vld [vmem:[%s5089_s1 + $0xa8] sm:$0xff] }
  0xa9   : > { %v452_v21 = vsel %vm387_vm0, %v375_v10, 0 }
  0xaa   : > { %v3759_v28 = vand.u32 4294901760, %v452_v21 }
  0xab   : > { %626 = vmatmul.f32.gmra.mxu0 %v625_v22 }
  0xae   : > { %840 = vmatmul.f32.gmra.mxu1 %v3707_v6 }
  0xb0   : > { %1203 = vmatmul.f32.gmra.mxu3 %v631_v24  ;;  %v507_v35 = vpop.f32.mrf.mxu0  ;;  %1008 = vmatmul.f32.gmra.mxu2 %v630_v20  ;;  %v657_v24 = vand.u32 4294901760, %v656_v18 }
  0xb2   : > { %v1108_v37 = vpop.f32.mrf.mxu3 }
  0xb3   : > { %634 = vmatmul.f32.gmra.mxu0 %v633_v32  ;;  %v781_v39 = vpop.f32.mrf.mxu1  ;;  %v929_v40 = vpop.f32.mrf.mxu2  ;;  %v376_v32 = vld [vmem:[%s5089_s1 + $0xb0] sm:$0xff] }
  0xb4   : > { %v782_v44 = vadd.f32 %v781_v39, %v507_v35  ;;  %v670_v39 = vsub.f32 %v452_v21, %v3759_v28  ;;  %v455_v41 = vsel %vm387_vm0, %v376_v32, 0 }
  0xb6   : > { %v930_v47 = vadd.f32 %v929_v40, %v782_v44  ;;  %844 = vmatmul.f32.gmra.mxu1 %v3715_v17  ;;  %v671_v45 = vand.u32 4294901760, %v670_v39 }
  0xb8   : > { %1209 = vmatmul.f32.gmra.mxu3 %v639_v33  ;;  %v3741_v52 = vadd.f32 %v1108_v37, %v930_v47  ;;  %v515_v53 = vpop.f32.mrf.mxu0  ;;  %1013 = vmatmul.f32.gmra.mxu2 %v638_v29  ;;  %v664_v37 = vsub.f32 %v662_v19, %v663_v26  ;;  %v3769_v47 = vand.u32 4294901760, %v455_v41 }
  0xba   : > { %v665_v44 = vand.u32 4294901760, %v664_v37  ;;  %v678_v60 = vsub.f32 %v455_v41, %v3769_v47 }
  0xbb   : > { %v1114_v56 = vpop.f32.mrf.mxu3  ;;  %642 = vmatmul.f32.gmra.mxu0 %v641_v48  ;;  %v785_v58 = vpop.f32.mrf.mxu1 }
  0xbc   : > { %v934_v59 = vpop.f32.mrf.mxu2  ;;  %v786_v63 = vadd.f32 %v785_v58, %v515_v53  ;;  %v377_v53 = vld [vmem:[%s5089_s1 + $0xb8] sm:$0xff] }
  0xbe   : > { %v935_v2 = vadd.f32 %v934_v59, %v786_v63  ;;  %848 = vmatmul.f32.gmra.mxu1 %v3723_v25  ;;  %v672_v59 = vsub.f32 %v670_v39, %v671_v45  ;;  %v458_v63 = vsel %vm387_vm0, %v377_v53, 0 }
  0xc0   : > { %1215 = vmatmul.f32.gmra.mxu3 %v647_v49  ;;  %v3751_v8 = vadd.f32 %v1114_v56, %v935_v2  ;;  %v523_v9 = vpop.f32.mrf.mxu0  ;;  %1018 = vmatmul.f32.gmra.mxu2 %v646_v42  ;;  %v673_v2 = vand.u32 4294901760, %v672_v59 }
  0xc3   : > { %v1120_v11 = vpop.f32.mrf.mxu3  ;;  %650 = vmatmul.f32.gmra.mxu0 %v649_v3  ;;  %v789_v12 = vpop.f32.mrf.mxu1  ;;  %v679_v3 = vand.u32 4294901760, %v678_v60 }
  0xc4   : > { %v939_v13 = vpop.f32.mrf.mxu2  ;;  %v790_v20 = vadd.f32 %v789_v12, %v523_v9 }
  0xc6   : > { %v940_v22 = vadd.f32 %v939_v13, %v790_v20  ;;  %852 = vmatmul.f32.gmra.mxu1 %v3731_v34 }
  0xc8   : > { %1221 = vmatmul.f32.gmra.mxu3 %v655_v4  ;;  %v3761_v29 = vadd.f32 %v1120_v11, %v940_v22  ;;  %v531_v30 = vpop.f32.mrf.mxu0  ;;  %1023 = vmatmul.f32.gmra.mxu2 %v654_v61  ;;  %v3779_v4 = vand.u32 4294901760, %v458_v63  ;;  %v378_v11 = vld [vmem:[%s5089_s1 + $0xc0] sm:$0xff] }
  0xc9   : > { %v461_v22 = vsel %vm387_vm0, %v378_v11, 0 }
  0xca   : > { %v686_v20 = vsub.f32 %v458_v63, %v3779_v4  ;;  %v3789_v32 = vand.u32 4294901760, %v461_v22 }
  0xcb   : > { %v1126_v33 = vpop.f32.mrf.mxu3  ;;  %658 = vmatmul.f32.gmra.mxu0 %v657_v24  ;;  %v793_v35 = vpop.f32.mrf.mxu1 }
  0xcc   : > { %v944_v36 = vpop.f32.mrf.mxu2  ;;  %v794_v40 = vadd.f32 %v793_v35, %v531_v30  ;;  %v687_v30 = vand.u32 4294901760, %v686_v20 }
  0xce   : > { %v945_v42 = vadd.f32 %v944_v36, %v794_v40  ;;  %856 = vmatmul.f32.gmra.mxu1 %v3739_v51  ;;  %v379_v36 = vld [vmem:[%s5089_s1 + $0xc8] sm:$0xff]  ;;  %v688_v41 = vsub.f32 %v686_v20, %v687_v30 }
  0xd0   : > { %1227 = vmatmul.f32.gmra.mxu3 %v663_v26  ;;  %v3771_v48 = vadd.f32 %v1126_v33, %v945_v42  ;;  %v539_v49 = vpop.f32.mrf.mxu0  ;;  %1028 = vmatmul.f32.gmra.mxu2 %v662_v19  ;;  %v680_v19 = vsub.f32 %v678_v60, %v679_v3  ;;  %v694_v42 = vsub.f32 %v461_v22, %v3789_v32  ;;  %v689_v53 = vand.u32 4294901760, %v688_v41  ;;  %v381_v22 = vld [vmem:[%s5089_s1 + $0xd8] sm:$0xff] }
  0xd2   : > { %v681_v26 = vand.u32 4294901760, %v680_v19 }
  0xd3   : > { %v1132_v55 = vpop.f32.mrf.mxu3  ;;  %666 = vmatmul.f32.gmra.mxu0 %v665_v44  ;;  %v797_v56 = vpop.f32.mrf.mxu1 }
  0xd4   : > { %v949_v58 = vpop.f32.mrf.mxu2  ;;  %v798_v61 = vadd.f32 %v797_v56, %v539_v49 }
  0xd6   : > { %v950_v1 = vadd.f32 %v949_v58, %v798_v61  ;;  %860 = vmatmul.f32.gmra.mxu1 %v3749_v5 }
  0xd8   : > { %1233 = vmatmul.f32.gmra.mxu3 %v671_v45  ;;  %v3781_v9 = vadd.f32 %v1132_v55, %v950_v1  ;;  %v547_v10 = vpop.f32.mrf.mxu0  ;;  %1033 = vmatmul.f32.gmra.mxu2 %v670_v39  ;;  %v464_v45 = vsel %vm387_vm0, %v379_v36, 0  ;;  %v695_v55 = vand.u32 4294901760, %v694_v42 }
  0xd9   : > { %v3799_v56 = vand.u32 4294901760, %v464_v45 }
  0xdb   : > { %v1138_v12 = vpop.f32.mrf.mxu3  ;;  %674 = vmatmul.f32.gmra.mxu0 %v673_v2  ;;  %v801_v13 = vpop.f32.mrf.mxu1  ;;  %v696_v2 = vsub.f32 %v694_v42, %v695_v55 }
  0xdc   : > { %v954_v18 = vpop.f32.mrf.mxu2  ;;  %v802_v21 = vadd.f32 %v801_v13, %v547_v10 }
  0xdd   : > { %v697_v13 = vand.u32 4294901760, %v696_v2 }
  0xde   : > { %v955_v24 = vadd.f32 %v954_v18, %v802_v21  ;;  %864 = vmatmul.f32.gmra.mxu1 %v3759_v28 }
  0xe0   : > { %1239 = vmatmul.f32.gmra.mxu3 %v679_v3  ;;  %v3791_v33 = vadd.f32 %v1138_v12, %v955_v24  ;;  %v555_v35 = vpop.f32.mrf.mxu0  ;;  %1038 = vmatmul.f32.gmra.mxu2 %v678_v60  ;;  %v380_v60 = vld [vmem:[%s5089_s1 + $0xd0] sm:$0xff]  ;;  %v702_v3 = vsub.f32 %v464_v45, %v3799_v56 }
  0xe1   : > { %v467_v11 = vsel %vm387_vm0, %v380_v60, 0 }
  0xe2   : > { %v703_v18 = vand.u32 4294901760, %v702_v3  ;;  %v3809_v19 = vand.u32 4294901760, %v467_v11 }
  0xe3   : > { %v1144_v37 = vpop.f32.mrf.mxu3  ;;  %682 = vmatmul.f32.gmra.mxu0 %v681_v26  ;;  %v805_v39 = vpop.f32.mrf.mxu1 }
  0xe4   : > { %v959_v40 = vpop.f32.mrf.mxu2  ;;  %v806_v44 = vadd.f32 %v805_v39, %v555_v35  ;;  %v704_v35 = vsub.f32 %v702_v3, %v703_v18  ;;  %v710_v36 = vsub.f32 %v467_v11, %v3809_v19  ;;  %v470_v39 = vsel %vm387_vm0, %v381_v22, 0 }
  0xe6   : > { %v960_v49 = vadd.f32 %v959_v40, %v806_v44  ;;  %868 = vmatmul.f32.gmra.mxu1 %v3769_v47  ;;  %v705_v41 = vand.u32 4294901760, %v704_v35  ;;  %v3819_v44 = vand.u32 4294901760, %v470_v39 }
  0xe8   : > { %1245 = vmatmul.f32.gmra.mxu3 %v687_v30  ;;  %v3801_v58 = vadd.f32 %v1144_v37, %v960_v49  ;;  %v563_v59 = vpop.f32.mrf.mxu0  ;;  %1043 = vmatmul.f32.gmra.mxu2 %v686_v20 }
  0xeb   : > { %v1150_v61 = vpop.f32.mrf.mxu3  ;;  %690 = vmatmul.f32.gmra.mxu0 %v689_v53  ;;  %v809_v63 = vpop.f32.mrf.mxu1  ;;  %v382_v53 = vld [vmem:[%s5089_s1 + $0xe0] sm:$0xff] }
  0xec   : > { %v964_v1 = vpop.f32.mrf.mxu2  ;;  %v810_v10 = vadd.f32 %v809_v63, %v563_v59  ;;  %v718_v63 = vsub.f32 %v470_v39, %v3819_v44  ;;  %v473_v2 = vsel %vm387_vm0, %v382_v53, 0 }
  0xee   : > { %v965_v12 = vadd.f32 %v964_v1, %v810_v10  ;;  %872 = vmatmul.f32.gmra.mxu1 %v3779_v4 }
  0xf0   : > { %1251 = vmatmul.f32.gmra.mxu3 %v695_v55  ;;  %v3811_v20 = vadd.f32 %v1150_v61, %v965_v12  ;;  %v571_v21 = vpop.f32.mrf.mxu0  ;;  %1048 = vmatmul.f32.gmra.mxu2 %v694_v42  ;;  %v711_v42 = vand.u32 4294901760, %v710_v36  ;;  %v3829_v12 = vand.u32 4294901760, %v473_v2 }
  0xf2   : > { %v712_v61 = vsub.f32 %v710_v36, %v711_v42  ;;  %5273 = vst [vmem:[#allocation4_spill] sm:$0xff] %v3829_v12  ;;  %v726_v35 = vsub.f32 %v473_v2, %v3829_v12 }
  0xf3   : > { %v1156_v24 = vpop.f32.mrf.mxu3  ;;  %698 = vmatmul.f32.gmra.mxu0 %v697_v13  ;;  %v813_v26 = vpop.f32.mrf.mxu1 }
  0xf4   : > { %v969_v30 = vpop.f32.mrf.mxu2  ;;  %v814_v37 = vadd.f32 %v813_v26, %v571_v21  ;;  %v713_v11 = vand.u32 4294901760, %v712_v61  ;;  %v383_v21 = vld [vmem:[%s5089_s1 + $0xe8] sm:$0xff] }
  0xf5   : > { %v476_v39 = vsel %vm387_vm0, %v383_v21, 0 }
  0xf6   : > { %v970_v40 = vadd.f32 %v969_v30, %v814_v37  ;;  %876 = vmatmul.f32.gmra.mxu1 %v3789_v32 }
  0xf8   : > { %1257 = vmatmul.f32.gmra.mxu3 %v703_v18  ;;  %v3821_v45 = vadd.f32 %v1156_v24, %v970_v40  ;;  %v579_v49 = vpop.f32.mrf.mxu0  ;;  %1053 = vmatmul.f32.gmra.mxu2 %v702_v3  ;;  %v719_v3 = vand.u32 4294901760, %v718_v63 }
  0xfa   : > { %v720_v30 = vsub.f32 %v718_v63, %v719_v3 }
  0xfb   : > { %v1162_v55 = vpop.f32.mrf.mxu3  ;;  %706 = vmatmul.f32.gmra.mxu0 %v705_v41  ;;  %v817_v59 = vpop.f32.mrf.mxu1 }
  0xfc   : > { %v974_v60 = vpop.f32.mrf.mxu2  ;;  %v818_v1 = vadd.f32 %v817_v59, %v579_v49  ;;  %v721_v41 = vand.u32 4294901760, %v720_v30 }
  0xfe   : > { %v975_v10 = vadd.f32 %v974_v60, %v818_v1  ;;  %880 = vmatmul.f32.gmra.mxu1 %v3799_v56 }
 0x100   : > { %1263 = vmatmul.f32.gmra.mxu3 %v711_v42  ;;  %v3831_v13 = vadd.f32 %v1162_v55, %v975_v10  ;;  %v587_v18 = vpop.f32.mrf.mxu0  ;;  %1058 = vmatmul.f32.gmra.mxu2 %v710_v36  ;;  %v727_v36 = vand.u32 4294901760, %v726_v35  ;;  %v3839_v42 = vand.u32 4294901760, %v476_v39  ;;  %v384_v55 = vld [vmem:[%s5089_s1 + $0xf0] sm:$0xff] }
 0x102   : > { %5274 = vst [vmem:[#allocation5_spill] sm:$0xff] %v3839_v42  ;;  %v728_v1 = vsub.f32 %v726_v35, %v727_v36  ;;  %v734_v2 = vsub.f32 %v476_v39, %v3839_v42 }
 0x103   : > { %v1168_v22 = vpop.f32.mrf.mxu3  ;;  %714 = vmatmul.f32.gmra.mxu0 %v713_v11  ;;  %v821_v24 = vpop.f32.mrf.mxu1  ;;  %v479_v11 = vsel %vm387_vm0, %v384_v55, 0 }
 0x104   : > { %v979_v26 = vpop.f32.mrf.mxu2  ;;  %v822_v37 = vadd.f32 %v821_v24, %v587_v18  ;;  %v729_v18 = vand.u32 4294901760, %v728_v1  ;;  %v3849_v21 = vand.u32 4294901760, %v479_v11 }
 0x106   : > { %v980_v40 = vadd.f32 %v979_v26, %v822_v37  ;;  %884 = vmatmul.f32.gmra.mxu1 %v3809_v19  ;;  %5275 = vst [vmem:[#allocation6_spill] sm:$0xff] %v3849_v21  ;;  %v385_v26 = vld [vmem:[%s5089_s1 + $0xf8] sm:$0xff] }
 0x108   : > { %1269 = vmatmul.f32.gmra.mxu3 %v719_v3  ;;  %v3841_v49 = vadd.f32 %v1168_v22, %v980_v40  ;;  %v595_v53 = vpop.f32.mrf.mxu0  ;;  %1063 = vmatmul.f32.gmra.mxu2 %v718_v63  ;;  %v735_v63 = vand.u32 4294901760, %v734_v2 }
 0x10a   : > { %v736_v40 = vsub.f32 %v734_v2, %v735_v63 }
 0x10b   : > { %v1174_v59 = vpop.f32.mrf.mxu3  ;;  %722 = vmatmul.f32.gmra.mxu0 %v721_v41  ;;  %v825_v60 = vpop.f32.mrf.mxu1  ;;  %v742_v41 = vsub.f32 %v479_v11, %v3849_v21 }
 0x10c   : > { %v984_v61 = vpop.f32.mrf.mxu2  ;;  %v826_v10 = vadd.f32 %v825_v60, %v595_v53 }
 0x10d   : > { %v743_v60 = vand.u32 4294901760, %v742_v41 }
 0x10e   : > { %v985_v3 = vadd.f32 %v984_v61, %v826_v10  ;;  %888 = vmatmul.f32.gmra.mxu1 %v3819_v44 }
 0x110   : > { %1275 = vmatmul.f32.gmra.mxu3 %v727_v36  ;;  %v3851_v22 = vadd.f32 %v1174_v59, %v985_v3  ;;  %v603_v24 = vpop.f32.mrf.mxu0  ;;  %1068 = vmatmul.f32.gmra.mxu2 %v726_v35  ;;  %v482_v36 = vsel %vm387_vm0, %v385_v26, 0  ;;  %v3385_v35 = vld [vmem:[%s5089_s1 + $0x100] sm:$0xff]  ;;  %v737_v59 = vand.u32 4294901760, %v736_v40  ;;  %v744_v26 = vsub.f32 %v742_v41, %v743_v60 }
 0x111   : > { %v3862_v61 = vand.u32 4294901760, %v482_v36  ;;  %v1963_v11 = vsel %vm387_vm0, %v3385_v35, 0 }
 0x113   : > { %v1180_v30 = vpop.f32.mrf.mxu3  ;;  %730 = vmatmul.f32.gmra.mxu0 %v729_v18  ;;  %v829_v37 = vpop.f32.mrf.mxu1 }
 0x114   : > { %v989_v39 = vpop.f32.mrf.mxu2  ;;  %v830_v53 = vadd.f32 %v829_v37, %v603_v24  ;;  %v750_v37 = vsub.f32 %v482_v36, %v3862_v61 }
 0x116   : > { %v990_v55 = vadd.f32 %v989_v39, %v830_v53  ;;  %892 = vmatmul.f32.gmra.mxu1 %v3829_v12  ;;  %v3868_v53 = vand.u32 4294901760, %v1963_v11  ;;  %v751_v40 = vand.u32 4294901760, %v750_v37 }
 0x118   : > { %1281 = vmatmul.f32.gmra.mxu3 %v735_v63  ;;  %v3864_v1 = vadd.f32 %v1180_v30, %v990_v55  ;;  %v611_v10 = vpop.f32.mrf.mxu0  ;;  %1073 = vmatmul.f32.gmra.mxu2 %v734_v2  ;;  %v3386_v30 = vld [vmem:[%s5089_s1 + $0x108] sm:$0xff]  ;;  %v745_v2 = vand.u32 4294901760, %v744_v26 }
 0x119   : > { %v1966_v36 = vsel %vm387_vm0, %v3386_v30, 0 }
 0x11a   : > { %v3881_v26 = vand.u32 4294901760, %v1966_v36 }
 0x11b   : > { %v1186_v3 = vpop.f32.mrf.mxu3  ;;  %738 = vmatmul.f32.gmra.mxu0 %v737_v59  ;;  %v833_v18 = vpop.f32.mrf.mxu1  ;;  %v3877_v59 = vsub.f32 %v1963_v11, %v3868_v53 }
 0x11c   : > { %v994_v24 = vpop.f32.mrf.mxu2  ;;  %v834_v39 = vadd.f32 %v833_v18, %v611_v10  ;;  %5277 = vst [vmem:[#allocation8_spill] sm:$0xff] %v3881_v26 }
 0x11d   : > { %5276 = vst [vmem:[#allocation7_spill] sm:$0xff] %v3877_v59  ;;  %v5098_v12 = vand.u32 4294901760, %v3877_v59 }
 0x11e   : > { %v995_v63 = vadd.f32 %v994_v24, %v834_v39  ;;  %896 = vmatmul.f32.gmra.mxu1 %v3839_v42  ;;  %v752_v39 = vsub.f32 %v750_v37, %v751_v40 }
 0x11f   : > { %v2078_v30 = vsub.f32 %v3877_v59, %v5098_v12 }
 0x120   : > { %1287 = vmatmul.f32.gmra.mxu3 %v743_v60  ;;  %v3874_v55 = vadd.f32 %v1186_v3, %v995_v63  ;;  %v619_v35 = vpop.f32.mrf.mxu0  ;;  %1078 = vmatmul.f32.gmra.mxu2 %v742_v41  ;;  %v3387_v41 = vld [vmem:[%s5089_s1 + $0x110] sm:$0xff]  ;;  %v753_v11 = vand.u32 4294901760, %v752_v39 }
 0x121   : > { %v2079_v39 = vand.u32 4294901760, %v2078_v30 }
 0x123   : > { %v1192_v10 = vpop.f32.mrf.mxu3  ;;  %746 = vmatmul.f32.gmra.mxu0 %v745_v2  ;;  %v837_v18 = vpop.f32.mrf.mxu1  ;;  %v3893_v2 = vsub.f32 %v1966_v36, %v3881_v26  ;;  %v3388_v36 = vld [vmem:[%s5089_s1 + $0x118] sm:$0xff] }
 0x124   : > { %v999_v24 = vpop.f32.mrf.mxu2  ;;  %v838_v42 = vadd.f32 %v837_v18, %v619_v35 }
 0x125   : > { %5278 = vst [vmem:[#allocation9_spill] sm:$0xff] %v3893_v2 }
 0x126   : > { %v1000_v60 = vadd.f32 %v999_v24, %v838_v42  ;;  %900 = vmatmul.f32.gmra.mxu1 %v3849_v21  ;;  %v1969_v42 = vsel %vm387_vm0, %v3387_v41, 0 }
 0x128   : > { %1293 = vmatmul.f32.gmra.mxu3 %v751_v40  ;;  %v3887_v3 = vadd.f32 %v1192_v10, %v1000_v60  ;;  %v627_v63 = vpop.f32.mrf.mxu0  ;;  %1083 = vmatmul.f32.gmra.mxu2 %v750_v37  ;;  %v5101_v40 = vand.u32 4294901760, %v3893_v2  ;;  %v3897_v10 = vand.u32 4294901760, %v1969_v42 }
 0x12a   : > { %5279 = vst [vmem:[#allocation10_spill] sm:$0xff] %v3897_v10 }
 0x12b   : > { %v1198_v35 = vpop.f32.mrf.mxu3  ;;  %754 = vmatmul.f32.gmra.mxu0 %v753_v11  ;;  %v841_v18 = vpop.f32.mrf.mxu1  ;;  %v2086_v11 = vsub.f32 %v3893_v2, %v5101_v40 }
 0x12c   : > { %v1004_v24 = vpop.f32.mrf.mxu2  ;;  %v842_v21 = vadd.f32 %v841_v18, %v627_v63  ;;  %v3910_v63 = vsub.f32 %v1969_v42, %v3897_v10  ;;  %v3389_v42 = vld [vmem:[%s5089_s1 + $0x120] sm:$0xff] }
 0x12d   : > { %v2087_v59 = vand.u32 4294901760, %v2086_v11 }
 0x12e   : > { %v1005_v37 = vadd.f32 %v1004_v24, %v842_v21  ;;  %904 = vmatmul.f32.gmra.mxu1 %v3862_v61  ;;  %5280 = vst [vmem:[#allocation11_spill] sm:$0xff] %v3910_v63  ;;  %v1972_v21 = vsel %vm387_vm0, %v3388_v36, 0 }
 0x130   : > { %2354 = vmatmul.f32.vlgmr.msrb.gmra.mxu3 %v3868_v53  ;;  %v3904_v60 = vadd.f32 %v1198_v35, %v1005_v37  ;;  %v635_v41 = vpop.f32.mrf.mxu0  ;;  %2080 = vmatmul.f32.vlgmr.msrb.gmra.mxu2 %v2079_v39  ;;  %v5106_v35 = vand.u32 4294901760, %v3910_v63  ;;  %v3915_v37 = vand.u32 4294901760, %v1972_v21 }
 0x132   : > { %5281 = vst [vmem:[#allocation12_spill] sm:$0xff] %v3915_v37  ;;  %v3928_v11 = vsub.f32 %v1972_v21, %v3915_v37  ;;  %v3390_v21 = vld [vmem:[%s5089_s1 + $0x128] sm:$0xff] }
 0x133   : > { %v1204_v30 = vpop.f32.mrf.mxu3  ;;  %v845_v18 = vpop.f32.mrf.mxu1  ;;  %1317 = vmatmul.f32.vlgmr.msrb.gmra.mxu0 %v3596_v15 }
 0x134   : > { %v1009_v24 = vpop.f32.mrf.mxu2  ;;  %v846_v12 = vadd.f32 %v845_v18, %v635_v41  ;;  %v2094_v41 = vsub.f32 %v3910_v63, %v5106_v35  ;;  %5282 = vst [vmem:[#allocation13_spill] sm:$0xff] %v3928_v11 }
 0x136   : > { %v1010_v39 = vadd.f32 %v1009_v24, %v846_v12  ;;  %1463 = vmatmul.f32.vlgmr.msrb.gmra.mxu1 %v3596_v15  ;;  %v1975_v12 = vsel %vm387_vm0, %v3389_v42, 0 }
 0x138   : > { %2358 = vmatmul.f32.gmra.mxu3 %v3881_v26  ;;  %v3922_v36 = vadd.f32 %v1204_v30, %v1010_v39  ;;  %v643_v40 = vpop.f32.mrf.mxu0  ;;  %2088 = vmatmul.f32.gmra.mxu2 %v2087_v59  ;;  %v2095_v26 = vand.u32 4294901760, %v2094_v41  ;;  %v5111_v30 = vand.u32 4294901760, %v3928_v11  ;;  %v3933_v39 = vand.u32 4294901760, %v1975_v12 }
 0x13a   : > { %5283 = vst [vmem:[#allocation14_spill] sm:$0xff] %v3933_v39  ;;  %v3946_v41 = vsub.f32 %v1975_v12, %v3933_v39  ;;  %v3391_v12 = vld [vmem:[%s5089_s1 + $0x130] sm:$0xff] }
 0x13b   : > { %v1210_v15 = vpop.f32.mrf.mxu3  ;;  %v849_v18 = vpop.f32.mrf.mxu1  ;;  %1321 = vmatmul.f32.gmra.mxu0 %v3598_v16 }
 0x13c   : > { %v1014_v24 = vpop.f32.mrf.mxu2  ;;  %v850_v2 = vadd.f32 %v849_v18, %v643_v40  ;;  %v2102_v40 = vsub.f32 %v3928_v11, %v5111_v30  ;;  %5284 = vst [vmem:[#allocation15_spill] sm:$0xff] %v3946_v41 }
 0x13e   : > { %v1015_v59 = vadd.f32 %v1014_v24, %v850_v2  ;;  %1467 = vmatmul.f32.gmra.mxu1 %v3598_v16  ;;  %v1978_v2 = vsel %vm387_vm0, %v3390_v21, 0 }
 0x140   : > { %2362 = vmatmul.f32.gmra.mxu3 %v3897_v10  ;;  %v3940_v42 = vadd.f32 %v1210_v15, %v1015_v59  ;;  %v651_v35 = vpop.f32.mrf.mxu0  ;;  %2096 = vmatmul.f32.gmra.mxu2 %v2095_v26  ;;  %v2103_v10 = vand.u32 4294901760, %v2102_v40  ;;  %v5116_v15 = vand.u32 4294901760, %v3946_v41  ;;  %v3951_v59 = vand.u32 4294901760, %v1978_v2 }
 0x142   : > { %5285 = vst [vmem:[#allocation16_spill] sm:$0xff] %v3951_v59  ;;  %v3964_v40 = vsub.f32 %v1978_v2, %v3951_v59  ;;  %v3392_v2 = vld [vmem:[%s5089_s1 + $0x138] sm:$0xff] }
 0x143   : > { %v1216_v16 = vpop.f32.mrf.mxu3  ;;  %v853_v18 = vpop.f32.mrf.mxu1  ;;  %1325 = vmatmul.f32.gmra.mxu0 %v3603_v27 }
 0x144   : > { %v1019_v24 = vpop.f32.mrf.mxu2  ;;  %v854_v63 = vadd.f32 %v853_v18, %v651_v35  ;;  %v2110_v35 = vsub.f32 %v3946_v41, %v5116_v15  ;;  %5286 = vst [vmem:[#allocation17_spill] sm:$0xff] %v3964_v40 }
 0x146   : > { %v1020_v26 = vadd.f32 %v1019_v24, %v854_v63  ;;  %1471 = vmatmul.f32.gmra.mxu1 %v3603_v27  ;;  %v1981_v63 = vsel %vm387_vm0, %v3391_v12, 0 }
 0x148   : > { %2366 = vmatmul.f32.gmra.mxu3 %v3915_v37  ;;  %v3958_v21 = vadd.f32 %v1216_v16, %v1020_v26  ;;  %v659_v30 = vpop.f32.mrf.mxu0  ;;  %2104 = vmatmul.f32.gmra.mxu2 %v2103_v10  ;;  %v2111_v37 = vand.u32 4294901760, %v2110_v35  ;;  %v5121_v16 = vand.u32 4294901760, %v3964_v40  ;;  %v3969_v26 = vand.u32 4294901760, %v1981_v63 }
 0x14a   : > { %5287 = vst [vmem:[#allocation18_spill] sm:$0xff] %v3969_v26  ;;  %v3982_v35 = vsub.f32 %v1981_v63, %v3969_v26  ;;  %v3393_v63 = vld [vmem:[%s5089_s1 + $0x140] sm:$0xff] }
 0x14b   : > { %v1222_v27 = vpop.f32.mrf.mxu3  ;;  %v857_v18 = vpop.f32.mrf.mxu1  ;;  %1329 = vmatmul.f32.gmra.mxu0 %v3611_v43 }
 0x14c   : > { %v1024_v24 = vpop.f32.mrf.mxu2  ;;  %v858_v11 = vadd.f32 %v857_v18, %v659_v30  ;;  %v2118_v30 = vsub.f32 %v3964_v40, %v5121_v16  ;;  %5288 = vst [vmem:[#allocation19_spill] sm:$0xff] %v3982_v35 }
 0x14e   : > { %v1025_v10 = vadd.f32 %v1024_v24, %v858_v11  ;;  %1475 = vmatmul.f32.gmra.mxu1 %v3611_v43  ;;  %v1984_v11 = vsel %vm387_vm0, %v3392_v2, 0 }
 0x150   : > { %2370 = vmatmul.f32.gmra.mxu3 %v3933_v39  ;;  %v3976_v12 = vadd.f32 %v1222_v27, %v1025_v10  ;;  %v667_v15 = vpop.f32.mrf.mxu0  ;;  %2112 = vmatmul.f32.gmra.mxu2 %v2111_v37  ;;  %v2119_v39 = vand.u32 4294901760, %v2118_v30  ;;  %v5126_v27 = vand.u32 4294901760, %v3982_v35  ;;  %v3987_v10 = vand.u32 4294901760, %v1984_v11 }
 0x152   : > { %5289 = vst [vmem:[#allocation20_spill] sm:$0xff] %v3987_v10  ;;  %v4000_v30 = vsub.f32 %v1984_v11, %v3987_v10  ;;  %v3394_v11 = vld [vmem:[%s5089_s1 + $0x148] sm:$0xff] }
 0x153   : > { %v1228_v43 = vpop.f32.mrf.mxu3  ;;  %v861_v18 = vpop.f32.mrf.mxu1  ;;  %1333 = vmatmul.f32.gmra.mxu0 %v3619_v50 }
 0x154   : > { %v1029_v24 = vpop.f32.mrf.mxu2  ;;  %v862_v41 = vadd.f32 %v861_v18, %v667_v15  ;;  %v2126_v15 = vsub.f32 %v3982_v35, %v5126_v27  ;;  %5290 = vst [vmem:[#allocation21_spill] sm:$0xff] %v4000_v30 }
 0x156   : > { %v1030_v37 = vadd.f32 %v1029_v24, %v862_v41  ;;  %1479 = vmatmul.f32.gmra.mxu1 %v3619_v50  ;;  %v1987_v41 = vsel %vm387_vm0, %v3393_v63, 0 }
 0x158   : > { %2374 = vmatmul.f32.gmra.mxu3 %v3951_v59  ;;  %v3994_v2 = vadd.f32 %v1228_v43, %v1030_v37  ;;  %v675_v16 = vpop.f32.mrf.mxu0  ;;  %2120 = vmatmul.f32.gmra.mxu2 %v2119_v39  ;;  %v2127_v59 = vand.u32 4294901760, %v2126_v15  ;;  %v5131_v43 = vand.u32 4294901760, %v4000_v30  ;;  %v4005_v37 = vand.u32 4294901760, %v1987_v41 }
 0x15a   : > { %5291 = vst [vmem:[#allocation22_spill] sm:$0xff] %v4005_v37  ;;  %v4018_v15 = vsub.f32 %v1987_v41, %v4005_v37  ;;  %v3395_v41 = vld [vmem:[%s5089_s1 + $0x150] sm:$0xff] }
 0x15b   : > { %v1234_v50 = vpop.f32.mrf.mxu3  ;;  %v865_v18 = vpop.f32.mrf.mxu1  ;;  %1337 = vmatmul.f32.gmra.mxu0 %v3627_v57 }
 0x15c   : > { %v1034_v24 = vpop.f32.mrf.mxu2  ;;  %v866_v40 = vadd.f32 %v865_v18, %v675_v16  ;;  %v2134_v16 = vsub.f32 %v4000_v30, %v5131_v43  ;;  %5292 = vst [vmem:[#allocation23_spill] sm:$0xff] %v4018_v15 }
 0x15e   : > { %v1035_v39 = vadd.f32 %v1034_v24, %v866_v40  ;;  %1483 = vmatmul.f32.gmra.mxu1 %v3627_v57  ;;  %v1990_v40 = vsel %vm387_vm0, %v3394_v11, 0 }
 0x160   : > { %2378 = vmatmul.f32.gmra.mxu3 %v3969_v26  ;;  %v4012_v63 = vadd.f32 %v1234_v50, %v1035_v39  ;;  %v683_v27 = vpop.f32.mrf.mxu0  ;;  %2128 = vmatmul.f32.gmra.mxu2 %v2127_v59  ;;  %v2135_v26 = vand.u32 4294901760, %v2134_v16  ;;  %v5136_v50 = vand.u32 4294901760, %v4018_v15  ;;  %v4023_v39 = vand.u32 4294901760, %v1990_v40 }
 0x162   : > { %5293 = vst [vmem:[#allocation24_spill] sm:$0xff] %v4023_v39  ;;  %v4036_v16 = vsub.f32 %v1990_v40, %v4023_v39  ;;  %v3396_v40 = vld [vmem:[%s5089_s1 + $0x158] sm:$0xff] }
 0x163   : > { %v1240_v57 = vpop.f32.mrf.mxu3  ;;  %v869_v18 = vpop.f32.mrf.mxu1  ;;  %1341 = vmatmul.f32.gmra.mxu0 %v3635_v0 }
 0x164   : > { %v1039_v24 = vpop.f32.mrf.mxu2  ;;  %v870_v35 = vadd.f32 %v869_v18, %v683_v27  ;;  %v2142_v27 = vsub.f32 %v4018_v15, %v5136_v50  ;;  %5294 = vst [vmem:[#allocation25_spill] sm:$0xff] %v4036_v16 }
 0x166   : > { %v1040_v59 = vadd.f32 %v1039_v24, %v870_v35  ;;  %1487 = vmatmul.f32.gmra.mxu1 %v3635_v0  ;;  %v1993_v35 = vsel %vm387_vm0, %v3395_v41, 0 }
 0x168   : > { %2382 = vmatmul.f32.gmra.mxu3 %v3987_v10  ;;  %v4030_v11 = vadd.f32 %v1240_v57, %v1040_v59  ;;  %v691_v43 = vpop.f32.mrf.mxu0  ;;  %2136 = vmatmul.f32.gmra.mxu2 %v2135_v26  ;;  %v2143_v10 = vand.u32 4294901760, %v2142_v27  ;;  %v5141_v57 = vand.u32 4294901760, %v4036_v16  ;;  %v4041_v59 = vand.u32 4294901760, %v1993_v35 }
 0x16a   : > { %5295 = vst [vmem:[#allocation26_spill] sm:$0xff] %v4041_v59  ;;  %v4054_v27 = vsub.f32 %v1993_v35, %v4041_v59  ;;  %v3397_v35 = vld [vmem:[%s5089_s1 + $0x160] sm:$0xff] }
 0x16b   : > { %v1246_v0 = vpop.f32.mrf.mxu3  ;;  %v873_v18 = vpop.f32.mrf.mxu1  ;;  %1345 = vmatmul.f32.gmra.mxu0 %v3643_v7 }
 0x16c   : > { %v1044_v24 = vpop.f32.mrf.mxu2  ;;  %v874_v30 = vadd.f32 %v873_v18, %v691_v43  ;;  %v2150_v43 = vsub.f32 %v4036_v16, %v5141_v57  ;;  %5296 = vst [vmem:[#allocation27_spill] sm:$0xff] %v4054_v27 }
 0x16e   : > { %v1045_v26 = vadd.f32 %v1044_v24, %v874_v30  ;;  %1491 = vmatmul.f32.gmra.mxu1 %v3643_v7  ;;  %v1996_v30 = vsel %vm387_vm0, %v3396_v40, 0 }
 0x170   : > { %2386 = vmatmul.f32.gmra.mxu3 %v4005_v37  ;;  %v4048_v41 = vadd.f32 %v1246_v0, %v1045_v26  ;;  %v699_v50 = vpop.f32.mrf.mxu0  ;;  %2144 = vmatmul.f32.gmra.mxu2 %v2143_v10  ;;  %v2151_v37 = vand.u32 4294901760, %v2150_v43  ;;  %v5146_v0 = vand.u32 4294901760, %v4054_v27  ;;  %v4059_v26 = vand.u32 4294901760, %v1996_v30 }
 0x172   : > { %5297 = vst [vmem:[#allocation28_spill] sm:$0xff] %v4059_v26  ;;  %v4072_v43 = vsub.f32 %v1996_v30, %v4059_v26  ;;  %v3398_v30 = vld [vmem:[%s5089_s1 + $0x168] sm:$0xff] }
 0x173   : > { %v1252_v7 = vpop.f32.mrf.mxu3  ;;  %v877_v18 = vpop.f32.mrf.mxu1  ;;  %1349 = vmatmul.f32.gmra.mxu0 %v3651_v14 }
 0x174   : > { %v1049_v24 = vpop.f32.mrf.mxu2  ;;  %v878_v15 = vadd.f32 %v877_v18, %v699_v50  ;;  %v2158_v50 = vsub.f32 %v4054_v27, %v5146_v0  ;;  %5298 = vst [vmem:[#allocation29_spill] sm:$0xff] %v4072_v43 }
 0x176   : > { %v1050_v10 = vadd.f32 %v1049_v24, %v878_v15  ;;  %1495 = vmatmul.f32.gmra.mxu1 %v3651_v14  ;;  %v1999_v15 = vsel %vm387_vm0, %v3397_v35, 0 }
 0x178   : > { %2390 = vmatmul.f32.gmra.mxu3 %v4023_v39  ;;  %v4066_v40 = vadd.f32 %v1252_v7, %v1050_v10  ;;  %v707_v57 = vpop.f32.mrf.mxu0  ;;  %2152 = vmatmul.f32.gmra.mxu2 %v2151_v37  ;;  %v2159_v39 = vand.u32 4294901760, %v2158_v50  ;;  %v5151_v7 = vand.u32 4294901760, %v4072_v43  ;;  %v4077_v10 = vand.u32 4294901760, %v1999_v15 }
 0x17a   : > { %5299 = vst [vmem:[#allocation30_spill] sm:$0xff] %v4077_v10  ;;  %v4090_v50 = vsub.f32 %v1999_v15, %v4077_v10  ;;  %v3399_v15 = vld [vmem:[%s5089_s1 + $0x170] sm:$0xff] }
 0x17b   : > { %v1258_v14 = vpop.f32.mrf.mxu3  ;;  %v881_v18 = vpop.f32.mrf.mxu1  ;;  %1353 = vmatmul.f32.gmra.mxu0 %v3659_v23 }
 0x17c   : > { %v1054_v24 = vpop.f32.mrf.mxu2  ;;  %v882_v16 = vadd.f32 %v881_v18, %v707_v57  ;;  %v2166_v57 = vsub.f32 %v4072_v43, %v5151_v7  ;;  %5300 = vst [vmem:[#allocation31_spill] sm:$0xff] %v4090_v50 }
 0x17e   : > { %v1055_v37 = vadd.f32 %v1054_v24, %v882_v16  ;;  %1499 = vmatmul.f32.gmra.mxu1 %v3659_v23  ;;  %v2002_v16 = vsel %vm387_vm0, %v3398_v30, 0 }
 0x180   : > { %2394 = vmatmul.f32.gmra.mxu3 %v4041_v59  ;;  %v4084_v35 = vadd.f32 %v1258_v14, %v1055_v37  ;;  %v715_v0 = vpop.f32.mrf.mxu0  ;;  %2160 = vmatmul.f32.gmra.mxu2 %v2159_v39  ;;  %v2167_v59 = vand.u32 4294901760, %v2166_v57  ;;  %v5156_v14 = vand.u32 4294901760, %v4090_v50  ;;  %v4095_v37 = vand.u32 4294901760, %v2002_v16 }
 0x182   : > { %5301 = vst [vmem:[#allocation32_spill] sm:$0xff] %v4095_v37  ;;  %v4108_v57 = vsub.f32 %v2002_v16, %v4095_v37 }
 0x183   : > { %v1264_v23 = vpop.f32.mrf.mxu3  ;;  %v885_v18 = vpop.f32.mrf.mxu1  ;;  %1357 = vmatmul.f32.gmra.mxu0 %v3667_v31 }
 0x184   : > { %v1059_v24 = vpop.f32.mrf.mxu2  ;;  %v886_v27 = vadd.f32 %v885_v18, %v715_v0  ;;  %v2174_v0 = vsub.f32 %v4090_v50, %v5156_v14  ;;  %5303 = vst [vmem:[#allocation34_spill] sm:$0xff] %v4108_v57 }
 0x186   : > { %v1060_v39 = vadd.f32 %v1059_v24, %v886_v27  ;;  %1503 = vmatmul.f32.gmra.mxu1 %v3667_v31  ;;  %v2005_v27 = vsel %vm387_vm0, %v3399_v15, 0 }
 0x188   : > { %2398 = vmatmul.f32.gmra.mxu3 %v4059_v26  ;;  %v4102_v30 = vadd.f32 %v1264_v23, %v1060_v39  ;;  %v723_v7 = vpop.f32.mrf.mxu0  ;;  %2168 = vmatmul.f32.gmra.mxu2 %v2167_v59  ;;  %v2175_v26 = vand.u32 4294901760, %v2174_v0  ;;  %v5161_v23 = vand.u32 4294901760, %v4108_v57  ;;  %v4113_v39 = vand.u32 4294901760, %v2005_v27  ;;  %v3400_v59 = vld [vmem:[%s5089_s1 + $0x178] sm:$0xff] }
 0x18a   : > { %5302 = vst [vmem:[#allocation33_spill] sm:$0xff] %v4102_v30  ;;  %v4126_v0 = vsub.f32 %v2005_v27, %v4113_v39  ;;  %v3401_v27 = vld [vmem:[%s5089_s1 + $0x180] sm:$0xff] }
 0x18b   : > { %v1270_v31 = vpop.f32.mrf.mxu3  ;;  %v889_v18 = vpop.f32.mrf.mxu1  ;;  %1361 = vmatmul.f32.gmra.mxu0 %v3675_v38  ;;  %5304 = vst [vmem:[#allocation35_spill] sm:$0xff] %v4113_v39 }
 0x18c   : > { %v1064_v24 = vpop.f32.mrf.mxu2  ;;  %v890_v43 = vadd.f32 %v889_v18, %v723_v7  ;;  %v2182_v7 = vsub.f32 %v4108_v57, %v5161_v23  ;;  %5306 = vst [vmem:[#allocation37_spill] sm:$0xff] %v4126_v0  ;;  %v2008_v18 = vsel %vm387_vm0, %v3400_v59, 0 }
 0x18e   : > { %v1065_v14 = vadd.f32 %v1064_v24, %v890_v43  ;;  %1507 = vmatmul.f32.gmra.mxu1 %v3675_v38  ;;  %v4130_v24 = vand.u32 4294901760, %v2008_v18 }
 0x190   : > { %2402 = vmatmul.f32.gmra.mxu3 %v4077_v10  ;;  %v4120_v16 = vadd.f32 %v1270_v31, %v1065_v14  ;;  %v731_v15 = vpop.f32.mrf.mxu0  ;;  %2176 = vmatmul.f32.gmra.mxu2 %v2175_v26  ;;  %5307 = vst [vmem:[#allocation38_spill] sm:$0xff] %v4130_v24  ;;  %v2183_v31 = vand.u32 4294901760, %v2182_v7  ;;  %v5166_v26 = vand.u32 4294901760, %v4126_v0  ;;  %v4139_v59 = vsub.f32 %v2008_v18, %v4130_v24 }
 0x192   : > { %5305 = vst [vmem:[#allocation36_spill] sm:$0xff] %v4120_v16  ;;  %v2190_v7 = vsub.f32 %v4126_v0, %v5166_v26  ;;  %v5171_v18 = vand.u32 4294901760, %v4139_v59 }
 0x193   : > { %v1276_v50 = vpop.f32.mrf.mxu3  ;;  %v893_v43 = vpop.f32.mrf.mxu1  ;;  %1365 = vmatmul.f32.gmra.mxu0 %v3683_v46  ;;  %5308 = vst [vmem:[#allocation39_spill] sm:$0xff] %v4139_v59 }
 0x194   : > { %v1069_v38 = vpop.f32.mrf.mxu2  ;;  %v894_v14 = vadd.f32 %v893_v43, %v731_v15 }
 0x196   : > { %v1070_v10 = vadd.f32 %v1069_v38, %v894_v14  ;;  %1511 = vmatmul.f32.gmra.mxu1 %v3683_v46  ;;  %v2011_v46 = vsel %vm387_vm0, %v3401_v27, 0  ;;  %v2198_v27 = vsub.f32 %v4139_v59, %v5171_v18  ;;  %v5172_v18 = vmov 0  }
 0x197   : > { %v4151_v16 = vand.u32 4294901760, %v2011_v46 }
 0x198   : > { %2406 = vmatmul.f32.gmra.mxu3 %v4095_v37  ;;  %v4143_v23 = vadd.f32 %v1276_v50, %v1070_v10  ;;  %v739_v15 = vpop.f32.mrf.mxu0  ;;  %2184 = vmatmul.f32.gmra.mxu2 %v2183_v31  ;;  %v2191_v37 = vand.u32 4294901760, %v2190_v7  ;;  %v338_v50 = vld [vmem:[%s4154_s12] sm:$0xff]  ;;  %v3402_v31 = vld [vmem:[%s5089_s1 + $0x188] sm:$0xff]  ;;  %v2199_v0 = vand.u32 4294901760, %v2198_v27 }
 0x199   : > { %5310 = vst [vmem:[#allocation41_spill] sm:$0xff] %v4151_v16  ;;  %vm346_vm1 = vnez %v338_v50 }
 0x19a   : > { %5309 = vst [vmem:[#allocation40_spill] sm:$0xff] %v4143_v23 }
 0x19b   : > { %v1282_v43 = vpop.f32.mrf.mxu3  ;;  %v897_v38 = vpop.f32.mrf.mxu1  ;;  %1369 = vmatmul.f32.gmra.mxu0 %v3691_v54 }
 0x19c   : > { %v1074_v14 = vpop.f32.mrf.mxu2  ;;  %v898_v57 = vadd.f32 %v897_v38, %v739_v15 }
 0x19e   : > { %v1075_v10 = vadd.f32 %v1074_v14, %v898_v57  ;;  %1515 = vmatmul.f32.gmra.mxu1 %v3691_v54  ;;  %v4167_v54 = vsub.f32 %v2011_v46, %v4151_v16  ;;  %v2014_v57 = vsel %vm387_vm0, %v3402_v31, 0  ;;  %v3403_v46 = vld [vmem:[%s5089_s1 + $0x190] sm:$0xff] }
 0x19f   : > { %v2017_v27 = vsel %vm387_vm0, %v3403_v46, 0 }
 0x1a0   : > { %2410 = vmatmul.f32.gmra.mxu3 %v4113_v39  ;;  %v4164_v15 = vadd.f32 %v1282_v43, %v1075_v10  ;;  %v747_v7 = vpop.f32.mrf.mxu0  ;;  %2192 = vmatmul.f32.gmra.mxu2 %v2191_v37  ;;  %5312 = vst [vmem:[#allocation43_spill] sm:$0xff] %v4167_v54  ;;  %v5178_v23 = vand.u32 4294901760, %v4167_v54  ;;  %v4173_v43 = vsel %vm346_vm1, 16843009, %v5172_v18  ;;  %v4175_v37 = vand.u32 4294901760, %v2014_v57 }
 0x1a1   : > { %v1631_v50 = vunpack.c.0.s8 %v4173_v43  ;;  %v1632_v31 = vunpack.c.1.s8 %v4173_v43 }
 0x1a2   : > { %5311 = vst [vmem:[#allocation42_spill] sm:$0xff] %v4164_v15  ;;  %v2206_v18 = vsub.f32 %v4167_v54, %v5178_v23  ;;  %v3404_v23 = vld [vmem:[%s5089_s1 + $0x198] sm:$0xff] }
 0x1a3   : > { %v1288_v38 = vpop.f32.mrf.mxu3  ;;  %v901_v14 = vpop.f32.mrf.mxu1  ;;  %1373 = vmatmul.f32.gmra.mxu0 %v3699_v62  ;;  %5313 = vst [vmem:[#allocation44_spill] sm:$0xff] %v4175_v37  ;;  %v1663_v15 = vpack.c.b16 %v1631_v50, %v1631_v50  ;;  %v1665_v46 = vpack.c.b16 %v1632_v31, %v1632_v31  ;;  %v1633_v50 = vunpack.c.2.s8 %v4173_v43 }
 0x1a4   : > { %v1079_v26 = vpop.f32.mrf.mxu2  ;;  %v902_v39 = vadd.f32 %v901_v14, %v747_v7 }
 0x1a5   : > { %v1666_v30 = vpack.c.b8 %v1665_v46, %v1665_v46 }
 0x1a6   : > { %v1080_v10 = vadd.f32 %v1079_v26, %v902_v39  ;;  %1519 = vmatmul.f32.gmra.mxu1 %v3699_v62  ;;  %v4191_v39 = vsub.f32 %v2014_v57, %v4175_v37  ;;  %v4193_v26 = vand.u32 4294901760, %v2017_v27 }
 0x1a7   : > { %vm1728_vm3 = vnez %v1666_v30 }
 0x1a8   : > { %2414 = vmatmul.f32.gmra.mxu3 %v4130_v24  ;;  %v4185_v7 = vadd.f32 %v1288_v38, %v1080_v10  ;;  %v755_v14 = vpop.f32.mrf.mxu0  ;;  %2200 = vmatmul.f32.gmra.mxu2 %v2199_v0  ;;  %5315 = vst [vmem:[#allocation46_spill] sm:$0xff] %v4191_v39  ;;  %v2207_v10 = vand.u32 4294901760, %v2206_v18  ;;  %v5181_v0 = vand.u32 4294901760, %v4191_v39  ;;  %v4202_v57 = vsub.f32 %v2017_v27, %v4193_v26 }
 0x1aa   : > { %5314 = vst [vmem:[#allocation45_spill] sm:$0xff] %v4185_v7  ;;  %v1664_v7 = vpack.c.b8 %v1663_v15, %v1663_v15  ;;  %v2214_v31 = vsub.f32 %v4191_v39, %v5181_v0  ;;  %v5319_v0 = vmov 0   ;;  %v5320_v30 = vand.u32 4294901760, %v4202_v57  ;;  %v339_v39 = vld [vmem:[%s4154_s12 + $0x8] sm:$0xff] }
 0x1ab   : > { %v1294_v62 = vpop.f32.mrf.mxu3  ;;  %v905_v59 = vpop.f32.mrf.mxu1  ;;  %1377 = vmatmul.f32.gmra.mxu0 %v3707_v6  ;;  %5316 = vst [vmem:[#allocation47_spill] sm:$0xff] %v4202_v57  ;;  %vm347_vm4 = vnez %v339_v39  ;;  %v5322_v39 = vmov 0 }
 0x1ac   : > { %v1084_v24 = vpop.f32.mrf.mxu2  ;;  %v906_v38 = vadd.f32 %v905_v59, %v755_v14  ;;  %vm1727_vm2 = vnez %v1664_v7  ;;  %v1760_v7 = vsel %vm1728_vm3, 16843009, %v5319_v0 }
 0x1ad   : > { %v1759_v27 = vsel %vm1727_vm2, 16843009, %v5319_v0 }
 0x1ae   : > { %v1085_v54 = vadd.f32 %v1084_v24, %v906_v38  ;;  %1523 = vmatmul.f32.gmra.mxu1 %v3707_v6  ;;  %v2020_v24 = vsel %vm387_vm0, %v3404_v23, 0  ;;  %v3405_v23 = vld [vmem:[%s5089_s1 + $0x1a0] sm:$0xff] }
 0x1b0   : > { %2418 = vmatmul.f32.gmra.mxu3 %v4151_v16  ;;  %v4206_v59 = vadd.f32 %v1294_v62, %v1085_v54  ;;  %v1318_v18 = vpop.f32.mrf.mxu0  ;;  %2208 = vmatmul.f32.gmra.mxu2 %v2207_v10  ;;  %v1667_v54 = vpack.c.b16 %v1633_v50, %v1633_v50  ;;  %v4214_v62 = vand.u32 4294901760, %v2020_v24  ;;  %v2215_v10 = vand.u32 4294901760, %v2214_v31 }
 0x1b1   : > { %v1319_v46 = vadd.f32 %v1318_v18, %v3741_v52  ;;  %v2222_v50 = vsub.f32 %v4202_v57, %v5320_v30  ;;  %v1634_v31 = vunpack.c.3.s8 %v4173_v43 }
 0x1b2   : > { %5317 = vst [vmem:[#allocation48_spill] sm:$0xff] %v4206_v59  ;;  %v1668_v52 = vpack.c.b8 %v1667_v54, %v1667_v54  ;;  %v4231_v18 = vsub.f32 %v2020_v24, %v4214_v62  ;;  %v1792_v59 = vunpack.c.0.s8 %v1760_v7 }
 0x1b3   : > { %v2355_v6 = vpop.f32.mrf.mxu3  ;;  %1381 = vmatmul.f32.gmra.mxu0 %v3715_v17  ;;  %v1464_v15 = vpop.f32.mrf.mxu1  ;;  %v2223_v57 = vand.u32 4294901760, %v2222_v50  ;;  %v1669_v43 = vpack.c.b16 %v1634_v31, %v1634_v31 }
 0x1b4   : > { %v2081_v14 = vpop.f32.mrf.mxu2  ;;  %5321 = vst [vmem:[#allocation50_spill] sm:$0xff] %v4231_v18  ;;  %vm1729_vm5 = vnez %v1668_v52  ;;  %v5190_v24 = vand.u32 4294901760, %v4231_v18  ;;  %vm4249_vm7 = vcmp.ne.s32.totalorder %v1792_v59, 0 }
 0x1b5   : > { %v4217_v38 = vadd.f32 %v2355_v6, %v2081_v14  ;;  %v1465_v6 = vadd.f32 %v1464_v15, %v1319_v46  ;;  %v1761_v50 = vsel %vm1729_vm5, 16843009, %v5319_v0 }
 0x1b6   : > { %1527 = vmatmul.f32.gmra.mxu1 %v3715_v17  ;;  %v2023_v17 = vsel %vm387_vm0, %v3405_v23, 0 }
 0x1b7   : > { %5318 = vst [vmem:[#allocation49_spill] sm:$0xff] %v4217_v38  ;;  %v1791_v38 = vunpack.c.0.s8 %v1759_v27  ;;  %v4238_v15 = vand.u32 4294901760, %v2023_v17  ;;  %v1591_v46 = vand.u32 2147483647, %v1465_v6  ;;  %v5325_v27 = vmov 0 }
 0x1b8   : > { %2422 = vmatmul.f32.gmra.mxu3 %v4175_v37  ;;  %v1322_v14 = vpop.f32.mrf.mxu0  ;;  %2216 = vmatmul.f32.gmra.mxu2 %v2215_v10  ;;  %v5326_v27 = vsel %vm4249_vm7, 4294967295, %v5325_v27 }
 0x1b9   : > { %v1323_v16 = vadd.f32 %v1322_v14, %v3751_v8  ;;  %v4243_v8 = vsel %vm347_vm4, 16843009, %v5319_v0  ;;  %vm4245_vm6 = vcmp.ne.s32.totalorder %v1791_v38, 0  ;;  %5327 = vst [vmem:[#allocation52_spill] sm:$0xff] %v5326_v27  ;;  %v1670_v38 = vpack.c.b8 %v1669_v43, %v1669_v43 }
 0x1ba   : > { %v5323_v39 = vsel %vm4245_vm6, 4294967295, %v5322_v39  ;;  %v1635_v59 = vunpack.c.0.s8 %v4243_v8  ;;  %v1855_v52 = vsel %vm4245_vm6, %v1591_v46, 0.0  ;;  %v4268_v6 = vsub.f32 %v2023_v17, %v4238_v15 }
 0x1bb   : > { %v2359_v30 = vpop.f32.mrf.mxu3  ;;  %1385 = vmatmul.f32.gmra.mxu0 %v3723_v25  ;;  %v1468_v54 = vpop.f32.mrf.mxu1  ;;  %5324 = vst [vmem:[#allocation51_spill] sm:$0xff] %v5323_v39  ;;  %vm1730_vm8 = vnez %v1670_v38 }
 0x1bc   : > { %v2089_v37 = vpop.f32.mrf.mxu2  ;;  %v1469_v10 = vadd.f32 %v1468_v54, %v1323_v16  ;;  %v3406_v16 = vld [vmem:[%s5089_s1 + $0x1a8] sm:$0xff]  ;;  %5328 = vst [vmem:[#allocation53_spill] sm:$0xff] %v4268_v6  ;;  %v1793_v54 = vunpack.c.0.s8 %v1761_v50  ;;  %v1671_v27 = vpack.c.b16 %v1635_v59, %v1635_v59  ;;  %v3407_v50 = vld [vmem:[%s5089_s1 + $0x1b0] sm:$0xff] }
 0x1bd   : > { %v4240_v23 = vadd.f32 %v2359_v30, %v2089_v37  ;;  %v2230_v37 = vsub.f32 %v4231_v18, %v5190_v24 }
 0x1be   : > { %v1592_v7 = vand.u32 2147483647, %v1469_v10  ;;  %1531 = vmatmul.f32.gmra.mxu1 %v3723_v25  ;;  %v2026_v10 = vsel %vm387_vm0, %v3406_v16, 0  ;;  %vm4278_vm9 = vcmp.ne.s32.totalorder %v1793_v54, 0 }
 0x1bf   : > { %v2231_v46 = vand.u32 4294901760, %v2230_v37  ;;  %v4276_v17 = vand.u32 4294901760, %v2026_v10  ;;  %v1762_v37 = vsel %vm1730_vm8, 16843009, %v5319_v0 }
 0x1c0   : > { %2426 = vmatmul.f32.gmra.mxu3 %v4193_v26  ;;  %v1856_v25 = vsel %vm4249_vm7, %v1592_v7, 0.0  ;;  %v1326_v31 = vpop.f32.mrf.mxu0  ;;  %2224 = vmatmul.f32.gmra.mxu2 %v2223_v57  ;;  %v5196_v57 = vand.u32 4294901760, %v4268_v6  ;;  %v1794_v54 = vunpack.c.0.s8 %v1762_v37 }
 0x1c1   : > { %v1887_v14 = vadd.f32 %v1856_v25, %v1855_v52  ;;  %v1327_v30 = vadd.f32 %v1326_v31, %v3761_v29  ;;  %v5329_v29 = vmov 0  ;;  %v4295_v25 = vsub.f32 %v2026_v10, %v4276_v17 }
 0x1c2   : > { %v5330_v29 = vsel %vm4278_vm9, 4294967295, %v5329_v29  ;;  %v2238_v52 = vsub.f32 %v4268_v6, %v5196_v57  ;;  %vm4305_vm11 = vcmp.ne.s32.totalorder %v1794_v54, 0 }
 0x1c3   : > { %v2363_v43 = vpop.f32.mrf.mxu3  ;;  %1389 = vmatmul.f32.gmra.mxu0 %v3731_v34  ;;  %v1472_v24 = vpop.f32.mrf.mxu1  ;;  %5331 = vst [vmem:[#allocation54_spill] sm:$0xff] %v5330_v29  ;;  %v5200_v6 = vand.u32 4294901760, %v4295_v25 }
 0x1c4   : > { %v2097_v18 = vpop.f32.mrf.mxu2  ;;  %v1473_v7 = vadd.f32 %v1472_v24, %v1327_v30  ;;  %v1672_v24 = vpack.c.b8 %v1671_v27, %v1671_v27  ;;  %5332 = vst [vmem:[#allocation55_spill] sm:$0xff] %v4295_v25  ;;  %v2239_v10 = vand.u32 4294901760, %v2238_v52 }
 0x1c5   : > { %v4273_v39 = vadd.f32 %v2363_v43, %v2097_v18  ;;  %v1636_v18 = vunpack.c.1.s8 %v4243_v8 }
 0x1c6   : > { %v1593_v16 = vand.u32 2147483647, %v1473_v7  ;;  %1535 = vmatmul.f32.gmra.mxu1 %v3731_v34  ;;  %v2029_v34 = vsel %vm387_vm0, %v3407_v50, 0  ;;  %vm1731_vm10 = vnez %v1672_v24 }
 0x1c7   : > { %v1673_v27 = vpack.c.b16 %v1636_v18, %v1636_v18  ;;  %v1763_v37 = vsel %vm1731_vm10, 16843009, %v5319_v0 }
 0x1c8   : > { %2430 = vmatmul.f32.gmra.mxu3 %v4214_v62  ;;  %v1857_v38 = vsel %vm4278_vm9, %v1593_v16, 0.0  ;;  %v1330_v59 = vpop.f32.mrf.mxu0  ;;  %2232 = vmatmul.f32.gmra.mxu2 %v2231_v46  ;;  %v4300_v46 = vand.u32 4294901760, %v2029_v34 }
 0x1c9   : > { %v1888_v31 = vadd.f32 %v1887_v14, %v1857_v38  ;;  %v1331_v30 = vadd.f32 %v1330_v59, %v3771_v48  ;;  %v5333_v14 = vmov 0  ;;  %v3408_v48 = vld [vmem:[%s5089_s1 + $0x1b8] sm:$0xff]  ;;  %v1674_v18 = vpack.c.b8 %v1673_v27, %v1673_v27 }
 0x1ca   : > { %v5334_v14 = vsel %vm4305_vm11, 4294967295, %v5333_v14  ;;  %v4316_v24 = vsub.f32 %v2029_v34, %v4300_v46  ;;  %v1637_v38 = vunpack.c.2.s8 %v4243_v8 }
 0x1cb   : > { %v2367_v43 = vpop.f32.mrf.mxu3  ;;  %1393 = vmatmul.f32.gmra.mxu0 %v3739_v51  ;;  %v1476_v7 = vpop.f32.mrf.mxu1  ;;  %5335 = vst [vmem:[#allocation56_spill] sm:$0xff] %v5334_v14  ;;  %vm1732_vm12 = vnez %v1674_v18  ;;  %v3409_v18 = vld [vmem:[%s5089_s1 + $0x1c0] sm:$0xff] }
 0x1cc   : > { %v2105_v16 = vpop.f32.mrf.mxu2  ;;  %v1477_v29 = vadd.f32 %v1476_v7, %v1331_v30  ;;  %5336 = vst [vmem:[#allocation57_spill] sm:$0xff] %v4316_v24 }
 0x1cd   : > { %v4302_v57 = vadd.f32 %v2367_v43, %v2105_v16  ;;  %v1795_v43 = vunpack.c.0.s8 %v1763_v37  ;;  %v5203_v16 = vand.u32 4294901760, %v4316_v24 }
 0x1ce   : > { %v1594_v50 = vand.u32 2147483647, %v1477_v29  ;;  %1539 = vmatmul.f32.gmra.mxu1 %v3739_v51  ;;  %v2246_v29 = vsub.f32 %v4295_v25, %v5200_v6  ;;  %v2032_v51 = vsel %vm387_vm0, %v3408_v48, 0 }
 0x1cf   : > { %vm4332_vm13 = vcmp.ne.s32.totalorder %v1795_v43, 0 }
 0x1d0   : > { %2434 = vmatmul.f32.gmra.mxu3 %v4238_v15  ;;  %v1858_v59 = vsel %vm4305_vm11, %v1594_v50, 0.0  ;;  %v1334_v52 = vpop.f32.mrf.mxu0  ;;  %2240 = vmatmul.f32.gmra.mxu2 %v2239_v10  ;;  %v1675_v10 = vpack.c.b16 %v1637_v38, %v1637_v38  ;;  %v4328_v50 = vand.u32 4294901760, %v2032_v51  ;;  %v2247_v48 = vand.u32 4294901760, %v2246_v29  ;;  %v340_v38 = vld [vmem:[%s4154_s12 + $0x10] sm:$0xff] }
 0x1d1   : > { %v1889_v30 = vadd.f32 %v1888_v31, %v1858_v59  ;;  %v1335_v54 = vadd.f32 %v1334_v52, %v3781_v9  ;;  %v5337_v31 = vmov 0  ;;  %v1764_v9 = vsel %vm1732_vm12, 16843009, %v5319_v0 }
 0x1d2   : > { %v5338_v31 = vsel %vm4332_vm13, 4294967295, %v5337_v31  ;;  %v2254_v59 = vsub.f32 %v4316_v24, %v5203_v16  ;;  %v1676_v52 = vpack.c.b8 %v1675_v10, %v1675_v10  ;;  %v4347_v29 = vsub.f32 %v2032_v51, %v4328_v50 }
 0x1d3   : > { %v2371_v27 = vpop.f32.mrf.mxu3  ;;  %1397 = vmatmul.f32.gmra.mxu0 %v3749_v5  ;;  %v1480_v34 = vpop.f32.mrf.mxu1  ;;  %5339 = vst [vmem:[#allocation58_spill] sm:$0xff] %v5338_v31  ;;  %v1796_v43 = vunpack.c.0.s8 %v1764_v9  ;;  %vm348_vm14 = vnez %v340_v38  ;;  %v3410_v38 = vld [vmem:[%s5089_s1 + $0x1c8] sm:$0xff] }
 0x1d4   : > { %v2113_v7 = vpop.f32.mrf.mxu2  ;;  %v1481_v14 = vadd.f32 %v1480_v34, %v1335_v54  ;;  %5340 = vst [vmem:[#allocation59_spill] sm:$0xff] %v4347_v29  ;;  %v1638_v54 = vunpack.c.3.s8 %v4243_v8  ;;  %v2255_v16 = vand.u32 4294901760, %v2254_v59  ;;  %vm1733_vm15 = vnez %v1676_v52 }
 0x1d5   : > { %v4330_v6 = vadd.f32 %v2371_v27, %v2113_v7  ;;  %v2035_v7 = vsel %vm387_vm0, %v3409_v18, 0  ;;  %v5207_v8 = vand.u32 4294901760, %v4347_v29  ;;  %vm4363_vm1 = vcmp.ne.s32.totalorder %v1796_v43, 0 }
 0x1d6   : > { %v1595_v37 = vand.u32 2147483647, %v1481_v14  ;;  %1543 = vmatmul.f32.gmra.mxu1 %v3749_v5  ;;  %v1677_v24 = vpack.c.b16 %v1638_v54, %v1638_v54  ;;  %v1765_v18 = vsel %vm1733_vm15, 16843009, %v5319_v0 }
 0x1d8   : > { %2438 = vmatmul.f32.gmra.mxu3 %v4276_v17  ;;  %v1859_v5 = vsel %vm4332_vm13, %v1595_v37, 0.0  ;;  %v1338_v14 = vpop.f32.mrf.mxu0  ;;  %2248 = vmatmul.f32.gmra.mxu2 %v2247_v48  ;;  %v4358_v48 = vand.u32 4294901760, %v2035_v7  ;;  %v1678_v59 = vpack.c.b8 %v1677_v24, %v1677_v24 }
 0x1d9   : > { %v1890_v27 = vadd.f32 %v1889_v30, %v1859_v5  ;;  %v1339_v34 = vadd.f32 %v1338_v14, %v3791_v33  ;;  %v4361_v33 = vsel %vm348_vm14, 16843009, %v5319_v0  ;;  %v5341_v30 = vmov 0 }
 0x1da   : > { %v5342_v30 = vsel %vm4363_vm1, 4294967295, %v5341_v30  ;;  %v1639_v52 = vunpack.c.0.s8 %v4361_v33  ;;  %vm1734_vm2 = vnez %v1678_v59 }
 0x1db   : > { %v2375_v25 = vpop.f32.mrf.mxu3  ;;  %1401 = vmatmul.f32.gmra.mxu0 %v3759_v28  ;;  %v1484_v10 = vpop.f32.mrf.mxu1  ;;  %5343 = vst [vmem:[#allocation60_spill] sm:$0xff] %v5342_v30 }
 0x1dc   : > { %v2121_v51 = vpop.f32.mrf.mxu2  ;;  %v1485_v37 = vadd.f32 %v1484_v10, %v1339_v34  ;;  %v1797_v34 = vunpack.c.0.s8 %v1765_v18  ;;  %v2038_v10 = vsel %vm387_vm0, %v3410_v38, 0  ;;  %v1766_v38 = vsel %vm1734_vm2, 16843009, %v5319_v0 }
 0x1dd   : > { %v4356_v31 = vadd.f32 %v2375_v25, %v2121_v51  ;;  %v2262_v25 = vsub.f32 %v4347_v29, %v5207_v8  ;;  %v1679_v29 = vpack.c.b16 %v1639_v52, %v1639_v52 }
 0x1de   : > { %v1596_v9 = vand.u32 2147483647, %v1485_v37  ;;  %1547 = vmatmul.f32.gmra.mxu1 %v3759_v28  ;;  %v4380_v28 = vsub.f32 %v2035_v7, %v4358_v48  ;;  %v4388_v7 = vand.u32 4294901760, %v2038_v10  ;;  %vm4390_vm3 = vcmp.ne.s32.totalorder %v1797_v34, 0 }
 0x1df   : > { %v2263_v8 = vand.u32 4294901760, %v2262_v25  ;;  %v1640_v25 = vunpack.c.1.s8 %v4361_v33  ;;  %v1680_v59 = vpack.c.b8 %v1679_v29, %v1679_v29 }
 0x1e0   : > { %2442 = vmatmul.f32.gmra.mxu3 %v4300_v46  ;;  %v1860_v54 = vsel %vm4363_vm1, %v1596_v9, 0.0  ;;  %v1342_v5 = vpop.f32.mrf.mxu0  ;;  %2256 = vmatmul.f32.gmra.mxu2 %v2255_v16  ;;  %5344 = vst [vmem:[#allocation61_spill] sm:$0xff] %v4380_v28  ;;  %v5212_v16 = vand.u32 4294901760, %v4380_v28 }
 0x1e1   : > { %v1891_v14 = vadd.f32 %v1890_v27, %v1860_v54  ;;  %v1343_v43 = vadd.f32 %v1342_v5, %v3801_v58  ;;  %v5345_v58 = vmov 0  ;;  %v3411_v27 = vld [vmem:[%s5089_s1 + $0x1d0] sm:$0xff]  ;;  %v1681_v29 = vpack.c.b16 %v1640_v25, %v1640_v25 }
 0x1e2   : > { %v5346_v58 = vsel %vm4390_vm3, 4294967295, %v5345_v58  ;;  %v2270_v5 = vsub.f32 %v4380_v28, %v5212_v16  ;;  %vm1735_vm4 = vnez %v1680_v59 }
 0x1e3   : > { %v2379_v51 = vpop.f32.mrf.mxu3  ;;  %1405 = vmatmul.f32.gmra.mxu0 %v3769_v47  ;;  %v1488_v24 = vpop.f32.mrf.mxu1  ;;  %5347 = vst [vmem:[#allocation62_spill] sm:$0xff] %v5346_v58  ;;  %v1682_v25 = vpack.c.b8 %v1681_v29, %v1681_v29 }
 0x1e4   : > { %v2129_v37 = vpop.f32.mrf.mxu2  ;;  %v1489_v9 = vadd.f32 %v1488_v24, %v1343_v43  ;;  %v4407_v43 = vsub.f32 %v2038_v10, %v4388_v7  ;;  %v1798_v24 = vunpack.c.0.s8 %v1766_v38  ;;  %v2271_v10 = vand.u32 4294901760, %v2270_v5 }
 0x1e5   : > { %v4385_v30 = vadd.f32 %v2379_v51, %v2129_v37  ;;  %v1767_v38 = vsel %vm1735_vm4, 16843009, %v5319_v0  ;;  %vm1736_vm8 = vnez %v1682_v25  ;;  %v3413_v25 = vld [vmem:[%s5089_s1 + $0x1e0] sm:$0xff] }
 0x1e6   : > { %v1597_v18 = vand.u32 2147483647, %v1489_v9  ;;  %1551 = vmatmul.f32.gmra.mxu1 %v3769_v47  ;;  %5348 = vst [vmem:[#allocation63_spill] sm:$0xff] %v4407_v43  ;;  %v2041_v47 = vsel %vm387_vm0, %v3411_v27, 0  ;;  %v5216_v28 = vand.u32 4294901760, %v4407_v43  ;;  %vm4417_vm5 = vcmp.ne.s32.totalorder %v1798_v24, 0 }
 0x1e8   : > { %2446 = vmatmul.f32.gmra.mxu3 %v4328_v50  ;;  %v1861_v52 = vsel %vm4390_vm3, %v1597_v18, 0.0  ;;  %v1346_v54 = vpop.f32.mrf.mxu0  ;;  %2264 = vmatmul.f32.gmra.mxu2 %v2263_v8  ;;  %v4412_v8 = vand.u32 4294901760, %v2041_v47 }
 0x1e9   : > { %v1892_v34 = vadd.f32 %v1891_v14, %v1861_v52  ;;  %v1347_v51 = vadd.f32 %v1346_v54, %v3811_v20  ;;  %v5349_v14 = vmov 0  ;;  %v3412_v20 = vld [vmem:[%s5089_s1 + $0x1d8] sm:$0xff]  ;;  %v1641_v52 = vunpack.c.2.s8 %v4361_v33 }
 0x1ea   : > { %v5350_v14 = vsel %vm4417_vm5, 4294967295, %v5349_v14  ;;  %v4428_v59 = vsub.f32 %v2041_v47, %v4412_v8 }
 0x1eb   : > { %v2383_v37 = vpop.f32.mrf.mxu3  ;;  %1409 = vmatmul.f32.gmra.mxu0 %v3779_v4  ;;  %v1492_v9 = vpop.f32.mrf.mxu1  ;;  %5351 = vst [vmem:[#allocation64_spill] sm:$0xff] %v5350_v14 }
 0x1ec   : > { %v2137_v18 = vpop.f32.mrf.mxu2  ;;  %v1493_v58 = vadd.f32 %v1492_v9, %v1347_v51  ;;  %5352 = vst [vmem:[#allocation65_spill] sm:$0xff] %v4428_v59 }
 0x1ed   : > { %v4414_v16 = vadd.f32 %v2383_v37, %v2137_v18  ;;  %v1799_v37 = vunpack.c.0.s8 %v1767_v38  ;;  %v5219_v18 = vand.u32 4294901760, %v4428_v59 }
 0x1ee   : > { %v1598_v27 = vand.u32 2147483647, %v1493_v58  ;;  %1555 = vmatmul.f32.gmra.mxu1 %v3779_v4  ;;  %v2278_v58 = vsub.f32 %v4407_v43, %v5216_v28  ;;  %v2044_v4 = vsel %vm387_vm0, %v3412_v20, 0 }
 0x1ef   : > { %vm4444_vm10 = vcmp.ne.s32.totalorder %v1799_v37, 0 }
 0x1f0   : > { %2450 = vmatmul.f32.gmra.mxu3 %v4358_v48  ;;  %v1862_v54 = vsel %vm4417_vm5, %v1598_v27, 0.0  ;;  %v1350_v5 = vpop.f32.mrf.mxu0  ;;  %2272 = vmatmul.f32.gmra.mxu2 %v2271_v10  ;;  %v4440_v10 = vand.u32 4294901760, %v2044_v4  ;;  %v1683_v27 = vpack.c.b16 %v1641_v52, %v1641_v52  ;;  %v2279_v20 = vand.u32 4294901760, %v2278_v58 }
 0x1f1   : > { %v1893_v51 = vadd.f32 %v1892_v34, %v1862_v54  ;;  %v1351_v24 = vadd.f32 %v1350_v5, %v3821_v45  ;;  %v5353_v34 = vmov 0  ;;  %v1768_v45 = vsel %vm1736_vm8, 16843009, %v5319_v0  ;;  %v341_v54 = vld [vmem:[%s4154_s12 + $0x18] sm:$0xff] }
 0x1f2   : > { %v5354_v34 = vsel %vm4444_vm10, 4294967295, %v5353_v34  ;;  %v2286_v52 = vsub.f32 %v4428_v59, %v5219_v18  ;;  %v4459_v5 = vsub.f32 %v2044_v4, %v4440_v10  ;;  %v1684_v58 = vpack.c.b8 %v1683_v27, %v1683_v27 }
 0x1f3   : > { %v2387_v29 = vpop.f32.mrf.mxu3  ;;  %1413 = vmatmul.f32.gmra.mxu0 %v3789_v32  ;;  %v1496_v47 = vpop.f32.mrf.mxu1  ;;  %5355 = vst [vmem:[#allocation66_spill] sm:$0xff] %v5354_v34  ;;  %v1800_v37 = vunpack.c.0.s8 %v1768_v45  ;;  %vm349_vm12 = vnez %v341_v54 }
 0x1f4   : > { %v2145_v9 = vpop.f32.mrf.mxu2  ;;  %v1497_v14 = vadd.f32 %v1496_v47, %v1351_v24  ;;  %5356 = vst [vmem:[#allocation67_spill] sm:$0xff] %v4459_v5  ;;  %v1642_v24 = vunpack.c.3.s8 %v4361_v33  ;;  %v2047_v47 = vsel %vm387_vm0, %v3413_v25, 0  ;;  %v2287_v27 = vand.u32 4294901760, %v2286_v52  ;;  %v3414_v25 = vld [vmem:[%s5089_s1 + $0x1e8] sm:$0xff] }
 0x1f5   : > { %v4442_v28 = vadd.f32 %v2387_v29, %v2145_v9  ;;  %v5223_v33 = vand.u32 4294901760, %v4459_v5  ;;  %vm1737_vm14 = vnez %v1684_v58  ;;  %v4470_v45 = vand.u32 4294901760, %v2047_v47 }
 0x1f6   : > { %v1599_v38 = vand.u32 2147483647, %v1497_v14  ;;  %1559 = vmatmul.f32.gmra.mxu1 %v3789_v32  ;;  %vm4475_vm15 = vcmp.ne.s32.totalorder %v1800_v37, 0  ;;  %v1769_v54 = vsel %vm1737_vm14, 16843009, %v5319_v0 }
 0x1f7   : > { %5357 = vst [vmem:[#allocation68_spill] sm:$0xff] %v4470_v45  ;;  %v1801_v37 = vunpack.c.0.s8 %v1769_v54 }
 0x1f8   : > { %2454 = vmatmul.f32.gmra.mxu3 %v4388_v7  ;;  %v1354_v14 = vpop.f32.mrf.mxu0  ;;  %2280 = vmatmul.f32.gmra.mxu2 %v2279_v20  ;;  %v1863_v32 = vsel %vm4444_vm10, %v1599_v38, 0.0  ;;  %v1685_v20 = vpack.c.b16 %v1642_v24, %v1642_v24 }
 0x1f9   : > { %v1355_v29 = vadd.f32 %v1354_v14, %v3831_v13  ;;  %v1894_v9 = vadd.f32 %v1893_v51, %v1863_v32  ;;  %v4473_v13 = vsel %vm349_vm12, 16843009, %v5319_v0  ;;  %v5358_v51 = vmov 0 }
 0x1fa   : > { %v5359_v51 = vsel %vm4475_vm15, 4294967295, %v5358_v51  ;;  %v1643_v52 = vunpack.c.0.s8 %v4473_v13  ;;  %v2050_v14 = vsel %vm387_vm0, %v3414_v25, 0  ;;  %vm4505_vm4 = vcmp.ne.s32.totalorder %v1801_v37, 0 }
 0x1fb   : > { %v2391_v43 = vpop.f32.mrf.mxu3  ;;  %1417 = vmatmul.f32.gmra.mxu0 %v3799_v56  ;;  %v1500_v4 = vpop.f32.mrf.mxu1  ;;  %5360 = vst [vmem:[#allocation69_spill] sm:$0xff] %v5359_v51 }
 0x1fc   : > { %v2153_v18 = vpop.f32.mrf.mxu2  ;;  %v1501_v59 = vadd.f32 %v1500_v4, %v1355_v29 }
 0x1fd   : > { %v4468_v34 = vadd.f32 %v2391_v43, %v2153_v18  ;;  %v2294_v43 = vsub.f32 %v4459_v5, %v5223_v33  ;;  %v1686_v18 = vpack.c.b8 %v1685_v20, %v1685_v20 }
 0x1fe   : > { %v1600_v38 = vand.u32 2147483647, %v1501_v59  ;;  %1563 = vmatmul.f32.gmra.mxu1 %v3799_v56  ;;  %v4490_v59 = vsub.f32 %v2047_v47, %v4470_v45 }
 0x1ff   : > { %v2295_v33 = vand.u32 4294901760, %v2294_v43  ;;  %vm1738_vm2 = vnez %v1686_v18  ;;  %v1644_v18 = vunpack.c.1.s8 %v4473_v13 }
 0x200   : > { %2458 = vmatmul.f32.gmra.mxu3 %v4412_v8  ;;  %v1358_v58 = vpop.f32.mrf.mxu0  ;;  %2288 = vmatmul.f32.gmra.mxu2 %v2287_v27  ;;  %5361 = vst [vmem:[#allocation70_spill] sm:$0xff] %v4490_v59  ;;  %v1864_v56 = vsel %vm4475_vm15, %v1600_v38, 0.0  ;;  %v1687_v27 = vpack.c.b16 %v1643_v52, %v1643_v52  ;;  %v5227_v51 = vand.u32 4294901760, %v4490_v59  ;;  %v4500_v38 = vand.u32 4294901760, %v2050_v14 }
 0x201   : > { %v1359_v24 = vadd.f32 %v1358_v58, %v3841_v49  ;;  %v1895_v32 = vadd.f32 %v1894_v9, %v1864_v56  ;;  %v3415_v49 = vld [vmem:[%s5089_s1 + $0x1f0] sm:$0xff]  ;;  %v5362_v9 = vmov 0  ;;  %v1770_v54 = vsel %vm1738_vm2, 16843009, %v5319_v0 }
 0x202   : > { %v5363_v9 = vsel %vm4505_vm4, 4294967295, %v5362_v9  ;;  %v1688_v43 = vpack.c.b8 %v1687_v27, %v1687_v27  ;;  %v2302_v58 = vsub.f32 %v4490_v59, %v5227_v51  ;;  %v4517_v56 = vsub.f32 %v2050_v14, %v4500_v38 }
 0x203   : > { %v2395_v29 = vpop.f32.mrf.mxu3  ;;  %1421 = vmatmul.f32.gmra.mxu0 %v3809_v19  ;;  %v1504_v4 = vpop.f32.mrf.mxu1  ;;  %5364 = vst [vmem:[#allocation71_spill] sm:$0xff] %v5363_v9  ;;  %v1689_v51 = vpack.c.b16 %v1644_v18, %v1644_v18 }
 0x204   : > { %v2161_v20 = vpop.f32.mrf.mxu2  ;;  %v1505_v5 = vadd.f32 %v1504_v4, %v1359_v24  ;;  %5365 = vst [vmem:[#allocation72_spill] sm:$0xff] %v4517_v56  ;;  %vm1739_vm8 = vnez %v1688_v43  ;;  %v5233_v9 = vand.u32 4294901760, %v4517_v56 }
 0x205   : > { %v4497_v47 = vadd.f32 %v2395_v29, %v2161_v20  ;;  %v1802_v29 = vunpack.c.0.s8 %v1770_v54  ;;  %v1771_v54 = vsel %vm1739_vm8, 16843009, %v5319_v0  ;;  %v1690_v18 = vpack.c.b8 %v1689_v51, %v1689_v51  ;;  %v5371_v51 = vld [vmem:[#allocation4_spill] sm:$0xff] }
 0x206   : > { %v1601_v25 = vand.u32 2147483647, %v1505_v5  ;;  %1567 = vmatmul.f32.gmra.mxu1 %v3809_v19  ;;  %v2053_v5 = vsel %vm387_vm0, %v3415_v49, 0  ;;  %v2303_v49 = vand.u32 4294901760, %v2302_v58 }
 0x207   : > { %v4524_v27 = vand.u32 4294901760, %v2053_v5  ;;  %vm4529_vm12 = vcmp.ne.s32.totalorder %v1802_v29, 0  ;;  %vm1740_vm14 = vnez %v1690_v18 }
 0x208   : > { %2462 = vmatmul.f32.gmra.mxu3 %v4440_v10  ;;  %v1362_v52 = vpop.f32.mrf.mxu0  ;;  %2296 = vmatmul.f32.gmra.mxu2 %v2295_v33  ;;  %v1865_v19 = vsel %vm4505_vm4, %v1601_v25, 0.0  ;;  %v5367_v25 = vmov 0 }
 0x209   : > { %v1363_v24 = vadd.f32 %v1362_v52, %v3851_v22  ;;  %v1896_v37 = vadd.f32 %v1895_v32, %v1865_v19  ;;  %5366 = vst [vmem:[#allocation73_spill] sm:$0xff] %v4524_v27  ;;  %v5368_v25 = vsel %vm4529_vm12, 4294967295, %v5367_v25  ;;  %v3416_v32 = vld [vmem:[%s5089_s1 + $0x1f8] sm:$0xff]  ;;  %v4540_v43 = vsub.f32 %v2053_v5, %v4524_v27 }
 0x20a   : > { %5369 = vst [vmem:[#allocation74_spill] sm:$0xff] %v5368_v25  ;;  %v1645_v52 = vunpack.c.2.s8 %v4473_v13  ;;  %v2056_v29 = vsel %vm387_vm0, %v3416_v32, 0  ;;  %v1772_v32 = vsel %vm1740_vm14, 16843009, %v5319_v0 }
 0x20b   : > { %v2399_v4 = vpop.f32.mrf.mxu3  ;;  %1425 = vmatmul.f32.gmra.mxu0 %v3819_v44  ;;  %v1508_v33 = vpop.f32.mrf.mxu1  ;;  %5370 = vst [vmem:[#allocation75_spill] sm:$0xff] %v4540_v43  ;;  %v4554_v25 = vand.u32 4294901760, %v2056_v29 }
 0x20c   : > { %v2169_v20 = vpop.f32.mrf.mxu2  ;;  %v1509_v14 = vadd.f32 %v1508_v33, %v1363_v24  ;;  %v1803_v33 = vunpack.c.0.s8 %v1771_v54  ;;  %v342_v54 = vld [vmem:[%s4154_s12 + $0x20] sm:$0xff] }
 0x20d   : > { %v4526_v59 = vadd.f32 %v2399_v4, %v2169_v20  ;;  %vm350_vm0 = vnez %v342_v54 }
 0x20e   : > { %v1602_v22 = vand.u32 2147483647, %v1509_v14  ;;  %1571 = vmatmul.f32.gmra.mxu1 %v3819_v44  ;;  %v2310_v44 = vsub.f32 %v4517_v56, %v5233_v9  ;;  %vm4556_vm2 = vcmp.ne.s32.totalorder %v1803_v33, 0 }
 0x210   : > { %2466 = vmatmul.f32.gmra.mxu3 %v4470_v45  ;;  %v1366_v58 = vpop.f32.mrf.mxu0  ;;  %2304 = vmatmul.f32.gmra.mxu2 %v2303_v49  ;;  %v1866_v19 = vsel %vm4529_vm12, %v1602_v22, 0.0  ;;  %v5237_v49 = vand.u32 4294901760, %v4540_v43  ;;  %v1691_v45 = vpack.c.b16 %v1645_v52, %v1645_v52  ;;  %v2311_v22 = vand.u32 4294901760, %v2310_v44 }
 0x211   : > { %v1367_v24 = vadd.f32 %v1366_v58, %v3864_v1  ;;  %v1897_v4 = vadd.f32 %v1896_v37, %v1866_v19  ;;  %v5372_v1 = vmov 0  ;;  %v1646_v58 = vunpack.c.3.s8 %v4473_v13 }
 0x212   : > { %v5373_v1 = vsel %vm4556_vm2, 4294967295, %v5372_v1  ;;  %v2318_v18 = vsub.f32 %v4540_v43, %v5237_v49  ;;  %v1692_v52 = vpack.c.b8 %v1691_v45, %v1691_v45  ;;  %v4569_v19 = vsub.f32 %v2056_v29, %v4554_v25 }
 0x213   : > { %v2403_v5 = vpop.f32.mrf.mxu3  ;;  %1429 = vmatmul.f32.gmra.mxu0 %v5371_v51  ;;  %v1512_v20 = vpop.f32.mrf.mxu1  ;;  %v1693_v13 = vpack.c.b16 %v1646_v58, %v1646_v58 }
 0x214   : > { %v2177_v14 = vpop.f32.mrf.mxu2  ;;  %v1513_v9 = vadd.f32 %v1512_v20, %v1367_v24  ;;  %v5374_v20 = vld [vmem:[#allocation5_spill] sm:$0xff]  ;;  %v2319_v49 = vand.u32 4294901760, %v2318_v18  ;;  %vm1741_vm8 = vnez %v1692_v52  ;;  %v5242_v29 = vand.u32 4294901760, %v4569_v19 }
 0x215   : > { %v4552_v56 = vadd.f32 %v2403_v5, %v2177_v14  ;;  %v1804_v5 = vunpack.c.0.s8 %v1772_v32  ;;  %v1773_v32 = vsel %vm1741_vm8, 16843009, %v5319_v0  ;;  %v1694_v54 = vpack.c.b8 %v1693_v13, %v1693_v13 }
 0x216   : > { %v1603_v37 = vand.u32 2147483647, %v1513_v9  ;;  %1575 = vmatmul.f32.gmra.mxu1 %v5371_v51  ;;  %v2326_v58 = vsub.f32 %v4569_v19, %v5242_v29  ;;  %v5378_v29 = vmov 0 }
 0x217   : > { %vm4581_vm14 = vcmp.ne.s32.totalorder %v1804_v5, 0  ;;  %v1805_v5 = vunpack.c.0.s8 %v1773_v32 }
 0x218   : > { %2470 = vmatmul.f32.gmra.mxu3 %v4500_v38  ;;  %v1370_v44 = vpop.f32.mrf.mxu0  ;;  %2312 = vmatmul.f32.gmra.mxu2 %v2311_v22  ;;  %v1867_v9 = vsel %vm4556_vm2, %v1603_v37, 0.0  ;;  %v4579_v37 = vsel %vm350_vm0, 16843009, %v5319_v0  ;;  %vm1742_vm0 = vnez %v1694_v54 }
 0x219   : > { %v1371_v24 = vadd.f32 %v1370_v44, %v3874_v55  ;;  %v1898_v33 = vadd.f32 %v1897_v4, %v1867_v9  ;;  %v5375_v55 = vmov 0  ;;  %v1647_v18 = vunpack.c.0.s8 %v4579_v37 }
 0x21a   : > { %v5376_v55 = vsel %vm4581_vm14, 4294967295, %v5375_v55  ;;  %vm4598_vm8 = vcmp.ne.s32.totalorder %v1805_v5, 0  ;;  %v1648_v32 = vunpack.c.1.s8 %v4579_v37 }
 0x21b   : > { %v2407_v51 = vpop.f32.mrf.mxu3  ;;  %1433 = vmatmul.f32.gmra.mxu0 %v5374_v20  ;;  %v1516_v14 = vpop.f32.mrf.mxu1  ;;  %v1695_v13 = vpack.c.b16 %v1647_v18, %v1647_v18  ;;  %v5379_v29 = vsel %vm4598_vm8, 4294967295, %v5378_v29 }
 0x21c   : > { %v2185_v45 = vpop.f32.mrf.mxu2  ;;  %v1517_v22 = vadd.f32 %v1516_v14, %v1371_v24 }
 0x21d   : > { %v4575_v43 = vadd.f32 %v2407_v51, %v2185_v45 }
 0x21e   : > { %v1604_v4 = vand.u32 2147483647, %v1517_v22  ;;  %1579 = vmatmul.f32.gmra.mxu1 %v5374_v20  ;;  %v5377_v20 = vld [vmem:[#allocation6_spill] sm:$0xff] }
 0x220   : > { %2474 = vmatmul.f32.gmra.mxu3 %v4524_v27  ;;  %v1374_v52 = vpop.f32.mrf.mxu0  ;;  %2320 = vmatmul.f32.gmra.mxu2 %v2319_v49  ;;  %v1868_v44 = vsel %vm4581_vm14, %v1604_v4, 0.0  ;;  %v2327_v27 = vand.u32 4294901760, %v2326_v58 }
 0x221   : > { %v1375_v9 = vadd.f32 %v1374_v52, %v3887_v3  ;;  %v1899_v24 = vadd.f32 %v1898_v33, %v1868_v44  ;;  %v1774_v3 = vsel %vm1742_vm0, 16843009, %v5319_v0  ;;  %v1696_v33 = vpack.c.b8 %v1695_v13, %v1695_v13 }
 0x222   : > { %v1806_v44 = vunpack.c.0.s8 %v1774_v3  ;;  %v5380_v13 = vmov 0 }
 0x223   : > { %v2411_v51 = vpop.f32.mrf.mxu3  ;;  %1437 = vmatmul.f32.gmra.mxu0 %v5377_v20  ;;  %v1520_v14 = vpop.f32.mrf.mxu1  ;;  %vm1743_vm0 = vnez %v1696_v33 }
 0x224   : > { %v2193_v45 = vpop.f32.mrf.mxu2  ;;  %v1521_v22 = vadd.f32 %v1520_v14, %v1375_v9  ;;  %vm4612_vm14 = vcmp.ne.s32.totalorder %v1806_v44, 0 }
 0x225   : > { %v4596_v49 = vadd.f32 %v2411_v51, %v2193_v45  ;;  %v5381_v13 = vsel %vm4612_vm14, 4294967295, %v5380_v13 }
 0x226   : > { %v1605_v4 = vand.u32 2147483647, %v1521_v22  ;;  %1583 = vmatmul.f32.gmra.mxu1 %v5377_v20  ;;  %v1697_v20 = vpack.c.b16 %v1648_v32, %v1648_v32  ;;  %v1649_v22 = vunpack.c.2.s8 %v4579_v37 }
 0x228   : > { %2478 = vmatmul.f32.gmra.mxu3 %v4554_v25  ;;  %v1378_v54 = vpop.f32.mrf.mxu0  ;;  %2328 = vmatmul.f32.gmra.mxu2 %v2327_v27  ;;  %v1869_v18 = vsel %vm4598_vm8, %v1605_v4, 0.0 }
 0x229   : > { %v1379_v52 = vadd.f32 %v1378_v54, %v3904_v60  ;;  %v1900_v58 = vadd.f32 %v1899_v24, %v1869_v18  ;;  %v1775_v60 = vsel %vm1743_vm0, 16843009, %v5319_v0  ;;  %v1698_v24 = vpack.c.b8 %v1697_v20, %v1697_v20 }
 0x22a   : > { %v1807_v54 = vunpack.c.0.s8 %v1775_v60 }
 0x22b   : > { %v2415_v9 = vpop.f32.mrf.mxu3  ;;  %1441 = vmatmul.f32.gmra.mxu0 %v3862_v61  ;;  %v1524_v5 = vpop.f32.mrf.mxu1  ;;  %vm1744_vm0 = vnez %v1698_v24  ;;  %v1650_v24 = vunpack.c.3.s8 %v4579_v37 }
 0x22c   : > { %v2201_v51 = vpop.f32.mrf.mxu2  ;;  %v1525_v14 = vadd.f32 %v1524_v5, %v1379_v52  ;;  %v5382_v52 = vld [vmem:[#allocation7_spill] sm:$0xff]  ;;  %vm4627_vm8 = vcmp.ne.s32.totalorder %v1807_v54, 0 }
 0x22d   : > { %v4610_v45 = vadd.f32 %v2415_v9, %v2201_v51  ;;  %v1699_v9 = vpack.c.b16 %v1649_v22, %v1649_v22 }
 0x22e   : > { %v1606_v27 = vand.u32 2147483647, %v1525_v14  ;;  %1587 = vmatmul.f32.gmra.mxu1 %v3862_v61  ;;  %v5386_v14 = vand.u32 4294901760, %v5382_v52 }
 0x22f   : > { %v1700_v60 = vpack.c.b8 %v1699_v9, %v1699_v9  ;;  %v1701_v9 = vpack.c.b16 %v1650_v24, %v1650_v24 }
 0x230   : > { %3037 = vmatmul.f32.vlgmr.msra.gmra.mxu3 %v3868_v53  ;;  %v1382_v4 = vpop.f32.mrf.mxu0  ;;  %2891 = vmatmul.f32.vlgmr.msra.gmra.mxu2 %v3868_v53  ;;  %v1870_v3 = vsel %vm4612_vm14, %v1606_v27, 0.0  ;;  %v5383_v53 = vmov 0  ;;  %v5387_v27 = vld [vmem:[#allocation8_spill] sm:$0xff] }
 0x231   : > { %v1383_v33 = vadd.f32 %v1382_v4, %v3922_v36  ;;  %v1901_v32 = vadd.f32 %v1900_v58, %v1870_v3  ;;  %v5384_v53 = vsel %vm4627_vm8, 4294967295, %v5383_v53  ;;  %v1776_v36 = vsel %vm1744_vm0, 16843009, %v5319_v0  ;;  %v343_v58 = vld [vmem:[%s4154_s12 + $0x28] sm:$0xff] }
 0x232   : > { %5385 = vst [vmem:[#allocation4_spill] sm:$0xff] %v5384_v53  ;;  %v1808_v54 = vunpack.c.0.s8 %v1776_v36  ;;  %vm351_vm14 = vnez %v343_v58  ;;  %vm1745_vm0 = vnez %v1700_v60  ;;  %v5393_v58 = vld [vmem:[#allocation10_spill] sm:$0xff]  ;;  %v5395_v53 = vmov 0 }
 0x233   : > { %v2419_v18 = vpop.f32.mrf.mxu3  ;;  %v1528_v61 = vpop.f32.mrf.mxu1  ;;  %2502 = vmatmul.f32.vlgmr.msra.gmra.mxu0 %v5382_v52  ;;  %v5388_v52 = vld [vmem:[#allocation9_spill] sm:$0xff]  ;;  %v1777_v36 = vsel %vm1745_vm0, 16843009, %v5319_v0 }
 0x234   : > { %v2209_v44 = vpop.f32.mrf.mxu2  ;;  %v1529_v5 = vadd.f32 %v1528_v61, %v1383_v33  ;;  %vm4647_vm2 = vcmp.ne.s32.totalorder %v1808_v54, 0  ;;  %v1809_v54 = vunpack.c.0.s8 %v1777_v36 }
 0x235   : > { %v4625_v51 = vadd.f32 %v2419_v18, %v2209_v44 }
 0x236   : > { %v1607_v20 = vand.u32 2147483647, %v1529_v5  ;;  %2681 = vmatmul.f32.vlgmr.msra.gmra.mxu1 %v5386_v14  ;;  %v4645_v14 = vsel %vm351_vm14, 16843009, %v5319_v0  ;;  %vm4663_vm0 = vcmp.ne.s32.totalorder %v1809_v54, 0 }
 0x237   : > { %v1651_v60 = vunpack.c.0.s8 %v4645_v14  ;;  %v5396_v53 = vsel %vm4663_vm0, 4294967295, %v5395_v53 }
 0x238   : > { %3041 = vmatmul.f32.gmra.mxu3 %v5387_v27  ;;  %v1386_v22 = vpop.f32.mrf.mxu0  ;;  %2895 = vmatmul.f32.gmra.mxu2 %v5387_v27  ;;  %v1871_v4 = vsel %vm4627_vm8, %v1607_v20, 0.0  ;;  %v5389_v20 = vmov 0  ;;  %v1702_v27 = vpack.c.b8 %v1701_v9, %v1701_v9 }
 0x239   : > { %v1387_v3 = vadd.f32 %v1386_v22, %v3940_v42  ;;  %v1902_v33 = vadd.f32 %v1901_v32, %v1871_v4  ;;  %v5390_v20 = vsel %vm4647_vm2, 4294967295, %v5389_v20  ;;  %v5392_v32 = vand.u32 4294901760, %v5388_v52 }
 0x23a   : > { %5391 = vst [vmem:[#allocation5_spill] sm:$0xff] %v5390_v20  ;;  %vm1746_vm14 = vnez %v1702_v27  ;;  %v5400_v20 = vmov 0 }
 0x23b   : > { %v2423_v18 = vpop.f32.mrf.mxu3  ;;  %v1532_v61 = vpop.f32.mrf.mxu1  ;;  %2507 = vmatmul.f32.gmra.mxu0 %v5388_v52  ;;  %v5394_v52 = vld [vmem:[#allocation11_spill] sm:$0xff] }
 0x23c   : > { %v2217_v44 = vpop.f32.mrf.mxu2  ;;  %v1533_v5 = vadd.f32 %v1532_v61, %v1387_v3 }
 0x23d   : > { %v4642_v37 = vadd.f32 %v2423_v18, %v2217_v44 }
 0x23e   : > { %v1608_v42 = vand.u32 2147483647, %v1533_v5  ;;  %2687 = vmatmul.f32.gmra.mxu1 %v5392_v32  ;;  %v1703_v5 = vpack.c.b16 %v1651_v60, %v1651_v60 }
 0x240   : > { %3045 = vmatmul.f32.gmra.mxu3 %v5393_v58  ;;  %v1390_v24 = vpop.f32.mrf.mxu0  ;;  %2899 = vmatmul.f32.gmra.mxu2 %v5393_v58  ;;  %v1872_v22 = vsel %vm4647_vm2, %v1608_v42, 0.0  ;;  %v5397_v42 = vand.u32 4294901760, %v5394_v52  ;;  %v1704_v36 = vpack.c.b8 %v1703_v5, %v1703_v5 }
 0x241   : > { %v1391_v4 = vadd.f32 %v1390_v24, %v3958_v21  ;;  %v1903_v3 = vadd.f32 %v1902_v33, %v1872_v22  ;;  %v1778_v21 = vsel %vm1746_vm14, 16843009, %v5319_v0  ;;  %v5398_v33 = vld [vmem:[#allocation12_spill] sm:$0xff]  ;;  %v1652_v24 = vunpack.c.1.s8 %v4645_v14 }
 0x242   : > { %v1810_v54 = vunpack.c.0.s8 %v1778_v21  ;;  %vm1747_vm14 = vnez %v1704_v36 }
 0x243   : > { %v2427_v18 = vpop.f32.mrf.mxu3  ;;  %v1536_v61 = vpop.f32.mrf.mxu1  ;;  %2512 = vmatmul.f32.gmra.mxu0 %v5394_v52  ;;  %v5399_v52 = vld [vmem:[#allocation13_spill] sm:$0xff] }
 0x244   : > { %v2225_v44 = vpop.f32.mrf.mxu2  ;;  %v1537_v9 = vadd.f32 %v1536_v61, %v1391_v4  ;;  %vm4679_vm2 = vcmp.ne.s32.totalorder %v1810_v54, 0 }
 0x245   : > { %v4661_v32 = vadd.f32 %v2427_v18, %v2225_v44  ;;  %v5401_v20 = vsel %vm4679_vm2, 4294967295, %v5400_v20 }
 0x246   : > { %v1609_v58 = vand.u32 2147483647, %v1537_v9  ;;  %2693 = vmatmul.f32.gmra.mxu1 %v5397_v42  ;;  %v1705_v9 = vpack.c.b16 %v1652_v24, %v1652_v24  ;;  %5402 = vst [vmem:[#allocation6_spill] sm:$0xff] %v5401_v20 }
 0x248   : > { %3049 = vmatmul.f32.gmra.mxu3 %v5398_v33  ;;  %v1394_v27 = vpop.f32.mrf.mxu0  ;;  %2903 = vmatmul.f32.gmra.mxu2 %v5398_v33  ;;  %v1873_v60 = vsel %vm4663_vm0, %v1609_v58, 0.0  ;;  %v5403_v58 = vand.u32 4294901760, %v5399_v52  ;;  %v1706_v21 = vpack.c.b8 %v1705_v9, %v1705_v9 }
 0x249   : > { %v1395_v22 = vadd.f32 %v1394_v27, %v3976_v12  ;;  %v1904_v4 = vadd.f32 %v1903_v3, %v1873_v60  ;;  %v1779_v12 = vsel %vm1747_vm14, 16843009, %v5319_v0  ;;  %v5404_v3 = vld [vmem:[#allocation14_spill] sm:$0xff]  ;;  %v1653_v27 = vunpack.c.2.s8 %v4645_v14 }
 0x24a   : > { %v1811_v54 = vunpack.c.0.s8 %v1779_v12  ;;  %vm1748_vm14 = vnez %v1706_v21  ;;  %v5410_v12 = vld [vmem:[#allocation16_spill] sm:$0xff]  ;;  %v1654_v21 = vunpack.c.3.s8 %v4645_v14 }
 0x24b   : > { %v2431_v18 = vpop.f32.mrf.mxu3  ;;  %v1540_v61 = vpop.f32.mrf.mxu1  ;;  %2517 = vmatmul.f32.gmra.mxu0 %v5399_v52  ;;  %v5405_v52 = vld [vmem:[#allocation15_spill] sm:$0xff]  ;;  %v1707_v9 = vpack.c.b16 %v1653_v27, %v1653_v27 }
 0x24c   : > { %v2233_v44 = vpop.f32.mrf.mxu2  ;;  %v1541_v5 = vadd.f32 %v1540_v61, %v1395_v22  ;;  %vm4695_vm0 = vcmp.ne.s32.totalorder %v1811_v54, 0  ;;  %v5409_v20 = vand.u32 4294901760, %v5405_v52 }
 0x24d   : > { %v4677_v42 = vadd.f32 %v2431_v18, %v2233_v44 }
 0x24e   : > { %v1610_v33 = vand.u32 2147483647, %v1541_v5  ;;  %2699 = vmatmul.f32.gmra.mxu1 %v5403_v58 }
 0x250   : > { %3053 = vmatmul.f32.gmra.mxu3 %v5404_v3  ;;  %v1398_v36 = vpop.f32.mrf.mxu0  ;;  %2907 = vmatmul.f32.gmra.mxu2 %v5404_v3  ;;  %v1874_v24 = vsel %vm4679_vm2, %v1610_v33, 0.0  ;;  %v5406_v3 = vmov 0 }
 0x251   : > { %v1399_v60 = vadd.f32 %v1398_v36, %v3994_v2  ;;  %v1905_v22 = vadd.f32 %v1904_v4, %v1874_v24  ;;  %v5407_v3 = vsel %vm4695_vm0, 4294967295, %v5406_v3  ;;  %v1780_v2 = vsel %vm1748_vm14, 16843009, %v5319_v0  ;;  %v344_v4 = vld [vmem:[%s4154_s12 + $0x30] sm:$0xff] }
 0x252   : > { %5408 = vst [vmem:[#allocation7_spill] sm:$0xff] %v5407_v3  ;;  %v1708_v36 = vpack.c.b8 %v1707_v9, %v1707_v9  ;;  %vm352_vm2 = vnez %v344_v4  ;;  %v1709_v9 = vpack.c.b16 %v1654_v21, %v1654_v21  ;;  %v5417_v4 = vld [vmem:[#allocation18_spill] sm:$0xff] }
 0x253   : > { %v2435_v18 = vpop.f32.mrf.mxu3  ;;  %v1544_v61 = vpop.f32.mrf.mxu1  ;;  %2522 = vmatmul.f32.gmra.mxu0 %v5405_v52  ;;  %v5411_v52 = vld [vmem:[#allocation17_spill] sm:$0xff] }
 0x254   : > { %v2241_v44 = vpop.f32.mrf.mxu2  ;;  %v1545_v5 = vadd.f32 %v1544_v61, %v1399_v60  ;;  %vm1749_vm14 = vnez %v1708_v36  ;;  %v1710_v36 = vpack.c.b8 %v1709_v9, %v1709_v9 }
 0x255   : > { %v4693_v58 = vadd.f32 %v2435_v18, %v2241_v44  ;;  %v1812_v18 = vunpack.c.0.s8 %v1780_v2  ;;  %v1781_v2 = vsel %vm1749_vm14, 16843009, %v5319_v0 }
 0x256   : > { %v1611_v33 = vand.u32 2147483647, %v1545_v5  ;;  %2705 = vmatmul.f32.gmra.mxu1 %v5409_v20 }
 0x257   : > { %vm4715_vm8 = vcmp.ne.s32.totalorder %v1812_v18, 0 }
 0x258   : > { %3057 = vmatmul.f32.gmra.mxu3 %v5410_v12  ;;  %v1402_v27 = vpop.f32.mrf.mxu0  ;;  %2911 = vmatmul.f32.gmra.mxu2 %v5410_v12  ;;  %v1875_v24 = vsel %vm4695_vm0, %v1611_v33, 0.0  ;;  %v4713_v12 = vsel %vm352_vm2, 16843009, %v5319_v0  ;;  %v5413_v33 = vmov 0  ;;  %vm1750_vm2 = vnez %v1710_v36 }
 0x259   : > { %v1403_v60 = vadd.f32 %v1402_v27, %v4012_v63  ;;  %v1906_v54 = vadd.f32 %v1905_v22, %v1875_v24  ;;  %v5414_v33 = vsel %vm4715_vm8, 4294967295, %v5413_v33  ;;  %v5416_v22 = vand.u32 4294901760, %v5411_v52 }
 0x25a   : > { %5415 = vst [vmem:[#allocation9_spill] sm:$0xff] %v5414_v33  ;;  %v1655_v21 = vunpack.c.0.s8 %v4713_v12  ;;  %v5424_v33 = vmov 0 }
 0x25b   : > { %v2439_v20 = vpop.f32.mrf.mxu3  ;;  %v1548_v61 = vpop.f32.mrf.mxu1  ;;  %2527 = vmatmul.f32.gmra.mxu0 %v5411_v52 }
 0x25c   : > { %v2249_v44 = vpop.f32.mrf.mxu2  ;;  %v1549_v5 = vadd.f32 %v1548_v61, %v1403_v60 }
 0x25d   : > { %v4710_v14 = vadd.f32 %v2439_v20, %v2249_v44  ;;  %v1813_v20 = vunpack.c.0.s8 %v1781_v2  ;;  %v5418_v44 = vld [vmem:[#allocation19_spill] sm:$0xff] }
 0x25e   : > { %v1612_v63 = vand.u32 2147483647, %v1549_v5  ;;  %2711 = vmatmul.f32.gmra.mxu1 %v5416_v22  ;;  %v1711_v22 = vpack.c.b16 %v1655_v21, %v1655_v21 }
 0x25f   : > { %5412 = vst [vmem:[#allocation8_spill] sm:$0xff] %v4710_v14  ;;  %vm4731_vm14 = vcmp.ne.s32.totalorder %v1813_v20, 0  ;;  %v5419_v14 = vmov 0 }
 0x260   : > { %3061 = vmatmul.f32.gmra.mxu3 %v5417_v4  ;;  %v1406_v27 = vpop.f32.mrf.mxu0  ;;  %2915 = vmatmul.f32.gmra.mxu2 %v5417_v4  ;;  %v1876_v24 = vsel %vm4715_vm8, %v1612_v63, 0.0  ;;  %v5420_v14 = vsel %vm4731_vm14, 4294967295, %v5419_v14  ;;  %v5421_v63 = vand.u32 4294901760, %v5418_v44  ;;  %v1712_v2 = vpack.c.b8 %v1711_v22, %v1711_v22 }
 0x261   : > { %v1407_v60 = vadd.f32 %v1406_v27, %v4030_v11  ;;  %v1907_v18 = vadd.f32 %v1906_v54, %v1876_v24  ;;  %v1782_v11 = vsel %vm1750_vm2, 16843009, %v5319_v0  ;;  %v5422_v54 = vld [vmem:[#allocation20_spill] sm:$0xff]  ;;  %v1656_v27 = vunpack.c.1.s8 %v4713_v12 }
 0x262   : > { %v1814_v20 = vunpack.c.0.s8 %v1782_v11  ;;  %vm1751_vm2 = vnez %v1712_v2 }
 0x263   : > { %v2443_v61 = vpop.f32.mrf.mxu3  ;;  %v1552_v52 = vpop.f32.mrf.mxu1  ;;  %2532 = vmatmul.f32.gmra.mxu0 %v5418_v44  ;;  %v5423_v44 = vld [vmem:[#allocation21_spill] sm:$0xff] }
 0x264   : > { %v2257_v5 = vpop.f32.mrf.mxu2  ;;  %v1553_v9 = vadd.f32 %v1552_v52, %v1407_v60  ;;  %vm4747_vm8 = vcmp.ne.s32.totalorder %v1814_v20, 0 }
 0x265   : > { %v4729_v3 = vadd.f32 %v2443_v61, %v2257_v5  ;;  %v5425_v33 = vsel %vm4747_vm8, 4294967295, %v5424_v33 }
 0x266   : > { %v1613_v4 = vand.u32 2147483647, %v1553_v9  ;;  %2717 = vmatmul.f32.gmra.mxu1 %v5421_v63  ;;  %v1713_v9 = vpack.c.b16 %v1656_v27, %v1656_v27  ;;  %5426 = vst [vmem:[#allocation10_spill] sm:$0xff] %v5425_v33 }
 0x268   : > { %3065 = vmatmul.f32.gmra.mxu3 %v5422_v54  ;;  %v1410_v36 = vpop.f32.mrf.mxu0  ;;  %2919 = vmatmul.f32.gmra.mxu2 %v5422_v54  ;;  %v1877_v21 = vsel %vm4731_vm14, %v1613_v4, 0.0  ;;  %v5427_v4 = vand.u32 4294901760, %v5423_v44  ;;  %v1714_v11 = vpack.c.b8 %v1713_v9, %v1713_v9 }
 0x269   : > { %v1411_v24 = vadd.f32 %v1410_v36, %v4048_v41  ;;  %v1908_v60 = vadd.f32 %v1907_v18, %v1877_v21  ;;  %v1783_v41 = vsel %vm1751_vm2, 16843009, %v5319_v0  ;;  %v5428_v18 = vld [vmem:[#allocation22_spill] sm:$0xff]  ;;  %v1657_v36 = vunpack.c.2.s8 %v4713_v12 }
 0x26a   : > { %v1815_v20 = vunpack.c.0.s8 %v1783_v41  ;;  %vm1752_vm2 = vnez %v1714_v11  ;;  %v5434_v41 = vld [vmem:[#allocation24_spill] sm:$0xff]  ;;  %v1658_v11 = vunpack.c.3.s8 %v4713_v12 }
 0x26b   : > { %v2447_v61 = vpop.f32.mrf.mxu3  ;;  %v1556_v52 = vpop.f32.mrf.mxu1  ;;  %2537 = vmatmul.f32.gmra.mxu0 %v5423_v44  ;;  %v5429_v44 = vld [vmem:[#allocation23_spill] sm:$0xff]  ;;  %v1715_v9 = vpack.c.b16 %v1657_v36, %v1657_v36 }
 0x26c   : > { %v2265_v5 = vpop.f32.mrf.mxu2  ;;  %v1557_v22 = vadd.f32 %v1556_v52, %v1411_v24  ;;  %vm4763_vm14 = vcmp.ne.s32.totalorder %v1815_v20, 0  ;;  %v5433_v33 = vand.u32 4294901760, %v5429_v44 }
 0x26d   : > { %v4745_v63 = vadd.f32 %v2447_v61, %v2265_v5 }
 0x26e   : > { %v1614_v54 = vand.u32 2147483647, %v1557_v22  ;;  %2723 = vmatmul.f32.gmra.mxu1 %v5427_v4 }
 0x270   : > { %3069 = vmatmul.f32.gmra.mxu3 %v5428_v18  ;;  %v1414_v2 = vpop.f32.mrf.mxu0  ;;  %2923 = vmatmul.f32.gmra.mxu2 %v5428_v18  ;;  %v1878_v27 = vsel %vm4747_vm8, %v1614_v54, 0.0  ;;  %v5430_v18 = vmov 0 }
 0x271   : > { %v1415_v21 = vadd.f32 %v1414_v2, %v4066_v40  ;;  %v1909_v24 = vadd.f32 %v1908_v60, %v1878_v27  ;;  %v5431_v18 = vsel %vm4763_vm14, 4294967295, %v5430_v18  ;;  %v1784_v40 = vsel %vm1752_vm2, 16843009, %v5319_v0  ;;  %v345_v60 = vld [vmem:[%s4154_s12 + $0x38] sm:$0xff]  ;;  %s3384_s12 = sshll.u32 %s5576_s14, 1 }
 0x272   : > { %5432 = vst [vmem:[#allocation11_spill] sm:$0xff] %v5431_v18  ;;  %v1716_v2 = vpack.c.b8 %v1715_v9, %v1715_v9  ;;  %vm353_vm8 = vnez %v345_v60  ;;  %v1717_v9 = vpack.c.b16 %v1658_v11, %v1658_v11  ;;  %v5441_v60 = vld [vmem:[#allocation26_spill] sm:$0xff]  ;;  %s4836_s7 = scalar_lea.vmem %s5091_s3, %s3384_s12 }
 0x273   : > { %v2451_v61 = vpop.f32.mrf.mxu3  ;;  %v1560_v52 = vpop.f32.mrf.mxu1  ;;  %2542 = vmatmul.f32.gmra.mxu0 %v5429_v44  ;;  %v5435_v44 = vld [vmem:[#allocation25_spill] sm:$0xff] }
 0x274   : > { %v2273_v5 = vpop.f32.mrf.mxu2  ;;  %v1561_v22 = vadd.f32 %v1560_v52, %v1415_v21  ;;  %vm1753_vm2 = vnez %v1716_v2  ;;  %v1718_v2 = vpack.c.b8 %v1717_v9, %v1717_v9 }
 0x275   : > { %v4761_v4 = vadd.f32 %v2451_v61, %v2273_v5  ;;  %v1816_v61 = vunpack.c.0.s8 %v1784_v40  ;;  %v1785_v40 = vsel %vm1753_vm2, 16843009, %v5319_v0 }
 0x276   : > { %v1615_v54 = vand.u32 2147483647, %v1561_v22  ;;  %2729 = vmatmul.f32.gmra.mxu1 %v5433_v33 }
 0x277   : > { %vm4783_vm0 = vcmp.ne.s32.totalorder %v1816_v61, 0 }
 0x278   : > { %3073 = vmatmul.f32.gmra.mxu3 %v5434_v41  ;;  %v1418_v36 = vpop.f32.mrf.mxu0  ;;  %2927 = vmatmul.f32.gmra.mxu2 %v5434_v41  ;;  %v1879_v27 = vsel %vm4763_vm14, %v1615_v54, 0.0  ;;  %v4781_v41 = vsel %vm353_vm8, 16843009, %v5319_v0  ;;  %v5437_v54 = vmov 0  ;;  %vm1754_vm8 = vnez %v1718_v2 }
 0x279   : > { %v1419_v21 = vadd.f32 %v1418_v36, %v4084_v35  ;;  %v1910_v20 = vadd.f32 %v1909_v24, %v1879_v27  ;;  %v5438_v54 = vsel %vm4783_vm0, 4294967295, %v5437_v54  ;;  %v5440_v24 = vand.u32 4294901760, %v5435_v44 }
 0x27a   : > { %5439 = vst [vmem:[#allocation13_spill] sm:$0xff] %v5438_v54  ;;  %v1659_v11 = vunpack.c.0.s8 %v4781_v41  ;;  %v1660_v2 = vunpack.c.1.s8 %v4781_v41 }
 0x27b   : > { %v2455_v33 = vpop.f32.mrf.mxu3  ;;  %v1564_v52 = vpop.f32.mrf.mxu1  ;;  %2547 = vmatmul.f32.gmra.mxu0 %v5435_v44 }
 0x27c   : > { %v2281_v5 = vpop.f32.mrf.mxu2  ;;  %v1565_v22 = vadd.f32 %v1564_v52, %v1419_v21  ;;  %v5442_v21 = vld [vmem:[#allocation33_spill] sm:$0xff]  ;;  %v1817_v52 = vunpack.c.0.s8 %v1785_v40  ;;  %v1719_v18 = vpack.c.b16 %v1659_v11, %v1659_v11  ;;  %v5449_v40 = vld [vmem:[#allocation28_spill] sm:$0xff] }
 0x27d   : > { %v4778_v12 = vadd.f32 %v2455_v33, %v2281_v5 }
 0x27e   : > { %v1616_v35 = vand.u32 2147483647, %v1565_v22  ;;  %2735 = vmatmul.f32.gmra.mxu1 %v5440_v24  ;;  %v5443_v22 = vld [vmem:[#allocation27_spill] sm:$0xff]  ;;  %vm4799_vm2 = vcmp.ne.s32.totalorder %v1817_v52, 0 }
 0x27f   : > { %5436 = vst [vmem:[#allocation12_spill] sm:$0xff] %v4778_v12 }
 0x280   : > { %3077 = vmatmul.f32.gmra.mxu3 %v5441_v60  ;;  %v1422_v36 = vpop.f32.mrf.mxu0  ;;  %2931 = vmatmul.f32.gmra.mxu2 %v5441_v60  ;;  %v1880_v27 = vsel %vm4783_vm0, %v1616_v35, 0.0  ;;  %v5445_v60 = vmov 0 }
 0x281   : > { %v1423_v61 = vadd.f32 %v1422_v36, %v5442_v21  ;;  %v1911_v33 = vadd.f32 %v1910_v20, %v1880_v27  ;;  %v5446_v60 = vsel %vm4799_vm2, 4294967295, %v5445_v60  ;;  %v5448_v36 = vand.u32 4294901760, %v5443_v22 }
 0x282   : > { %5447 = vst [vmem:[#allocation15_spill] sm:$0xff] %v5446_v60  ;;  %v1786_v20 = vsel %vm1754_vm8, 16843009, %v5319_v0  ;;  %v1720_v27 = vpack.c.b8 %v1719_v18, %v1719_v18  ;;  %v1721_v18 = vpack.c.b16 %v1660_v2, %v1660_v2 }
 0x283   : > { %v2459_v5 = vpop.f32.mrf.mxu3  ;;  %v1568_v44 = vpop.f32.mrf.mxu1  ;;  %2552 = vmatmul.f32.gmra.mxu0 %v5443_v22 }
 0x284   : > { %v2289_v24 = vpop.f32.mrf.mxu2  ;;  %v1569_v9 = vadd.f32 %v1568_v44, %v1423_v61  ;;  %v5450_v61 = vld [vmem:[#allocation36_spill] sm:$0xff]  ;;  %v1818_v44 = vunpack.c.0.s8 %v1786_v20  ;;  %vm1755_vm8 = vnez %v1720_v27  ;;  %v1661_v27 = vunpack.c.2.s8 %v4781_v41 }
 0x285   : > { %v4797_v12 = vadd.f32 %v2459_v5, %v2289_v24  ;;  %v1787_v20 = vsel %vm1755_vm8, 16843009, %v5319_v0 }
 0x286   : > { %v1617_v35 = vand.u32 2147483647, %v1569_v9  ;;  %2741 = vmatmul.f32.gmra.mxu1 %v5448_v36  ;;  %v5451_v9 = vld [vmem:[#allocation29_spill] sm:$0xff]  ;;  %vm4816_vm0 = vcmp.ne.s32.totalorder %v1818_v44, 0 }
 0x287   : > { %5444 = vst [vmem:[#allocation14_spill] sm:$0xff] %v4797_v12 }
 0x288   : > { %3081 = vmatmul.f32.gmra.mxu3 %v5449_v40  ;;  %v1426_v11 = vpop.f32.mrf.mxu0  ;;  %2935 = vmatmul.f32.gmra.mxu2 %v5449_v40  ;;  %v1881_v21 = vsel %vm4799_vm2, %v1617_v35, 0.0  ;;  %v5453_v40 = vmov 0 }
 0x289   : > { %v1427_v52 = vadd.f32 %v1426_v11, %v5450_v61  ;;  %v1912_v5 = vadd.f32 %v1911_v33, %v1881_v21  ;;  %v5454_v40 = vsel %vm4816_vm0, 4294967295, %v5453_v40  ;;  %v5456_v33 = vand.u32 4294901760, %v5451_v9  ;;  %v5457_v11 = vld [vmem:[#allocation30_spill] sm:$0xff] }
 0x28a   : > { %5455 = vst [vmem:[#allocation17_spill] sm:$0xff] %v5454_v40  ;;  %v1722_v21 = vpack.c.b8 %v1721_v18, %v1721_v18  ;;  %v1723_v18 = vpack.c.b16 %v1661_v27, %v1661_v27 }
 0x28b   : > { %v2463_v22 = vpop.f32.mrf.mxu3  ;;  %v1572_v24 = vpop.f32.mrf.mxu1  ;;  %2557 = vmatmul.f32.gmra.mxu0 %v5451_v9 }
 0x28c   : > { %v2297_v36 = vpop.f32.mrf.mxu2  ;;  %v1573_v54 = vadd.f32 %v1572_v24, %v1427_v52  ;;  %v5458_v52 = vld [vmem:[#allocation40_spill] sm:$0xff]  ;;  %vm1756_vm8 = vnez %v1722_v21  ;;  %v1724_v27 = vpack.c.b8 %v1723_v18, %v1723_v18 }
 0x28d   : > { %v4814_v12 = vadd.f32 %v2463_v22, %v2297_v36  ;;  %v5459_v36 = vld [vmem:[#allocation31_spill] sm:$0xff]  ;;  %v5464_v21 = vld [vmem:[#allocation32_spill] sm:$0xff] }
 0x28e   : > { %v1618_v35 = vand.u32 2147483647, %v1573_v54  ;;  %2747 = vmatmul.f32.gmra.mxu1 %v5456_v33  ;;  %v1819_v54 = vunpack.c.0.s8 %v1787_v20  ;;  %v5463_v20 = vand.u32 4294901760, %v5459_v36 }
 0x28f   : > { %5452 = vst [vmem:[#allocation16_spill] sm:$0xff] %v4814_v12 }
 0x290   : > { %3085 = vmatmul.f32.gmra.mxu3 %v5457_v11  ;;  %v1430_v2 = vpop.f32.mrf.mxu0  ;;  %2939 = vmatmul.f32.gmra.mxu2 %v5457_v11  ;;  %v1882_v61 = vsel %vm4816_vm0, %v1618_v35, 0.0  ;;  %vm4838_vm0 = vcmp.ne.s32.totalorder %v1819_v54, 0  ;;  %v1788_v11 = vsel %vm1756_vm8, 16843009, %v5319_v0  ;;  %v5465_v54 = vld [vmem:[#allocation42_spill] sm:$0xff]  ;;  %vm1757_vm8 = vnez %v1724_v27  ;;  %v5472_v27 = vld [vmem:[#allocation45_spill] sm:$0xff] }
 0x291   : > { %v1431_v44 = vadd.f32 %v1430_v2, %v5458_v52  ;;  %v1913_v22 = vadd.f32 %v1912_v5, %v1882_v61  ;;  %v5461_v5 = vmov 0  ;;  %v3503_v2 = vmov 0.0  }
 0x292   : > { %v5462_v5 = vsel %vm4838_vm0, 4294967295, %v5461_v5  ;;  %337 = vst [vmem:[%s4836_s7] sm:$0x3] %v3503_v2  ;;  %v1662_v61 = vunpack.c.3.s8 %v4781_v41  ;;  %v5467_v41 = vmov 0 }
 0x293   : > { %v2467_v24 = vpop.f32.mrf.mxu3  ;;  %v1576_v9 = vpop.f32.mrf.mxu1  ;;  %2562 = vmatmul.f32.gmra.mxu0 %v5459_v36 }
 0x294   : > { %v2305_v33 = vpop.f32.mrf.mxu2  ;;  %v1577_v60 = vadd.f32 %v1576_v9, %v1431_v44  ;;  %v1820_v9 = vunpack.c.0.s8 %v1788_v11  ;;  %v1725_v18 = vpack.c.b16 %v1662_v61, %v1662_v61  ;;  %v5471_v11 = vld [vmem:[#allocation35_spill] sm:$0xff] }
 0x295   : > { %v4831_v12 = vadd.f32 %v2467_v24, %v2305_v33 }
 0x296   : > { %v1619_v35 = vand.u32 2147483647, %v1577_v60  ;;  %2753 = vmatmul.f32.gmra.mxu1 %v5463_v20  ;;  %v5466_v20 = vld [vmem:[#allocation34_spill] sm:$0xff]  ;;  %vm4855_vm2 = vcmp.ne.s32.totalorder %v1820_v9, 0 }
 0x297   : > { %5460 = vst [vmem:[#allocation18_spill] sm:$0xff] %v4831_v12  ;;  %v5468_v41 = vsel %vm4855_vm2, 4294967295, %v5467_v41 }
 0x298   : > { %3089 = vmatmul.f32.gmra.mxu3 %v5464_v21  ;;  %v1434_v52 = vpop.f32.mrf.mxu0  ;;  %2943 = vmatmul.f32.gmra.mxu2 %v5464_v21  ;;  %v1883_v44 = vsel %vm4838_vm0, %v1619_v35, 0.0  ;;  %5469 = vst [vmem:[#allocation19_spill] sm:$0xff] %v5468_v41  ;;  %v5470_v35 = vand.u32 4294901760, %v5466_v20 }
 0x299   : > { %v1435_v60 = vadd.f32 %v1434_v52, %v5465_v54  ;;  %v1914_v24 = vadd.f32 %v1913_v22, %v1883_v44  ;;  %v1789_v22 = vsel %vm1757_vm8, 16843009, %v5319_v0  ;;  %v1726_v52 = vpack.c.b8 %v1725_v18, %v1725_v18 }
 0x29a   : > { %v5474_v18 = vmov 0 }
 0x29b   : > { %v2471_v36 = vpop.f32.mrf.mxu3  ;;  %v1580_v33 = vpop.f32.mrf.mxu1  ;;  %2567 = vmatmul.f32.gmra.mxu0 %v5466_v20  ;;  %vm1758_vm0 = vnez %v1726_v52 }
 0x29c   : > { %v2313_v40 = vpop.f32.mrf.mxu2  ;;  %v1581_v2 = vadd.f32 %v1580_v33, %v1435_v60  ;;  %v1821_v60 = vunpack.c.0.s8 %v1789_v22  ;;  %v5473_v33 = vld [vmem:[#allocation37_spill] sm:$0xff]  ;;  %v5478_v22 = vld [vmem:[#allocation38_spill] sm:$0xff] }
 0x29d   : > { %v4853_v12 = vadd.f32 %v2471_v36, %v2313_v40 }
 0x29e   : > { %v1620_v21 = vand.u32 2147483647, %v1581_v2  ;;  %2759 = vmatmul.f32.gmra.mxu1 %v5470_v35  ;;  %vm4870_vm8 = vcmp.ne.s32.totalorder %v1821_v60, 0 }
 0x29f   : > { %v5475_v18 = vsel %vm4870_vm8, 4294967295, %v5474_v18 }
 0x2a0   : > { %3093 = vmatmul.f32.gmra.mxu3 %v5471_v11  ;;  %v1438_v44 = vpop.f32.mrf.mxu0  ;;  %2947 = vmatmul.f32.gmra.mxu2 %v5471_v11  ;;  %v1884_v40 = vsel %vm4855_vm2, %v1620_v21, 0.0  ;;  %5476 = vst [vmem:[#allocation20_spill] sm:$0xff] %v5475_v18  ;;  %v5477_v21 = vand.u32 4294901760, %v5473_v33 }
 0x2a1   : > { %v1439_v61 = vadd.f32 %v1438_v44, %v5472_v27  ;;  %v1915_v54 = vadd.f32 %v1914_v24, %v1884_v40  ;;  %v1790_v24 = vsel %vm1758_vm0, 16843009, %v5319_v0  ;;  %v5479_v40 = vld [vmem:[#allocation48_spill] sm:$0xff]  ;;  %v5482_v0 = vmov 0 }
 0x2a2   : > { %v1822_v60 = vunpack.c.0.s8 %v1790_v24 }
 0x2a3   : > { %v2475_v9 = vpop.f32.mrf.mxu3  ;;  %v1584_v36 = vpop.f32.mrf.mxu1  ;;  %2572 = vmatmul.f32.gmra.mxu0 %v5473_v33 }
 0x2a4   : > { %v2321_v20 = vpop.f32.mrf.mxu2  ;;  %v1585_v2 = vadd.f32 %v1584_v36, %v1439_v61  ;;  %vm4885_vm0 = vcmp.ne.s32.totalorder %v1822_v60, 0  ;;  %v5488_v60 = vld [vmem:[#allocation43_spill] sm:$0xff] }
 0x2a5   : > { %v4868_v35 = vadd.f32 %v2475_v9, %v2321_v20  ;;  %v5480_v20 = vld [vmem:[#allocation39_spill] sm:$0xff]  ;;  %v5483_v0 = vsel %vm4885_vm0, 4294967295, %v5482_v0 }
 0x2a6   : > { %v1621_v11 = vand.u32 2147483647, %v1585_v2  ;;  %2765 = vmatmul.f32.gmra.mxu1 %v5477_v21  ;;  %5484 = vst [vmem:[#allocation22_spill] sm:$0xff] %v5483_v0  ;;  %v5485_v18 = vand.u32 4294901760, %v5480_v20 }
 0x2a8   : > { %3097 = vmatmul.f32.gmra.mxu3 %v5478_v22  ;;  %v1442_v44 = vpop.f32.mrf.mxu0  ;;  %2951 = vmatmul.f32.gmra.mxu2 %v5478_v22  ;;  %v1885_v52 = vsel %vm4870_vm8, %v1621_v11, 0.0  ;;  %v5486_v11 = vld [vmem:[#allocation41_spill] sm:$0xff] }
 0x2a9   : > { %v1443_v27 = vadd.f32 %v1442_v44, %v5479_v40  ;;  %v1916_v61 = vadd.f32 %v1915_v54, %v1885_v52  ;;  %v5487_v44 = vld [vmem:[#allocation49_spill] sm:$0xff] }
 0x2ab   : > { %v2479_v9 = vpop.f32.mrf.mxu3  ;;  %v1588_v36 = vpop.f32.mrf.mxu1  ;;  %2577 = vmatmul.f32.gmra.mxu0 %v5480_v20 }
 0x2ac   : > { %v2329_v33 = vpop.f32.mrf.mxu2  ;;  %v1589_v2 = vadd.f32 %v1588_v36, %v1443_v27 }
 0x2ad   : > { %v4883_v21 = vadd.f32 %v2479_v9, %v2329_v33 }
 0x2ae   : > { %v1622_v22 = vand.u32 2147483647, %v1589_v2  ;;  %2771 = vmatmul.f32.gmra.mxu1 %v5485_v18 }
 0x2af   : > { %5481 = vst [vmem:[#allocation21_spill] sm:$0xff] %v4883_v21  ;;  %v5489_v21 = vand.u32 4294901760, %v5488_v60 }
 0x2b0   : > { %3101 = vmatmul.f32.gmra.mxu3 %v5486_v11  ;;  %v2503_v54 = vpop.f32.mrf.mxu0  ;;  %2955 = vmatmul.f32.gmra.mxu2 %v5486_v11  ;;  %v1886_v24 = vsel %vm4885_vm0, %v1622_v22, 0.0  ;;  %v5490_v11 = vld [vmem:[#allocation44_spill] sm:$0xff] }
 0x2b1   : > { %v2504_v52 = vadd.f32 %v2503_v54, %v5487_v44  ;;  %v1917_v40 = vadd.f32 %v1916_v61, %v1886_v24  ;;  %v5491_v44 = vld [vmem:[#allocation46_spill] sm:$0xff] }
 0x2b3   : > { %v3038_v27 = vpop.f32.mrf.mxu3  ;;  %2582 = vmatmul.f32.gmra.mxu0 %v5488_v60  ;;  %v2682_v9 = vpop.f32.mrf.mxu1  ;;  %v1918_v33 = vrot.slane %v1917_v40, 4  ;;  %v1924_v60 = vld [vmem:[%s4836_s7] sm:$0x1] }
 0x2b4   : > { %v2892_v36 = vpop.f32.mrf.mxu2  ;;  %v2683_v2 = vadd.f32 %v2682_v9, %v2504_v52 }
 0x2b5   : > { %v1919_v20 = vadd.f32 %v1918_v33, %v1917_v40 }
 0x2b6   : > { %v2893_v18 = vadd.f32 %v2892_v36, %v2683_v2  ;;  %2777 = vmatmul.f32.gmra.mxu1 %v5489_v21  ;;  %v5492_v2 = vand.u32 4294901760, %v5491_v44 }
 0x2b7   : > { %v1920_v0 = vrot.slane %v1919_v20, 2 }
 0x2b8   : > { %3105 = vmatmul.f32.gmra.mxu3 %v5490_v11  ;;  %v3039_v22 = vadd.f32 %v3038_v27, %v2893_v18  ;;  %v2508_v41 = vpop.f32.mrf.mxu0  ;;  %2959 = vmatmul.f32.gmra.mxu2 %v5490_v11 }
 0x2b9   : > { %v2509_v61 = vadd.f32 %v2508_v41, %v4240_v23  ;;  %v1921_v54 = vadd.f32 %v1920_v0, %v1919_v20 }
 0x2ba   : > { %v3165_v18 = vand.u32 2147483647, %v3039_v22 }
 0x2bb   : > { %v3042_v24 = vpop.f32.mrf.mxu3  ;;  %2587 = vmatmul.f32.gmra.mxu0 %v5491_v44  ;;  %v2688_v52 = vpop.f32.mrf.mxu1  ;;  %v1922_v9 = vrot.slane %v1921_v54, 1 }
 0x2bc   : > { %v2896_v40 = vpop.f32.mrf.mxu2  ;;  %v2689_v36 = vadd.f32 %v2688_v52, %v2509_v61  ;;  %v5493_v61 = vld [vmem:[#allocation47_spill] sm:$0xff]  ;;  %v3197_v44 = vsel %vm4245_vm6, %v3165_v18, 0.0  ;;  %v5497_v18 = vld [vmem:[#allocation50_spill] sm:$0xff]  ;;  %vm5529_vm6 = vnez %v5373_v1 }
 0x2bd   : > { %v1923_v21 = vadd.f32 %v1922_v9, %v1921_v54 }
 0x2be   : > { %v2897_v33 = vadd.f32 %v2896_v40, %v2689_v36  ;;  %2783 = vmatmul.f32.gmra.mxu1 %v5492_v2  ;;  %v5499_v40 = vand.u32 4294901760, %v5497_v18 }
 0x2bf   : > { %v1925_v27 = vadd.f32 %v1924_v60, %v1923_v21 }
 0x2c0   : > { %3109 = vmatmul.f32.gmra.mxu3 %v4193_v26  ;;  %v3043_v23 = vadd.f32 %v3042_v24, %v2897_v33  ;;  %v2513_v41 = vpop.f32.mrf.mxu0  ;;  %2963 = vmatmul.f32.gmra.mxu2 %v4193_v26  ;;  %v5496_v26 = vand.u32 4294901760, %v5493_v61 }
 0x2c1   : > { %v2514_v0 = vadd.f32 %v2513_v41, %v4273_v39  ;;  %1926 = vst [vmem:[%s4836_s7] sm:$0x1] %v1925_v27 }
 0x2c2   : > { %v3166_v20 = vand.u32 2147483647, %v3043_v23 }
 0x2c3   : > { %v3046_v11 = vpop.f32.mrf.mxu3  ;;  %2592 = vmatmul.f32.gmra.mxu0 %v5493_v61  ;;  %v2694_v54 = vpop.f32.mrf.mxu1 }
 0x2c4   : > { %v2900_v52 = vpop.f32.mrf.mxu2  ;;  %v3198_v36 = vsel %vm4249_vm7, %v3166_v20, 0.0  ;;  %v2695_v22 = vadd.f32 %v2694_v54, %v2514_v0  ;;  %vm5533_vm7 = vnez %v5376_v55 }
 0x2c5   : > { %v3229_v24 = vadd.f32 %v3198_v36, %v3197_v44  ;;  %v5500_v36 = vld [vmem:[#allocation53_spill] sm:$0xff] }
 0x2c6   : > { %v2901_v60 = vadd.f32 %v2900_v52, %v2695_v22  ;;  %2789 = vmatmul.f32.gmra.mxu1 %v5496_v26 }
 0x2c8   : > { %3113 = vmatmul.f32.gmra.mxu3 %v4214_v62  ;;  %v3047_v39 = vadd.f32 %v3046_v11, %v2901_v60  ;;  %v2518_v21 = vpop.f32.mrf.mxu0  ;;  %2967 = vmatmul.f32.gmra.mxu2 %v4214_v62 }
 0x2c9   : > { %v2519_v33 = vadd.f32 %v2518_v21, %v4302_v57 }
 0x2ca   : > { %v3167_v2 = vand.u32 2147483647, %v3047_v39 }
 0x2cb   : > { %v3050_v27 = vpop.f32.mrf.mxu3  ;;  %2597 = vmatmul.f32.gmra.mxu0 %v5497_v18  ;;  %v2700_v23 = vpop.f32.mrf.mxu1 }
 0x2cc   : > { %v2904_v41 = vpop.f32.mrf.mxu2  ;;  %v3199_v20 = vsel %vm4278_vm9, %v3167_v2, 0.0  ;;  %v2701_v54 = vadd.f32 %v2700_v23, %v2519_v33  ;;  %v5502_v2 = vand.u32 4294901760, %v5500_v36  ;;  %vm5535_vm9 = vnez %v5379_v29 }
 0x2cd   : > { %v3230_v61 = vadd.f32 %v3229_v24, %v3199_v20 }
 0x2ce   : > { %v2905_v52 = vadd.f32 %v2904_v41, %v2701_v54  ;;  %2795 = vmatmul.f32.gmra.mxu1 %v5499_v40  ;;  %v5503_v41 = vld [vmem:[#allocation55_spill] sm:$0xff] }
 0x2d0   : > { %3117 = vmatmul.f32.gmra.mxu3 %v4238_v15  ;;  %v3051_v62 = vadd.f32 %v3050_v27, %v2905_v52  ;;  %v2523_v11 = vpop.f32.mrf.mxu0  ;;  %2971 = vmatmul.f32.gmra.mxu2 %v4238_v15 }
 0x2d1   : > { %v2524_v57 = vadd.f32 %v2523_v11, %v4330_v6  ;;  %v5505_v11 = vand.u32 4294901760, %v5503_v41 }
 0x2d2   : > { %v3168_v44 = vand.u32 2147483647, %v3051_v62 }
 0x2d3   : > { %v3054_v9 = vpop.f32.mrf.mxu3  ;;  %2602 = vmatmul.f32.gmra.mxu0 %v5500_v36  ;;  %v2706_v22 = vpop.f32.mrf.mxu1  ;;  %v5506_v36 = vld [vmem:[#allocation57_spill] sm:$0xff] }
 0x2d4   : > { %v2908_v60 = vpop.f32.mrf.mxu2  ;;  %v3200_v24 = vsel %vm4305_vm11, %v3168_v44, 0.0  ;;  %v2707_v39 = vadd.f32 %v2706_v22, %v2524_v57  ;;  %vm5537_vm11 = vnez %v5381_v13 }
 0x2d5   : > { %v3231_v21 = vadd.f32 %v3230_v61, %v3200_v24 }
 0x2d6   : > { %v2909_v33 = vadd.f32 %v2908_v60, %v2707_v39  ;;  %2801 = vmatmul.f32.gmra.mxu1 %v5502_v2  ;;  %v5508_v2 = vand.u32 4294901760, %v5506_v36 }
 0x2d8   : > { %3121 = vmatmul.f32.gmra.mxu3 %v4276_v17  ;;  %v3055_v15 = vadd.f32 %v3054_v9, %v2909_v33  ;;  %v2528_v27 = vpop.f32.mrf.mxu0  ;;  %2975 = vmatmul.f32.gmra.mxu2 %v4276_v17 }
 0x2d9   : > { %v2529_v6 = vadd.f32 %v2528_v27, %v4356_v31 }
 0x2da   : > { %v3169_v18 = vand.u32 2147483647, %v3055_v15 }
 0x2db   : > { %v3058_v23 = vpop.f32.mrf.mxu3  ;;  %2607 = vmatmul.f32.gmra.mxu0 %v5503_v41  ;;  %v2712_v0 = vpop.f32.mrf.mxu1 }
 0x2dc   : > { %v2912_v20 = vpop.f32.mrf.mxu2  ;;  %v3201_v61 = vsel %vm4332_vm13, %v3169_v18, 0.0  ;;  %v2713_v52 = vadd.f32 %v2712_v0, %v2529_v6  ;;  %v5509_v18 = vld [vmem:[#allocation59_spill] sm:$0xff] }
 0x2dd   : > { %v3232_v40 = vadd.f32 %v3231_v21, %v3201_v61 }
 0x2de   : > { %v2913_v62 = vadd.f32 %v2912_v20, %v2713_v52  ;;  %2807 = vmatmul.f32.gmra.mxu1 %v5505_v11 }
 0x2e0   : > { %3125 = vmatmul.f32.gmra.mxu3 %v4300_v46  ;;  %v3059_v17 = vadd.f32 %v3058_v23, %v2913_v62  ;;  %v2533_v57 = vpop.f32.mrf.mxu0  ;;  %2979 = vmatmul.f32.gmra.mxu2 %v4300_v46 }
 0x2e1   : > { %v2534_v31 = vadd.f32 %v2533_v57, %v4385_v30  ;;  %v5512_v57 = vld [vmem:[#allocation61_spill] sm:$0xff] }
 0x2e2   : > { %v3170_v44 = vand.u32 2147483647, %v3059_v17 }
 0x2e3   : > { %v3062_v9 = vpop.f32.mrf.mxu3  ;;  %2612 = vmatmul.f32.gmra.mxu0 %v5506_v36  ;;  %v2718_v22 = vpop.f32.mrf.mxu1 }
 0x2e4   : > { %v2916_v60 = vpop.f32.mrf.mxu2  ;;  %v3202_v24 = vsel %vm4363_vm1, %v3170_v44, 0.0  ;;  %v2719_v39 = vadd.f32 %v2718_v22, %v2534_v31 }
 0x2e5   : > { %v3233_v21 = vadd.f32 %v3232_v40, %v3202_v24  ;;  %v5511_v40 = vand.u32 4294901760, %v5509_v18  ;;  %v5514_v24 = vand.u32 4294901760, %v5512_v57 }
 0x2e6   : > { %v2917_v33 = vadd.f32 %v2916_v60, %v2719_v39  ;;  %2813 = vmatmul.f32.gmra.mxu1 %v5508_v2  ;;  %v5515_v2 = vld [vmem:[#allocation63_spill] sm:$0xff] }
 0x2e8   : > { %3129 = vmatmul.f32.gmra.mxu3 %v4328_v50  ;;  %v3063_v46 = vadd.f32 %v3062_v9, %v2917_v33  ;;  %v2538_v15 = vpop.f32.mrf.mxu0  ;;  %2983 = vmatmul.f32.gmra.mxu2 %v4328_v50 }
 0x2e9   : > { %v2539_v30 = vadd.f32 %v2538_v15, %v4414_v16 }
 0x2ea   : > { %v3171_v27 = vand.u32 2147483647, %v3063_v46 }
 0x2eb   : > { %v3066_v6 = vpop.f32.mrf.mxu3  ;;  %2617 = vmatmul.f32.gmra.mxu0 %v5509_v18  ;;  %v2724_v23 = vpop.f32.mrf.mxu1 }
 0x2ec   : > { %v2920_v41 = vpop.f32.mrf.mxu2  ;;  %v3203_v20 = vsel %vm4390_vm3, %v3171_v27, 0.0  ;;  %v2725_v54 = vadd.f32 %v2724_v23, %v2539_v30  ;;  %v5525_v30 = vld [vmem:[#allocation70_spill] sm:$0xff]  ;;  %vm5542_vm3 = vnez %v5396_v53 }
 0x2ed   : > { %v3234_v61 = vadd.f32 %v3233_v21, %v3203_v20 }
 0x2ee   : > { %v2921_v52 = vadd.f32 %v2920_v41, %v2725_v54  ;;  %2819 = vmatmul.f32.gmra.mxu1 %v5511_v40  ;;  %v5517_v41 = vand.u32 4294901760, %v5515_v2 }
 0x2f0   : > { %3133 = vmatmul.f32.gmra.mxu3 %v4358_v48  ;;  %v3067_v50 = vadd.f32 %v3066_v6, %v2921_v52  ;;  %v2543_v62 = vpop.f32.mrf.mxu0  ;;  %2987 = vmatmul.f32.gmra.mxu2 %v4358_v48 }
 0x2f1   : > { %v2544_v16 = vadd.f32 %v2543_v62, %v4442_v28 }
 0x2f2   : > { %v3172_v11 = vand.u32 2147483647, %v3067_v50 }
 0x2f3   : > { %v3070_v17 = vpop.f32.mrf.mxu3  ;;  %2622 = vmatmul.f32.gmra.mxu0 %v5512_v57  ;;  %v2730_v31 = vpop.f32.mrf.mxu1 }
 0x2f4   : > { %v2924_v44 = vpop.f32.mrf.mxu2  ;;  %v3204_v36 = vsel %vm4417_vm5, %v3172_v11, 0.0  ;;  %v2731_v22 = vadd.f32 %v2730_v31, %v2544_v16 }
 0x2f5   : > { %v3235_v60 = vadd.f32 %v3234_v61, %v3204_v36  ;;  %v5518_v61 = vld [vmem:[#allocation65_spill] sm:$0xff]  ;;  %v5521_v36 = vld [vmem:[#allocation67_spill] sm:$0xff] }
 0x2f6   : > { %v2925_v26 = vadd.f32 %v2924_v44, %v2731_v22  ;;  %2825 = vmatmul.f32.gmra.mxu1 %v5514_v24  ;;  %v5520_v57 = vand.u32 4294901760, %v5518_v61 }
 0x2f8   : > { %3137 = vmatmul.f32.gmra.mxu3 %v4388_v7  ;;  %v3071_v48 = vadd.f32 %v3070_v17, %v2925_v26  ;;  %v2548_v39 = vpop.f32.mrf.mxu0  ;;  %2991 = vmatmul.f32.gmra.mxu2 %v4388_v7 }
 0x2f9   : > { %v2549_v28 = vadd.f32 %v2548_v39, %v4468_v34 }
 0x2fa   : > { %v3173_v21 = vand.u32 2147483647, %v3071_v48 }
 0x2fb   : > { %v3074_v33 = vpop.f32.mrf.mxu3  ;;  %2627 = vmatmul.f32.gmra.mxu0 %v5515_v2  ;;  %v2736_v46 = vpop.f32.mrf.mxu1 }
 0x2fc   : > { %v2928_v15 = vpop.f32.mrf.mxu2  ;;  %v3205_v27 = vsel %vm4444_vm10, %v3173_v21, 0.0  ;;  %v2737_v6 = vadd.f32 %v2736_v46, %v2549_v28  ;;  %v5523_v21 = vand.u32 4294901760, %v5521_v36 }
 0x2fd   : > { %v3236_v18 = vadd.f32 %v3235_v60, %v3205_v27 }
 0x2fe   : > { %v2929_v23 = vadd.f32 %v2928_v15, %v2737_v6  ;;  %2831 = vmatmul.f32.gmra.mxu1 %v5517_v41 }
 0x300   : > { %3141 = vmatmul.f32.gmra.mxu3 %v4412_v8  ;;  %v3075_v7 = vadd.f32 %v3074_v33, %v2929_v23  ;;  %v2553_v0 = vpop.f32.mrf.mxu0  ;;  %2995 = vmatmul.f32.gmra.mxu2 %v4412_v8  ;;  %v5524_v33 = vld [vmem:[#allocation68_spill] sm:$0xff] }
 0x301   : > { %v2554_v34 = vadd.f32 %v2553_v0, %v4497_v47 }
 0x302   : > { %v3174_v20 = vand.u32 2147483647, %v3075_v7 }
 0x303   : > { %v3078_v54 = vpop.f32.mrf.mxu3  ;;  %2632 = vmatmul.f32.gmra.mxu0 %v5518_v61  ;;  %v2742_v52 = vpop.f32.mrf.mxu1 }
 0x304   : > { %v2932_v40 = vpop.f32.mrf.mxu2  ;;  %v3206_v62 = vsel %vm4475_vm15, %v3174_v20, 0.0  ;;  %v2743_v16 = vadd.f32 %v2742_v52, %v2554_v34  ;;  %v5527_v34 = vand.u32 4294901760, %v5525_v30 }
 0x305   : > { %v3237_v11 = vadd.f32 %v3236_v18, %v3206_v62 }
 0x306   : > { %v2933_v17 = vadd.f32 %v2932_v40, %v2743_v16  ;;  %2837 = vmatmul.f32.gmra.mxu1 %v5520_v57  ;;  %v5528_v40 = vld [vmem:[#allocation72_spill] sm:$0xff] }
 0x308   : > { %3145 = vmatmul.f32.gmra.mxu3 %v4440_v10  ;;  %v3079_v8 = vadd.f32 %v3078_v54, %v2933_v17  ;;  %v2558_v31 = vpop.f32.mrf.mxu0  ;;  %2999 = vmatmul.f32.gmra.mxu2 %v4440_v10 }
 0x309   : > { %v2559_v47 = vadd.f32 %v2558_v31, %v4526_v59  ;;  %v5531_v31 = vld [vmem:[#allocation73_spill] sm:$0xff] }
 0x30a   : > { %v3175_v44 = vand.u32 2147483647, %v3079_v8  ;;  %v5530_v8 = vand.u32 4294901760, %v5528_v40 }
 0x30b   : > { %v3082_v9 = vpop.f32.mrf.mxu3  ;;  %2637 = vmatmul.f32.gmra.mxu0 %v5521_v36  ;;  %v2748_v22 = vpop.f32.mrf.mxu1  ;;  %v5532_v36 = vld [vmem:[#allocation75_spill] sm:$0xff] }
 0x30c   : > { %v2936_v60 = vpop.f32.mrf.mxu2  ;;  %v3207_v24 = vsel %vm4505_vm4, %v3175_v44, 0.0  ;;  %v2749_v48 = vadd.f32 %v2748_v22, %v2559_v47  ;;  %vm5550_vm4 = vnez %v5420_v14 }
 0x30d   : > { %v3238_v39 = vadd.f32 %v3237_v11, %v3207_v24 }
 0x30e   : > { %v2937_v28 = vadd.f32 %v2936_v60, %v2749_v48  ;;  %2843 = vmatmul.f32.gmra.mxu1 %v5523_v21 }
 0x310   : > { %3149 = vmatmul.f32.gmra.mxu3 %v5524_v33  ;;  %v3083_v10 = vadd.f32 %v3082_v9, %v2937_v28  ;;  %v2563_v2 = vpop.f32.mrf.mxu0  ;;  %3003 = vmatmul.f32.gmra.mxu2 %v5524_v33 }
 0x311   : > { %v2564_v59 = vadd.f32 %v2563_v2, %v4552_v56 }
 0x312   : > { %v3176_v46 = vand.u32 2147483647, %v3083_v10 }
 0x313   : > { %v3086_v15 = vpop.f32.mrf.mxu3  ;;  %2642 = vmatmul.f32.gmra.mxu0 %v5525_v30  ;;  %v2754_v27 = vpop.f32.mrf.mxu1 }
 0x314   : > { %v2940_v6 = vpop.f32.mrf.mxu2  ;;  %v3208_v23 = vsel %vm4529_vm12, %v3176_v46, 0.0  ;;  %v2755_v41 = vadd.f32 %v2754_v27, %v2564_v59  ;;  %v5536_v27 = vand.u32 4294901760, %v4569_v19 }
 0x315   : > { %v3239_v7 = vadd.f32 %v3238_v39, %v3208_v23  ;;  %v5534_v39 = vand.u32 4294901760, %v5532_v36 }
 0x316   : > { %v2941_v0 = vadd.f32 %v2940_v6, %v2755_v41  ;;  %2849 = vmatmul.f32.gmra.mxu1 %v5527_v34 }
 0x318   : > { %3153 = vmatmul.f32.gmra.mxu3 %v4500_v38  ;;  %v3087_v20 = vadd.f32 %v3086_v15, %v2941_v0  ;;  %v2568_v54 = vpop.f32.mrf.mxu0  ;;  %3007 = vmatmul.f32.gmra.mxu2 %v4500_v38 }
 0x319   : > { %v2569_v56 = vadd.f32 %v2568_v54, %v4575_v43 }
 0x31a   : > { %v3177_v61 = vand.u32 2147483647, %v3087_v20 }
 0x31b   : > { %v3090_v52 = vpop.f32.mrf.mxu3  ;;  %2647 = vmatmul.f32.gmra.mxu0 %v5528_v40  ;;  %v2760_v50 = vpop.f32.mrf.mxu1 }
 0x31c   : > { %v2944_v62 = vpop.f32.mrf.mxu2  ;;  %v3209_v16 = vsel %vm5529_vm6, %v3177_v61, 0.0  ;;  %v2761_v11 = vadd.f32 %v2760_v50, %v2569_v56 }
 0x31d   : > { %v3240_v17 = vadd.f32 %v3239_v7, %v3209_v16 }
 0x31e   : > { %v2945_v57 = vadd.f32 %v2944_v62, %v2761_v11  ;;  %2855 = vmatmul.f32.gmra.mxu1 %v5530_v8  ;;  %v5538_v62 = vld [vmem:[#allocation4_spill] sm:$0xff] }
 0x31f   : > { %vm5539_vm13 = vnez %v5538_v62 }
 0x320   : > { %3157 = vmatmul.f32.gmra.mxu3 %v5531_v31  ;;  %v3091_v38 = vadd.f32 %v3090_v52, %v2945_v57  ;;  %v2573_v47 = vpop.f32.mrf.mxu0  ;;  %3011 = vmatmul.f32.gmra.mxu2 %v5531_v31 }
 0x321   : > { %v2574_v43 = vadd.f32 %v2573_v47, %v4596_v49 }
 0x322   : > { %v3178_v44 = vand.u32 2147483647, %v3091_v38 }
 0x323   : > { %v3094_v9 = vpop.f32.mrf.mxu3  ;;  %2652 = vmatmul.f32.gmra.mxu0 %v5532_v36  ;;  %v2766_v1 = vpop.f32.mrf.mxu1 }
 0x324   : > { %v2948_v22 = vpop.f32.mrf.mxu2  ;;  %v3210_v60 = vsel %vm5533_vm7, %v3178_v44, 0.0  ;;  %v2767_v26 = vadd.f32 %v2766_v1, %v2574_v43  ;;  %v5540_v44 = vld [vmem:[#allocation5_spill] sm:$0xff] }
 0x325   : > { %v3241_v24 = vadd.f32 %v3240_v17, %v3210_v60  ;;  %vm5541_vm1 = vnez %v5540_v44 }
 0x326   : > { %v2949_v48 = vadd.f32 %v2948_v22, %v2767_v26  ;;  %2861 = vmatmul.f32.gmra.mxu1 %v5534_v39 }
 0x328   : > { %3161 = vmatmul.f32.gmra.mxu3 %v4554_v25  ;;  %v3095_v28 = vadd.f32 %v3094_v9, %v2949_v48  ;;  %v2578_v21 = vpop.f32.mrf.mxu0  ;;  %3015 = vmatmul.f32.gmra.mxu2 %v4554_v25 }
 0x329   : > { %v2579_v49 = vadd.f32 %v2578_v21, %v4610_v45 }
 0x32a   : > { %v3179_v33 = vand.u32 2147483647, %v3095_v28 }
 0x32b   : > { %v3098_v10 = vpop.f32.mrf.mxu3  ;;  %2657 = vmatmul.f32.gmra.mxu0 %v4569_v19  ;;  %v2772_v55 = vpop.f32.mrf.mxu1 }
 0x32c   : > { %v2952_v2 = vpop.f32.mrf.mxu2  ;;  %v3211_v59 = vsel %vm5535_vm9, %v3179_v33, 0.0  ;;  %v2773_v46 = vadd.f32 %v2772_v55, %v2579_v49  ;;  %vm5564_vm9 = vnez %v5462_v5 }
 0x32d   : > { %v3242_v15 = vadd.f32 %v3241_v24, %v3211_v59 }
 0x32e   : > { %v2953_v30 = vadd.f32 %v2952_v2, %v2773_v46  ;;  %2867 = vmatmul.f32.gmra.mxu1 %v5536_v27  ;;  %v5543_v27 = vld [vmem:[#allocation6_spill] sm:$0xff] }
 0x32f   : > { %vm5544_vm5 = vnez %v5543_v27 }
 0x330   : > { %v3099_v6 = vadd.f32 %v3098_v10, %v2953_v30  ;;  %v2583_v18 = vpop.f32.mrf.mxu0 }
 0x331   : > { %v2584_v25 = vadd.f32 %v2583_v18, %v4625_v51 }
 0x332   : > { %v3180_v45 = vand.u32 2147483647, %v3099_v6 }
 0x333   : > { %v3102_v23 = vpop.f32.mrf.mxu3  ;;  %v2778_v41 = vpop.f32.mrf.mxu1 }
 0x334   : > { %v2956_v7 = vpop.f32.mrf.mxu2  ;;  %v3212_v0 = vsel %vm5537_vm11, %v3180_v45, 0.0  ;;  %v2779_v34 = vadd.f32 %v2778_v41, %v2584_v25 }
 0x335   : > { %v3243_v29 = vadd.f32 %v3242_v15, %v3212_v0 }
 0x336   : > { %v2957_v20 = vadd.f32 %v2956_v7, %v2779_v34 }
 0x338   : > { %v3103_v54 = vadd.f32 %v3102_v23, %v2957_v20  ;;  %v2588_v56 = vpop.f32.mrf.mxu0  ;;  %v5545_v23 = vld [vmem:[#allocation8_spill] sm:$0xff]  ;;  %v5546_v20 = vld [vmem:[#allocation7_spill] sm:$0xff] }
 0x339   : > { %v2589_v61 = vadd.f32 %v2588_v56, %v4642_v37  ;;  %vm5547_vm10 = vnez %v5546_v20  ;;  %v5556_v20 = vld [vmem:[#allocation13_spill] sm:$0xff] }
 0x33a   : > { %v3181_v19 = vand.u32 2147483647, %v3103_v54  ;;  %vm5557_vm6 = vnez %v5556_v20 }
 0x33b   : > { %v3106_v52 = vpop.f32.mrf.mxu3  ;;  %v2784_v40 = vpop.f32.mrf.mxu1 }
 0x33c   : > { %v2960_v50 = vpop.f32.mrf.mxu2  ;;  %v3213_v51 = vsel %vm5539_vm13, %v3181_v19, 0.0  ;;  %v2785_v16 = vadd.f32 %v2784_v40, %v2589_v61 }
 0x33d   : > { %v3244_v11 = vadd.f32 %v3243_v29, %v3213_v51 }
 0x33e   : > { %v2961_v17 = vadd.f32 %v2960_v50, %v2785_v16 }
 0x340   : > { %v3107_v57 = vadd.f32 %v3106_v52, %v2961_v17  ;;  %v2593_v13 = vpop.f32.mrf.mxu0 }
 0x341   : > { %v2594_v8 = vadd.f32 %v2593_v13, %v4661_v32 }
 0x342   : > { %v3182_v31 = vand.u32 2147483647, %v3107_v57 }
 0x343   : > { %v3110_v38 = vpop.f32.mrf.mxu3  ;;  %v2790_v47 = vpop.f32.mrf.mxu1 }
 0x344   : > { %v2964_v43 = vpop.f32.mrf.mxu2  ;;  %v3214_v37 = vsel %vm5541_vm1, %v3182_v31, 0.0  ;;  %v2791_v9 = vadd.f32 %v2790_v47, %v2594_v8 }
 0x345   : > { %v3245_v36 = vadd.f32 %v3244_v11, %v3214_v37  ;;  %v5548_v11 = vld [vmem:[#allocation9_spill] sm:$0xff] }
 0x346   : > { %v2965_v1 = vadd.f32 %v2964_v43, %v2791_v9  ;;  %vm5549_vm15 = vnez %v5548_v11 }
 0x348   : > { %v3111_v22 = vadd.f32 %v3110_v38, %v2965_v1  ;;  %v2598_v60 = vpop.f32.mrf.mxu0 }
 0x349   : > { %v2599_v26 = vadd.f32 %v2598_v60, %v4677_v42 }
 0x34a   : > { %v3183_v24 = vand.u32 2147483647, %v3111_v22 }
 0x34b   : > { %v3114_v48 = vpop.f32.mrf.mxu3  ;;  %v2796_v39 = vpop.f32.mrf.mxu1 }
 0x34c   : > { %v2968_v28 = vpop.f32.mrf.mxu2  ;;  %v3215_v32 = vsel %vm5542_vm3, %v3183_v24, 0.0  ;;  %v2797_v21 = vadd.f32 %v2796_v39, %v2599_v26 }
 0x34d   : > { %v3246_v49 = vadd.f32 %v3245_v36, %v3215_v32 }
 0x34e   : > { %v2969_v33 = vadd.f32 %v2968_v28, %v2797_v21  ;;  %v5551_v21 = vld [vmem:[#allocation10_spill] sm:$0xff] }
 0x34f   : > { %vm5552_vm12 = vnez %v5551_v21 }
 0x350   : > { %v3115_v10 = vadd.f32 %v3114_v48, %v2969_v33  ;;  %v2603_v55 = vpop.f32.mrf.mxu0 }
 0x351   : > { %v2604_v2 = vadd.f32 %v2603_v55, %v4693_v58 }
 0x352   : > { %v3184_v59 = vand.u32 2147483647, %v3115_v10 }
 0x353   : > { %v3118_v46 = vpop.f32.mrf.mxu3  ;;  %v2802_v15 = vpop.f32.mrf.mxu1 }
 0x354   : > { %v2972_v30 = vpop.f32.mrf.mxu2  ;;  %v3216_v42 = vsel %vm5544_vm5, %v3184_v59, 0.0  ;;  %v2803_v6 = vadd.f32 %v2802_v15, %v2604_v2  ;;  %v5553_v2 = vld [vmem:[#allocation12_spill] sm:$0xff] }
 0x355   : > { %v3247_v18 = vadd.f32 %v3246_v49, %v3216_v42 }
 0x356   : > { %v2973_v25 = vadd.f32 %v2972_v30, %v2803_v6 }
 0x358   : > { %v3119_v45 = vadd.f32 %v3118_v46, %v2973_v25  ;;  %v2608_v53 = vpop.f32.mrf.mxu0 }
 0x359   : > { %v2609_v41 = vadd.f32 %v2608_v53, %v5545_v23  ;;  %v5555_v23 = vld [vmem:[#allocation14_spill] sm:$0xff] }
 0x35a   : > { %v3185_v7 = vand.u32 2147483647, %v3119_v45 }
 0x35b   : > { %v3122_v0 = vpop.f32.mrf.mxu3  ;;  %v2808_v34 = vpop.f32.mrf.mxu1 }
 0x35c   : > { %v2976_v29 = vpop.f32.mrf.mxu2  ;;  %v3217_v58 = vsel %vm5547_vm10, %v3185_v7, 0.0  ;;  %v2809_v54 = vadd.f32 %v2808_v34, %v2609_v41 }
 0x35d   : > { %v3248_v56 = vadd.f32 %v3247_v18, %v3217_v58 }
 0x35e   : > { %v2977_v61 = vadd.f32 %v2976_v29, %v2809_v54 }
 0x360   : > { %v3123_v19 = vadd.f32 %v3122_v0, %v2977_v61  ;;  %v2613_v52 = vpop.f32.mrf.mxu0 }
 0x361   : > { %v2614_v40 = vadd.f32 %v2613_v52, %v4729_v3 }
 0x362   : > { %v3186_v50 = vand.u32 2147483647, %v3123_v19 }
 0x363   : > { %v3126_v62 = vpop.f32.mrf.mxu3  ;;  %v2814_v51 = vpop.f32.mrf.mxu1 }
 0x364   : > { %v2980_v16 = vpop.f32.mrf.mxu2  ;;  %v3218_v17 = vsel %vm5549_vm15, %v3186_v50, 0.0  ;;  %v2815_v57 = vadd.f32 %v2814_v51, %v2614_v40  ;;  %v5558_v40 = vld [vmem:[#allocation16_spill] sm:$0xff] }
 0x365   : > { %v3249_v13 = vadd.f32 %v3248_v56, %v3218_v17  ;;  %v5559_v17 = vld [vmem:[#allocation15_spill] sm:$0xff] }
 0x366   : > { %v2981_v8 = vadd.f32 %v2980_v16, %v2815_v57 }
 0x368   : > { %v3127_v31 = vadd.f32 %v3126_v62, %v2981_v8  ;;  %v2618_v38 = vpop.f32.mrf.mxu0 }
 0x369   : > { %v2619_v47 = vadd.f32 %v2618_v38, %v4745_v63 }
 0x36a   : > { %v3187_v43 = vand.u32 2147483647, %v3127_v31 }
 0x36b   : > { %v3130_v44 = vpop.f32.mrf.mxu3  ;;  %v2820_v37 = vpop.f32.mrf.mxu1 }
 0x36c   : > { %v2984_v9 = vpop.f32.mrf.mxu2  ;;  %v3219_v3 = vsel %vm5550_vm4, %v3187_v43, 0.0  ;;  %v2821_v36 = vadd.f32 %v2820_v37, %v2619_v47  ;;  %v5561_v43 = vld [vmem:[#allocation18_spill] sm:$0xff] }
 0x36d   : > { %v3250_v1 = vadd.f32 %v3249_v13, %v3219_v3 }
 0x36e   : > { %v2985_v22 = vadd.f32 %v2984_v9, %v2821_v36 }
 0x370   : > { %v3131_v60 = vadd.f32 %v3130_v44, %v2985_v22  ;;  %v2623_v26 = vpop.f32.mrf.mxu0 }
 0x371   : > { %v2624_v24 = vadd.f32 %v2623_v26, %v4761_v4 }
 0x372   : > { %v3188_v48 = vand.u32 2147483647, %v3131_v60 }
 0x373   : > { %v3134_v39 = vpop.f32.mrf.mxu3  ;;  %v2826_v28 = vpop.f32.mrf.mxu1 }
 0x374   : > { %v2988_v32 = vpop.f32.mrf.mxu2  ;;  %v3220_v63 = vsel %vm5552_vm12, %v3188_v48, 0.0  ;;  %v2827_v49 = vadd.f32 %v2826_v28, %v2624_v24 }
 0x375   : > { %v3251_v33 = vadd.f32 %v3250_v1, %v3220_v63  ;;  %v5562_v1 = vld [vmem:[#allocation17_spill] sm:$0xff] }
 0x376   : > { %v2989_v10 = vadd.f32 %v2988_v32, %v2827_v49  ;;  %vm5563_vm7 = vnez %v5562_v1 }
 0x378   : > { %v3135_v55 = vadd.f32 %v3134_v39, %v2989_v10  ;;  %v2628_v14 = vpop.f32.mrf.mxu0 }
 0x379   : > { %v2629_v59 = vadd.f32 %v2628_v14, %v5553_v2 }
 0x37a   : > { %v3189_v46 = vand.u32 2147483647, %v3135_v55 }
 0x37b   : > { %v3138_v15 = vpop.f32.mrf.mxu3  ;;  %v2832_v30 = vpop.f32.mrf.mxu1 }
 0x37c   : > { %v2992_v27 = vpop.f32.mrf.mxu2  ;;  %v3221_v4 = vsel %vm4763_vm14, %v3189_v46, 0.0  ;;  %v2833_v6 = vadd.f32 %v2832_v30, %v2629_v59  ;;  %vm5560_vm14 = vnez %v5559_v17  ;;  %v3266_v17 = vld [vmem:[%s4836_s7 + $0x1] sm:$0x1] }
 0x37d   : > { %v3252_v18 = vadd.f32 %v3251_v33, %v3221_v4 }
 0x37e   : > { %v2993_v25 = vadd.f32 %v2992_v27, %v2833_v6 }
 0x380   : > { %v3139_v45 = vadd.f32 %v3138_v15, %v2993_v25  ;;  %v2633_v53 = vpop.f32.mrf.mxu0 }
 0x381   : > { %v2634_v41 = vadd.f32 %v2633_v53, %v5555_v23  ;;  %v5566_v53 = vld [vmem:[#allocation21_spill] sm:$0xff] }
 0x382   : > { %v3190_v7 = vand.u32 2147483647, %v3139_v45 }
 0x383   : > { %v3142_v0 = vpop.f32.mrf.mxu3  ;;  %v2838_v34 = vpop.f32.mrf.mxu1 }
 0x384   : > { %v2996_v29 = vpop.f32.mrf.mxu2  ;;  %v3222_v58 = vsel %vm5557_vm6, %v3190_v7, 0.0  ;;  %v2839_v54 = vadd.f32 %v2838_v34, %v2634_v41 }
 0x385   : > { %v3253_v56 = vadd.f32 %v3252_v18, %v3222_v58 }
 0x386   : > { %v2997_v61 = vadd.f32 %v2996_v29, %v2839_v54 }
 0x388   : > { %v3143_v19 = vadd.f32 %v3142_v0, %v2997_v61  ;;  %v2638_v52 = vpop.f32.mrf.mxu0 }
 0x389   : > { %v2639_v50 = vadd.f32 %v2638_v52, %v5558_v40 }
 0x38a   : > { %v3191_v62 = vand.u32 2147483647, %v3143_v19 }
 0x38b   : > { %v3146_v51 = vpop.f32.mrf.mxu3  ;;  %v2844_v16 = vpop.f32.mrf.mxu1 }
 0x38c   : > { %v3000_v11 = vpop.f32.mrf.mxu2  ;;  %v3223_v57 = vsel %vm5560_vm14, %v3191_v62, 0.0  ;;  %v2845_v13 = vadd.f32 %v2844_v16, %v2639_v50 }
 0x38d   : > { %v3254_v8 = vadd.f32 %v3253_v56, %v3223_v57 }
 0x38e   : > { %v3001_v31 = vadd.f32 %v3000_v11, %v2845_v13 }
 0x390   : > { %v3147_v38 = vadd.f32 %v3146_v51, %v3001_v31  ;;  %v2643_v47 = vpop.f32.mrf.mxu0 }
 0x391   : > { %v2644_v44 = vadd.f32 %v2643_v47, %v5561_v43 }
 0x392   : > { %v3192_v37 = vand.u32 2147483647, %v3147_v38 }
 0x393   : > { %v3150_v9 = vpop.f32.mrf.mxu3  ;;  %v2850_v3 = vpop.f32.mrf.mxu1 }
 0x394   : > { %v3004_v36 = vpop.f32.mrf.mxu2  ;;  %v3224_v22 = vsel %vm5563_vm7, %v3192_v37, 0.0  ;;  %v2851_v60 = vadd.f32 %v2850_v3, %v2644_v44 }
 0x395   : > { %v3255_v26 = vadd.f32 %v3254_v8, %v3224_v22 }
 0x396   : > { %v3005_v24 = vadd.f32 %v3004_v36, %v2851_v60 }
 0x398   : > { %v3151_v48 = vadd.f32 %v3150_v9, %v3005_v24  ;;  %v2648_v39 = vpop.f32.mrf.mxu0 }
 0x399   : > { %v2649_v28 = vadd.f32 %v2648_v39, %v4853_v12 }
 0x39a   : > { %v3193_v32 = vand.u32 2147483647, %v3151_v48 }
 0x39b   : > { %v3154_v21 = vpop.f32.mrf.mxu3  ;;  %v2856_v63 = vpop.f32.mrf.mxu1 }
 0x39c   : > { %v3008_v49 = vpop.f32.mrf.mxu2  ;;  %v3225_v33 = vsel %vm5564_vm9, %v3193_v32, 0.0  ;;  %v2857_v10 = vadd.f32 %v2856_v63, %v2649_v28 }
 0x39d   : > { %v3256_v55 = vadd.f32 %v3255_v26, %v3225_v33 }
 0x39e   : > { %v3009_v14 = vadd.f32 %v3008_v49, %v2857_v10 }
 0x3a0   : > { %v3155_v2 = vadd.f32 %v3154_v21, %v3009_v14  ;;  %v2653_v59 = vpop.f32.mrf.mxu0 }
 0x3a1   : > { %v2654_v46 = vadd.f32 %v2653_v59, %v4868_v35 }
 0x3a2   : > { %v3194_v15 = vand.u32 2147483647, %v3155_v2 }
 0x3a3   : > { %v3158_v30 = vpop.f32.mrf.mxu3  ;;  %v2862_v27 = vpop.f32.mrf.mxu1 }
 0x3a4   : > { %v3012_v42 = vpop.f32.mrf.mxu2  ;;  %v3226_v12 = vsel %vm4855_vm2, %v3194_v15, 0.0  ;;  %v2863_v6 = vadd.f32 %v2862_v27, %v2654_v46 }
 0x3a5   : > { %v3257_v18 = vadd.f32 %v3256_v55, %v3226_v12 }
 0x3a6   : > { %v3013_v25 = vadd.f32 %v3012_v42, %v2863_v6 }
 0x3a8   : > { %v3159_v45 = vadd.f32 %v3158_v30, %v3013_v25  ;;  %v2658_v5 = vpop.f32.mrf.mxu0 }
 0x3a9   : > { %v2659_v23 = vadd.f32 %v2658_v5, %v5566_v53 }
 0x3aa   : > { %v3195_v41 = vand.u32 2147483647, %v3159_v45 }
 0x3ab   : > { %v2868_v7 = vpop.f32.mrf.mxu1  ;;  %v3162_v58 = vpop.f32.mrf.mxu3 }
 0x3ac   : > { %v3016_v0 = vpop.f32.mrf.mxu2  ;;  %v3227_v35 = vsel %vm4870_vm8, %v3195_v41, 0.0  ;;  %v2869_v29 = vadd.f32 %v2868_v7, %v2659_v23 }
 0x3ad   : > { %v3258_v20 = vadd.f32 %v3257_v18, %v3227_v35 }
 0x3ae   : > { %v3017_v54 = vadd.f32 %v3016_v0, %v2869_v29 }
 0x3b0   : > { %v3163_v56 = vadd.f32 %v3162_v58, %v3017_v54 }
 0x3b2   : > { %v3196_v61 = vand.u32 2147483647, %v3163_v56 }
 0x3b4   : > { %v3228_v52 = vsel %vm4885_vm0, %v3196_v61, 0.0 }
 0x3b5   : > { %v3259_v40 = vadd.f32 %v3258_v20, %v3228_v52 }
 0x3b7   : > { %v3260_v50 = vrot.slane %v3259_v40, 4 }
 0x3b9   : > { %v3261_v62 = vadd.f32 %v3260_v50, %v3259_v40 }
 0x3bb   : > { %v3262_v51 = vrot.slane %v3261_v62, 2 }
 0x3bd   : > { %v3263_v16 = vadd.f32 %v3262_v51, %v3261_v62 }
 0x3bf   : > { %v3264_v11 = vrot.slane %v3263_v16, 1 }
 0x3c1   : > { %v3265_v57 = vadd.f32 %v3264_v11, %v3263_v16 }
 0x3c3   : > { %v3267_v13 = vadd.f32 %v3266_v17, %v3265_v57 }
 0x3c5   : > { %3268 = vst [vmem:[%s4836_s7 + $0x1] sm:$0x1] %v3267_v13 }
 0x3c6 PF: > { %s13_s16 = sadd.s32 1, %s3500_s16   ;;  %s5569_s12 = smov %s3488_s13 }
 0x3c7   : > { %p10_p10 = scmp.ge.s32.totalorder %s13_s16, 4   ;;  %s5570_s13 = smov %s3563_s21 }
 0x3c8   : > { %s5571_s14 = smov %s3496_s15  ;;  %s5572_s15 = smov %s5574_s17 }
 0x3c9   :  { %12 = sbr.rel (!%p10_p10) target bundleno = 3 (0x3), region = 160 }

</bundles_post_ra>
